<compile_context>
chip_gen: v6e
topology: v6e:2x2x1
jax: 0.10.0
libtpu: 0.0.40
codegen_flags: <defaults>
</compile_context>

<pallas_src>
import jax
import jax.numpy as jnp
from jax.experimental import pallas as pl
from jax.experimental.pallas import tpu as pltpu

_LANE_CANDIDATES = (2048, 1024, 512, 256, 128)
_SMALL_FALLBACK_ELEMS = 256 * 2048  # below ~512K elements, let XLA fuse.


def _chip_config():
    """Returns (target_tile_bytes, vmem_limit_bytes_or_None) per generation."""
    try:
        kind = jax.devices()[0].device_kind.lower()
    except Exception:
        kind = ""
    if "v7" in kind:
        # 8 MiB tiles; 2 in + 2 out double buffers = 32 MiB -> raise scoped VMEM.
        return 8 << 20, 48 << 20
    if "v6" in kind:
        # 4 MiB tiles; 16 MiB of buffers fits the 32 MiB default scoped VMEM.
        return 4 << 20, None
    # v5e / unknown: 2 MiB tiles; 8 MiB of buffers < 16 MiB default scoped VMEM.
    return 2 << 20, None


def _sigmoid_kernel(x_ref, o_ref):
    # Upcast to f32 (required for v5e's EUP on sub-32-bit inputs; no-op for f32).
    x = x_ref[...].astype(jnp.float32)
    # sigmoid(x) == 0.5 * tanh(0.5 * x) + 0.5  -> single EUP op per element.
    o_ref[...] = (0.5 * jnp.tanh(0.5 * x) + 0.5).astype(o_ref.dtype)


def egnet_forward(x):
    """egNet.forward == elementwise Sigmoid, as a tiled Pallas TPU kernel."""
    orig_shape = x.shape
    dtype = x.dtype
    total = x.size

    # Small tensors: pallas_call launch overhead dominates; let XLA fuse.
    if total < _SMALL_FALLBACK_ELEMS:
        return jax.nn.sigmoid(x)

    itemsize = jnp.dtype(dtype).itemsize
    sublane_mult = 8 * max(1, 4 // itemsize)  # 8 (f32), 16 (bf16), 32 (int8/fp8)

    # Widest lane count that divides total -> zero-copy reshape, no lane padding.
    lanes = None
    for cand in _LANE_CANDIDATES:
        if total % cand == 0:
            lanes = cand
            break

    flat = x.reshape(-1)
    padded = lanes is None
    if padded:
        # Rare fallback: total not divisible by 128; pad only the tail row.
        lanes = 128
        rows = pl.cdiv(total, lanes)
        flat = jnp.pad(flat, (0, rows * lanes - total))
    else:
        rows = total // lanes
    x2d = flat.reshape(rows, lanes)

    tile_bytes, vmem_limit = _chip_config()
    tile_rows = max(sublane_mult, tile_bytes // (lanes * itemsize))
    tile_rows = (tile_rows // sublane_mult) * sublane_mult
    # Don't tile bigger than the (sublane-rounded) array itself.
    rows_rounded = pl.cdiv(rows, sublane_mult) * sublane_mult
    tile_rows = min(tile_rows, rows_rounded)

    # Last grid block may overrun `rows`; Pallas masks edge blocks (elementwise).
    grid = (pl.cdiv(rows, tile_rows),)

    cp_kwargs = dict(dimension_semantics=("parallel",))
    if vmem_limit is not None:
        cp_kwargs["vmem_limit_bytes"] = vmem_limit

    out2d = pl.pallas_call(
        _sigmoid_kernel,
        out_shape=jax.ShapeDtypeStruct((rows, lanes), dtype),
        grid=grid,
        in_specs=[pl.BlockSpec((tile_rows, lanes), lambda i: (i, 0))],
        out_specs=pl.BlockSpec((tile_rows, lanes), lambda i: (i, 0)),
        compiler_params=pltpu.CompilerParams(**cp_kwargs),
    )(x2d)

    out = out2d.reshape(-1)
    if padded:
        out = out[:total]  # slice only on the (rare) padded path
    return out.reshape(orig_shape)


if __name__ == "__main__":
    # egNet has no learnable parameters (ReLU/Sigmoid only); nothing to init.
    key = jax.random.PRNGKey(0)
    k1, k2 = jax.random.split(key)

    # 1) Spec-sized input (2,4,16,16): small-tensor fallback path.
    x_small = jax.random.normal(k1, (2, 4, 16, 16), dtype=jnp.float32)
    out_small = jax.block_until_ready(egnet_forward(x_small))
    ref_small = jax.nn.sigmoid(x_small)
    assert out_small.shape == x_small.shape and out_small.dtype == x_small.dtype
    assert jnp.allclose(out_small, ref_small, atol=1e-6), "small-path mismatch"

    # 2) Input large enough to exercise the Pallas kernel path, with a row count
    #    (258) that is not a tile multiple -> exercises the masked edge block.
    x_big = jax.random.normal(k2, (4, 8, 128, 129), dtype=jnp.float32)
    out_big = jax.block_until_ready(egnet_forward(x_big))
    ref_big = jax.nn.sigmoid(x_big)
    assert out_big.shape == x_big.shape and out_big.dtype == x_big.dtype
    assert jnp.allclose(out_big, ref_big, atol=1e-6), "kernel-path mismatch"

    print("KERNEL_OK")
</pallas_src>

<mosaic_0001>
module attributes {stable_mosaic.version = 11 : i64} {
  func.func @_sigmoid_kernel(%arg0: i32, %arg1: memref<256x2048xf32, #tpu.memory_space<vmem>>, %arg2: memref<256x2048xf32, #tpu.memory_space<vmem>>) attributes {dimension_semantics = [#tpu.dimension_semantics<parallel>], iteration_bounds = array<i64: 2>, scalar_prefetch = 0 : i64, scratch_operands = 0 : i64, tpu.core_type = #tpu.core_type<tc>, window_params = [{transform_indices = @transform_0, window_bounds = array<i64: 256, 2048>}, {transform_indices = @transform_1, window_bounds = array<i64: 256, 2048>}]} {
    %c0 = arith.constant 0 : index
    %c0_0 = arith.constant 0 : index
    %0 = vector.load %arg1[%c0, %c0_0] : memref<256x2048xf32, #tpu.memory_space<vmem>>, vector<256x2048xf32>
    %cst = arith.constant 5.000000e-01 : f32
    %1 = vector.broadcast %cst : f32 to vector<256x2048xf32>
    %2 = arith.mulf %1, %0 : vector<256x2048xf32>
    %3 = math.tanh %2 : vector<256x2048xf32>
    %cst_1 = arith.constant 5.000000e-01 : f32
    %4 = vector.broadcast %cst_1 : f32 to vector<256x2048xf32>
    %5 = arith.mulf %4, %3 : vector<256x2048xf32>
    %cst_2 = arith.constant 5.000000e-01 : f32
    %6 = vector.broadcast %cst_2 : f32 to vector<256x2048xf32>
    %7 = arith.addf %5, %6 : vector<256x2048xf32>
    %c0_3 = arith.constant 0 : index
    %c0_4 = arith.constant 0 : index
    %8 = vector.load %arg2[%c0_3, %c0_4] : memref<256x2048xf32, #tpu.memory_space<vmem>>, vector<256x2048xf32>
    tpu.vector_store %arg2[%c0_3, %c0_4], %7 {strides = array<i32>} : memref<256x2048xf32, #tpu.memory_space<vmem>>, vector<256x2048xf32>,
    return
  }
  func.func @transform_0(%arg0: i32) -> (i32, i32) {
    %c0_i32 = arith.constant 0 : i32
    %c0_i32_0 = arith.constant 0 : i32
    return %arg0, %c0_i32 : i32, i32
  }
  func.func @transform_1(%arg0: i32) -> (i32, i32) {
    %c0_i32 = arith.constant 0 : i32
    %c0_i32_0 = arith.constant 0 : i32
    return %arg0, %c0_i32 : i32, i32
  }
}

</mosaic_0001>

<bundles_post_ra>
// kernel: tpu_custom_call.1
= control target key start
LH: loop header
LB: loop body
LE: loop exit
PB: predicated region body
PF: predicated region fallthrough
CT: control target
= control target key end

     0   :  { %6 = vsyncpa [#allocation3], 0  ;;  %s5730_s0 = inlined_call_operand.hbm [shape: f32[258,2048], index: 0, kind: input, shape index: {}]   ;;  %s5731_s1 = inlined_call_operand.hbm [shape: f32[258,2048], index: 1, kind: output, shape index: {}]  }
   0x1   :  { %8 = vsyncpa [#allocation3 + $0x1], 0 }
   0x2   :  { %9 = vsyncpa [#allocation4], 0 }
   0x3   :  { %11 = vsyncpa [#allocation4 + $0x1], 0  ;;  %s4529_s6 = smov 0   ;;  %s4531_s7 = smov 0  }
   0x4   :  { %s4533_s8 = smov 0   ;;  %s4535_s9 = smov 0  }
   0x5 LB: > { %s4550_s10 = sadd.s32 4294967295, %s4511_s9   ;;  %s3322_s11 = sadd.s32 4294967294, %s4511_s9   ;;  %s4511_s9 = sphi %s4535_s9, %s5741_s9   ;;  %s4507_s8 = sphi %s4533_s8, %s5740_s8   ;;  %s4503_s7 = sphi %s4531_s7, %s5739_s7   ;;  %s4499_s6 = sphi %s4529_s6, %s5738_s6  }
   0x6   : > { %s4554_s12 = sadd.s32 1, %s4511_s9   ;;  %s24_s13 = sadd.s32 1, %s4507_s8 }
   0x7   : > { %s21_s14 = ssub.s32 %s4511_s9, %s4554_s12  ;;  %p31_p0 = scmp.ne.s32.totalorder %s4507_s8, %s4503_s7 }
   0x8   : > { %p22_p1 = scmp.eq.s32.totalorder %s21_s14, 0  ;;  %p32_p2 = scmp.eq.s32.totalorder %s4511_s9, 0 }
   0x9   : > { %p37_p3 = scmp.ne.s32.totalorder %s4503_s7, %s4499_s6  ;;  %p38_p4 = scmp.eq.s32.totalorder %s4550_s10, 0 }
   0xa   : > { %s4566_s15 = scalar_select %p22_p1, %s4507_s8, %s24_s13  }
   0xb   : > { %p33_p5 = por %p32_p2, %p31_p0  ;;  %p4568_p6 = por %p38_p4, %p37_p3 }
   0xc   : > { %p61_p7 = scmp.eq.s32.totalorder %s4550_s10, 1  ;;  %p67_p8 = scmp.eq.s32.totalorder %s3322_s11, 1 }
   0xd   : > { %p5732_p11 = scmp.ge.s32.totalorder %s4511_s9, 2 }
   0xe   : > { %p4573_p9 = por %p61_p7, %p31_p0  ;;  %p4577_p10 = por %p67_p8, %p37_p3 }
   0xf   : > { %83 = sbr.rel (%p5732_p11) target bundleno = 52 (0x34), region = 16 }
  0x10   : > { %s5735_s18 = scalar_select %p4577_p10, 1, 0 }
  0x14   : > { %86 = sbr.rel (!%p33_p5) target bundleno = 52 (0x34), region = 20  ;;  %s87_s19 = sand.u32 (%p33_p5), 1, %s4507_s8  }
  0x15   : > { %s3326_s20 = sshll.u32 (%p33_p5), %s4511_s9, 5  ;;  %s3325_s21 = sshll.u32 (%p33_p5), %s87_s19, 12 }
  0x16   : > { %s93_s22 = ssub.s32 (%p33_p5), 33, %s3326_s20  ;;  %s4589_s25 = scalar_lea.sflag (%p33_p5), [#allocation3], %s87_s19 }
  0x17   : > { %p94_p12 = scmp.lt.s32.totalorder (%p33_p5), %s93_s22, 32  ;;  %s91_s26 = scalar_lea.vmem (%p33_p5), [#allocation2], %s3325_s21 }
  0x19   : > { %s5743_s22 = smov (!%p94_p12, %s93_s22), 32 }
  0x1a   : > { %s4586_s23 = sshll.u32 %s5743_s22, 11 }
  0x1b   : > { %s99_s24 = ssub.s32 65536, %s4586_s23 }
  0x1c   : > { %100 = vsyncadd %s4589_s25, %s99_s24  ;;  %p3329_p13 = scmp.ne.s32.totalorder %s4586_s23, 0  ;;  %s3350_s27 = sshll.u32 %s4511_s9, 16 }
  0x1d   : > { %s4597_s30 = scalar_lea.hbm %s5730_s0, %s3350_s27  ;;  %s106_s2 = sshll.u32 %s91_s26, 4  ;;  %s4599_s2 = int_to_ptr.vmem [resolvable:$true] %s106_s2 }
  0x1e   : > { %s4421_s3 = scalar_lea.hbm %s4597_s30, %s4586_s23  ;;  %s4425_s11 = scalar_lea.hbm %s5730_s0, 67584 }
  0x1f   : > { %p4422_p0 = scmp.ne.s32.totalorder %s4597_s30, %s4421_s3  ;;  %p4426_p3 = scmp.lt.s32.totalorder %s4597_s30, %s5730_s0 }
  0x20   : > { %p4427_p4 = scmp.lt.s32.totalorder %s4425_s11, %s4421_s3 }
  0x21   : > { %p4423_p1 = pnand %p4422_p0, %p3329_p13 }
  0x22   : > { %p4428_p5 = por %p4427_p4, %p4426_p3 }
  0x23   : > { %p4424_p2 = pneg %p4423_p1 }
  0x25   : > { %p4429_p7 = pnand %p4428_p5, %p4424_p2 }
  0x27   : > { %4432 = shalt.err (!%p4429_p7)
}
  0x28   : > { %s4433_s19 = scalar_lea.vmem %s4599_s2, %s4586_s23  ;;  %s4513_s20 = smov [#allocation2]  }
  0x29   : > { %p4434_p8 = scmp.ne.s32.totalorder %s4599_s2, %s4433_s19  ;;  %s4437_s21 = sshll.u32 %s4513_s20, 4  ;;  %s4438_s21 = int_to_ptr.vmem [resolvable:$false] %s4437_s21 }
  0x2a   : > { %s4439_s22 = scalar_lea.vmem %s4438_s21, 131072  ;;  %p4440_p1 = scmp.lt.s32.totalorder %s4599_s2, %s4438_s21 }
  0x2b   : > { %p4435_p12 = pnand %p4434_p8, %p3329_p13  ;;  %p4441_p11 = scmp.lt.s32.totalorder %s4439_s22, %s4433_s19 }
  0x2d   : > { %p4436_p0 = pneg %p4435_p12  ;;  %p4442_p10 = por %p4441_p11, %p4440_p1 }
  0x2f   : > { %p4443_p3 = pnand %p4442_p10, %p4436_p0 }
  0x31   : > { %4446 = shalt.err (!%p4443_p3)
}
  0x32   : > { %s4514_s24 = smov 2048   ;;  %s4515_s26 = smov 128  }
  0x33   : > { %112 = dma.hbm_to_vmem [thread:$0]  (%p3329_p13), %s4597_s30, %s4586_s23, %s4599_s2, %s4589_s25, %s4514_s24, %s4514_s24, %s4515_s26  }
  0x34 PF: > { %p3334_p2 = scmp.ge.s32.totalorder %s4511_s9, 1  ;;  %p114_p4 = scmp.lt.s32.totalorder %s4511_s9, 3 }
  0x36   : > { %p115_p5 = pnand %p3334_p2, %p114_p4 }
  0x37   : > { %s4628_s27 = sand.u32 (!%p115_p5), 1, %s4503_s7  }
  0x38   : > { %118 = sbr.rel (%p115_p5) target bundleno = 622 (0x26e), region = 24  ;;  %s3335_s28 = sshll.u32 (!%p115_p5), %s4628_s27, 12 }
  0x39   : > { %s121_s29 = scalar_lea.sflag (!%p115_p5), [#allocation3], %s4628_s27  ;;  %s4634_s3 = scalar_lea.vmem (!%p115_p5), [#allocation2], %s3335_s28 }
  0x3d   : > { %4490 = dma.done.wait (%p4568_p6), %s121_s29, 65536  }
  0x3e   : > { %4492 = vsyncadd (%p4568_p6), %s121_s29, 4294901760  ;;  %v155_v0 = vld [vmem:[%s4634_s3] sm:$0xff]  ;;  %v156_v1 = vld [vmem:[%s4634_s3 + $0x8] sm:$0xff]  ;;  %s4667_s16 = scalar_lea.vmem [#allocation5], %s3335_s28  ;;  %s3228_s23 = scalar_lea.sflag [#allocation4], %s4628_s27 }
  0x3f   : > { %v157_v2 = vld [vmem:[%s4634_s3 + $0x10] sm:$0xff]  ;;  %v667_v3 = vmul.f32 0.5, %v155_v0  ;;  %v668_v4 = vmul.f32 0.5, %v156_v1  ;;  %v158_v6 = vld [vmem:[%s4634_s3 + $0x18] sm:$0xff]  ;;  %v159_v7 = vld [vmem:[%s4634_s3 + $0x20] sm:$0xff]  ;;  %s3338_s25 = sshll.u32 (%p4573_p9), %s4550_s10, 5 }
  0x40   : > { %v669_v5 = vmul.f32 0.5, %v157_v2  ;;  %v160_v8 = vld [vmem:[%s4634_s3 + $0x28] sm:$0xff]  ;;  %v670_v9 = vmul.f32 0.5, %v158_v6  ;;  %v161_v10 = vld [vmem:[%s4634_s3 + $0x30] sm:$0xff]  ;;  %v671_v11 = vmul.f32 0.5, %v159_v7  ;;  %v162_v12 = vld [vmem:[%s4634_s3 + $0x38] sm:$0xff] }
  0x41   : > { %3397 = vtanh.f32 %v667_v3  ;;  %v672_v13 = vmul.f32 0.5, %v160_v8  ;;  %v163_v14 = vld [vmem:[%s4634_s3 + $0x40] sm:$0xff]  ;;  %v673_v15 = vmul.f32 0.5, %v161_v10  ;;  %v164_v16 = vld [vmem:[%s4634_s3 + $0x48] sm:$0xff]  ;;  %v674_v17 = vmul.f32 0.5, %v162_v12  ;;  %v165_v18 = vld [vmem:[%s4634_s3 + $0x50] sm:$0xff] }
  0x42   : > { %3399 = vtanh.f32 %v668_v4  ;;  %v675_v19 = vmul.f32 0.5, %v163_v14  ;;  %v166_v20 = vld [vmem:[%s4634_s3 + $0x58] sm:$0xff]  ;;  %v676_v21 = vmul.f32 0.5, %v164_v16  ;;  %v167_v22 = vld [vmem:[%s4634_s3 + $0x60] sm:$0xff]  ;;  %v677_v23 = vmul.f32 0.5, %v165_v18  ;;  %v168_v24 = vld [vmem:[%s4634_s3 + $0x68] sm:$0xff] }
  0x43   : > { %3401 = vtanh.f32 %v669_v5  ;;  %v678_v25 = vmul.f32 0.5, %v166_v20  ;;  %v169_v26 = vld [vmem:[%s4634_s3 + $0x70] sm:$0xff]  ;;  %v679_v27 = vmul.f32 0.5, %v167_v22  ;;  %v170_v28 = vld [vmem:[%s4634_s3 + $0x78] sm:$0xff]  ;;  %v680_v29 = vmul.f32 0.5, %v168_v24  ;;  %v171_v30 = vld [vmem:[%s4634_s3 + $0x80] sm:$0xff] }
  0x44   : > { %3403 = vtanh.f32 %v670_v9  ;;  %v681_v31 = vmul.f32 0.5, %v169_v26  ;;  %v172_v32 = vld [vmem:[%s4634_s3 + $0x88] sm:$0xff]  ;;  %v682_v33 = vmul.f32 0.5, %v170_v28  ;;  %v173_v34 = vld [vmem:[%s4634_s3 + $0x90] sm:$0xff]  ;;  %v683_v35 = vmul.f32 0.5, %v171_v30  ;;  %v174_v36 = vld [vmem:[%s4634_s3 + $0x98] sm:$0xff] }
  0x45   : > { %3405 = vtanh.f32 %v671_v11  ;;  %v684_v38 = vmul.f32 0.5, %v172_v32  ;;  %v175_v39 = vld [vmem:[%s4634_s3 + $0xa0] sm:$0xff]  ;;  %v685_v42 = vmul.f32 0.5, %v173_v34  ;;  %v176_v43 = vld [vmem:[%s4634_s3 + $0xa8] sm:$0xff]  ;;  %v686_v46 = vmul.f32 0.5, %v174_v36  ;;  %v177_v47 = vld [vmem:[%s4634_s3 + $0xb0] sm:$0xff] }
  0x46   : > { %3407 = vtanh.f32 %v672_v13  ;;  %v687_v51 = vmul.f32 0.5, %v175_v39  ;;  %v178_v52 = vld [vmem:[%s4634_s3 + $0xb8] sm:$0xff]  ;;  %v688_v56 = vmul.f32 0.5, %v176_v43  ;;  %v179_v57 = vld [vmem:[%s4634_s3 + $0xc0] sm:$0xff]  ;;  %v689_v61 = vmul.f32 0.5, %v177_v47  ;;  %v180_v62 = vld [vmem:[%s4634_s3 + $0xc8] sm:$0xff] }
  0x47   : > { %3409 = vtanh.f32 %v673_v15  ;;  %v690_v2 = vmul.f32 0.5, %v178_v52  ;;  %v181_v3 = vld [vmem:[%s4634_s3 + $0xd0] sm:$0xff]  ;;  %v691_v7 = vmul.f32 0.5, %v179_v57  ;;  %v182_v8 = vld [vmem:[%s4634_s3 + $0xd8] sm:$0xff]  ;;  %v692_v12 = vmul.f32 0.5, %v180_v62  ;;  %v183_v13 = vld [vmem:[%s4634_s3 + $0xe0] sm:$0xff] }
  0x48   : > { %3411 = vtanh.f32 %v674_v17  ;;  %v693_v17 = vmul.f32 0.5, %v181_v3  ;;  %v184_v18 = vld [vmem:[%s4634_s3 + $0xe8] sm:$0xff]  ;;  %v694_v22 = vmul.f32 0.5, %v182_v8  ;;  %v186_v28 = vld [vmem:[%s4634_s3 + $0xf8] sm:$0xff]  ;;  %v189_v43 = vld [vmem:[%s4634_s3 + $0x110] sm:$0xff]  ;;  %s3236_s30 = ssub.s32 (%p4573_p9), 33, %s3338_s25 }
  0x49   : > { %3413 = vtanh.f32 %v675_v19  ;;  %v696_v32 = vmul.f32 0.5, %v184_v18  ;;  %v701_v57 = vmul.f32 0.5, %v189_v43  ;;  %p3237_p6 = scmp.lt.s32.totalorder (%p4573_p9), %s3236_s30, 32 }
  0x4a   : > { %3415 = vtanh.f32 %v676_v21 }
  0x4b   : > { %3417 = vtanh.f32 %v677_v23  ;;  %v185_v23 = vld [vmem:[%s4634_s3 + $0xf0] sm:$0xff] }
  0x4c   : > { %3419 = vtanh.f32 %v678_v25 }
  0x4d   : > { %3421 = vtanh.f32 %v679_v27  ;;  %v695_v27 = vmul.f32 0.5, %v183_v13 }
  0x4e   : > { %v3398_v37 = vpop.eup %3397  ;;  %3423 = vtanh.f32 %v680_v29 }
  0x4f   : > { %v3400_v40 = vpop.eup %3399  ;;  %v1691_v41 = vmul.f32 0.5, %v3398_v37  ;;  %3425 = vtanh.f32 %v681_v31  ;;  %v697_v37 = vmul.f32 0.5, %v185_v23 }
  0x50   : > { %v3402_v44 = vpop.eup %3401  ;;  %v1692_v45 = vmul.f32 0.5, %v3400_v40  ;;  %3427 = vtanh.f32 %v682_v33  ;;  %v187_v33 = vld [vmem:[%s4634_s3 + $0x100] sm:$0xff] }
  0x51   : > { %v3404_v48 = vpop.eup %3403  ;;  %v2203_v49 = vadd.f32 0.5, %v1691_v41  ;;  %v1693_v50 = vmul.f32 0.5, %v3402_v44  ;;  %3429 = vtanh.f32 %v683_v35  ;;  %v699_v47 = vmul.f32 0.5, %v187_v33 }
  0x52   : > { %v3406_v53 = vpop.eup %3405  ;;  %v2204_v54 = vadd.f32 0.5, %v1692_v45  ;;  %v1694_v55 = vmul.f32 0.5, %v3404_v48  ;;  %3431 = vtanh.f32 %v684_v38  ;;  %v188_v38 = vld [vmem:[%s4634_s3 + $0x108] sm:$0xff]  ;;  %v190_v48 = vld [vmem:[%s4634_s3 + $0x118] sm:$0xff] }
  0x53   : > { %v3408_v58 = vpop.eup %3407  ;;  %2715 = vst [vmem:[%s4667_s16] sm:$0xff] %v2203_v49  ;;  %v2205_v59 = vadd.f32 0.5, %v1693_v50  ;;  %v1695_v60 = vmul.f32 0.5, %v3406_v53  ;;  %3433 = vtanh.f32 %v685_v42  ;;  %v698_v42 = vmul.f32 0.5, %v186_v28  ;;  %v191_v53 = vld [vmem:[%s4634_s3 + $0x120] sm:$0xff] }
  0x54   : > { %v3410_v63 = vpop.eup %3409  ;;  %2716 = vst [vmem:[%s4667_s16 + $0x8] sm:$0xff] %v2204_v54  ;;  %v2206_v0 = vadd.f32 0.5, %v1694_v55  ;;  %v1696_v1 = vmul.f32 0.5, %v3408_v58  ;;  %3435 = vtanh.f32 %v686_v46  ;;  %v700_v52 = vmul.f32 0.5, %v188_v38  ;;  %v192_v58 = vld [vmem:[%s4634_s3 + $0x128] sm:$0xff] }
  0x55   : > { %v3412_v4 = vpop.eup %3411  ;;  %2717 = vst [vmem:[%s4667_s16 + $0x10] sm:$0xff] %v2205_v59  ;;  %v2207_v5 = vadd.f32 0.5, %v1695_v60  ;;  %v1697_v6 = vmul.f32 0.5, %v3410_v63  ;;  %3437 = vtanh.f32 %v687_v51  ;;  %v702_v62 = vmul.f32 0.5, %v190_v48  ;;  %v193_v63 = vld [vmem:[%s4634_s3 + $0x130] sm:$0xff] }
  0x56   : > { %v3414_v9 = vpop.eup %3413  ;;  %2718 = vst [vmem:[%s4667_s16 + $0x18] sm:$0xff] %v2206_v0  ;;  %v2208_v10 = vadd.f32 0.5, %v1696_v1  ;;  %v1698_v11 = vmul.f32 0.5, %v3412_v4  ;;  %3439 = vtanh.f32 %v688_v56  ;;  %v703_v3 = vmul.f32 0.5, %v191_v53  ;;  %v194_v4 = vld [vmem:[%s4634_s3 + $0x138] sm:$0xff] }
  0x57   : > { %v3416_v14 = vpop.eup %3415  ;;  %2719 = vst [vmem:[%s4667_s16 + $0x20] sm:$0xff] %v2207_v5  ;;  %v2209_v15 = vadd.f32 0.5, %v1697_v6  ;;  %v1699_v16 = vmul.f32 0.5, %v3414_v9  ;;  %3441 = vtanh.f32 %v689_v61  ;;  %v704_v8 = vmul.f32 0.5, %v192_v58  ;;  %v195_v9 = vld [vmem:[%s4634_s3 + $0x140] sm:$0xff] }
  0x58   : > { %v3418_v19 = vpop.eup %3417  ;;  %2720 = vst [vmem:[%s4667_s16 + $0x28] sm:$0xff] %v2208_v10  ;;  %v2210_v20 = vadd.f32 0.5, %v1698_v11  ;;  %v1700_v21 = vmul.f32 0.5, %v3416_v14  ;;  %3443 = vtanh.f32 %v690_v2  ;;  %v705_v13 = vmul.f32 0.5, %v193_v63  ;;  %v196_v14 = vld [vmem:[%s4634_s3 + $0x148] sm:$0xff] }
  0x59   : > { %v3420_v24 = vpop.eup %3419  ;;  %2721 = vst [vmem:[%s4667_s16 + $0x30] sm:$0xff] %v2209_v15  ;;  %v2211_v25 = vadd.f32 0.5, %v1699_v16  ;;  %v1701_v26 = vmul.f32 0.5, %v3418_v19  ;;  %3445 = vtanh.f32 %v691_v7  ;;  %v706_v18 = vmul.f32 0.5, %v194_v4  ;;  %v197_v19 = vld [vmem:[%s4634_s3 + $0x150] sm:$0xff] }
  0x5a   : > { %v3422_v29 = vpop.eup %3421  ;;  %2722 = vst [vmem:[%s4667_s16 + $0x38] sm:$0xff] %v2210_v20  ;;  %v2212_v30 = vadd.f32 0.5, %v1700_v21  ;;  %v1702_v31 = vmul.f32 0.5, %v3420_v24  ;;  %3447 = vtanh.f32 %v692_v12  ;;  %v707_v23 = vmul.f32 0.5, %v195_v9  ;;  %v198_v24 = vld [vmem:[%s4634_s3 + $0x158] sm:$0xff] }
  0x5b   : > { %v3424_v34 = vpop.eup %3423  ;;  %2723 = vst [vmem:[%s4667_s16 + $0x40] sm:$0xff] %v2211_v25  ;;  %v2213_v35 = vadd.f32 0.5, %v1701_v26  ;;  %v1703_v36 = vmul.f32 0.5, %v3422_v29  ;;  %3449 = vtanh.f32 %v693_v17  ;;  %v708_v28 = vmul.f32 0.5, %v196_v14  ;;  %v199_v29 = vld [vmem:[%s4634_s3 + $0x160] sm:$0xff] }
  0x5c   : > { %v3426_v39 = vpop.eup %3425  ;;  %2724 = vst [vmem:[%s4667_s16 + $0x48] sm:$0xff] %v2212_v30  ;;  %v2214_v40 = vadd.f32 0.5, %v1702_v31  ;;  %v1704_v41 = vmul.f32 0.5, %v3424_v34  ;;  %3451 = vtanh.f32 %v694_v22  ;;  %v709_v33 = vmul.f32 0.5, %v197_v19  ;;  %v200_v34 = vld [vmem:[%s4634_s3 + $0x168] sm:$0xff] }
  0x5d   : > { %v3428_v44 = vpop.eup %3427  ;;  %2725 = vst [vmem:[%s4667_s16 + $0x50] sm:$0xff] %v2213_v35  ;;  %v2215_v45 = vadd.f32 0.5, %v1703_v36  ;;  %v1705_v46 = vmul.f32 0.5, %v3426_v39  ;;  %3453 = vtanh.f32 %v695_v27  ;;  %v710_v38 = vmul.f32 0.5, %v198_v24  ;;  %v201_v39 = vld [vmem:[%s4634_s3 + $0x170] sm:$0xff] }
  0x5e   : > { %v3430_v49 = vpop.eup %3429  ;;  %2726 = vst [vmem:[%s4667_s16 + $0x58] sm:$0xff] %v2214_v40  ;;  %v2216_v50 = vadd.f32 0.5, %v1704_v41  ;;  %v1706_v51 = vmul.f32 0.5, %v3428_v44  ;;  %3455 = vtanh.f32 %v696_v32  ;;  %v711_v43 = vmul.f32 0.5, %v199_v29  ;;  %v202_v44 = vld [vmem:[%s4634_s3 + $0x178] sm:$0xff] }
  0x5f   : > { %v3432_v54 = vpop.eup %3431  ;;  %2727 = vst [vmem:[%s4667_s16 + $0x60] sm:$0xff] %v2215_v45  ;;  %v2217_v55 = vadd.f32 0.5, %v1705_v46  ;;  %v1707_v56 = vmul.f32 0.5, %v3430_v49  ;;  %3457 = vtanh.f32 %v697_v37  ;;  %v712_v48 = vmul.f32 0.5, %v200_v34  ;;  %v203_v49 = vld [vmem:[%s4634_s3 + $0x180] sm:$0xff] }
  0x60   : > { %v3434_v59 = vpop.eup %3433  ;;  %2728 = vst [vmem:[%s4667_s16 + $0x68] sm:$0xff] %v2216_v50  ;;  %v2218_v60 = vadd.f32 0.5, %v1706_v51  ;;  %v1708_v61 = vmul.f32 0.5, %v3432_v54  ;;  %3459 = vtanh.f32 %v698_v42  ;;  %v713_v53 = vmul.f32 0.5, %v201_v39  ;;  %v204_v54 = vld [vmem:[%s4634_s3 + $0x188] sm:$0xff] }
  0x61   : > { %v3436_v0 = vpop.eup %3435  ;;  %2729 = vst [vmem:[%s4667_s16 + $0x70] sm:$0xff] %v2217_v55  ;;  %v2219_v1 = vadd.f32 0.5, %v1707_v56  ;;  %v1709_v2 = vmul.f32 0.5, %v3434_v59  ;;  %3461 = vtanh.f32 %v699_v47  ;;  %v714_v58 = vmul.f32 0.5, %v202_v44  ;;  %v205_v59 = vld [vmem:[%s4634_s3 + $0x190] sm:$0xff] }
  0x62   : > { %v3438_v5 = vpop.eup %3437  ;;  %2730 = vst [vmem:[%s4667_s16 + $0x78] sm:$0xff] %v2218_v60  ;;  %v2220_v6 = vadd.f32 0.5, %v1708_v61  ;;  %v1710_v7 = vmul.f32 0.5, %v3436_v0  ;;  %3463 = vtanh.f32 %v700_v52  ;;  %v715_v63 = vmul.f32 0.5, %v203_v49  ;;  %v206_v0 = vld [vmem:[%s4634_s3 + $0x198] sm:$0xff] }
  0x63   : > { %v3440_v10 = vpop.eup %3439  ;;  %2731 = vst [vmem:[%s4667_s16 + $0x80] sm:$0xff] %v2219_v1  ;;  %v2221_v11 = vadd.f32 0.5, %v1709_v2  ;;  %v1711_v12 = vmul.f32 0.5, %v3438_v5  ;;  %3465 = vtanh.f32 %v701_v57  ;;  %v716_v4 = vmul.f32 0.5, %v204_v54  ;;  %v207_v5 = vld [vmem:[%s4634_s3 + $0x1a0] sm:$0xff] }
  0x64   : > { %v3442_v15 = vpop.eup %3441  ;;  %2732 = vst [vmem:[%s4667_s16 + $0x88] sm:$0xff] %v2220_v6  ;;  %v2222_v16 = vadd.f32 0.5, %v1710_v7  ;;  %v1712_v17 = vmul.f32 0.5, %v3440_v10  ;;  %3467 = vtanh.f32 %v702_v62  ;;  %v717_v9 = vmul.f32 0.5, %v205_v59  ;;  %v208_v10 = vld [vmem:[%s4634_s3 + $0x1a8] sm:$0xff] }
  0x65   : > { %v3444_v20 = vpop.eup %3443  ;;  %2733 = vst [vmem:[%s4667_s16 + $0x90] sm:$0xff] %v2221_v11  ;;  %v2223_v21 = vadd.f32 0.5, %v1711_v12  ;;  %v1713_v22 = vmul.f32 0.5, %v3442_v15  ;;  %3469 = vtanh.f32 %v703_v3  ;;  %v718_v14 = vmul.f32 0.5, %v206_v0  ;;  %v209_v15 = vld [vmem:[%s4634_s3 + $0x1b0] sm:$0xff] }
  0x66   : > { %v3446_v25 = vpop.eup %3445  ;;  %2734 = vst [vmem:[%s4667_s16 + $0x98] sm:$0xff] %v2222_v16  ;;  %v2224_v26 = vadd.f32 0.5, %v1712_v17  ;;  %v1714_v27 = vmul.f32 0.5, %v3444_v20  ;;  %3471 = vtanh.f32 %v704_v8  ;;  %v719_v19 = vmul.f32 0.5, %v207_v5  ;;  %v210_v20 = vld [vmem:[%s4634_s3 + $0x1b8] sm:$0xff] }
  0x67   : > { %v3448_v30 = vpop.eup %3447  ;;  %2735 = vst [vmem:[%s4667_s16 + $0xa0] sm:$0xff] %v2223_v21  ;;  %v2225_v31 = vadd.f32 0.5, %v1713_v22  ;;  %v1715_v32 = vmul.f32 0.5, %v3446_v25  ;;  %3473 = vtanh.f32 %v705_v13  ;;  %v720_v24 = vmul.f32 0.5, %v208_v10  ;;  %v211_v25 = vld [vmem:[%s4634_s3 + $0x1c0] sm:$0xff] }
  0x68   : > { %v3450_v35 = vpop.eup %3449  ;;  %2736 = vst [vmem:[%s4667_s16 + $0xa8] sm:$0xff] %v2224_v26  ;;  %v2226_v36 = vadd.f32 0.5, %v1714_v27  ;;  %v1716_v37 = vmul.f32 0.5, %v3448_v30  ;;  %3475 = vtanh.f32 %v706_v18  ;;  %v721_v29 = vmul.f32 0.5, %v209_v15  ;;  %v212_v30 = vld [vmem:[%s4634_s3 + $0x1c8] sm:$0xff] }
  0x69   : > { %v3452_v40 = vpop.eup %3451  ;;  %2737 = vst [vmem:[%s4667_s16 + $0xb0] sm:$0xff] %v2225_v31  ;;  %v2227_v41 = vadd.f32 0.5, %v1715_v32  ;;  %v1717_v42 = vmul.f32 0.5, %v3450_v35  ;;  %3477 = vtanh.f32 %v707_v23  ;;  %v722_v34 = vmul.f32 0.5, %v210_v20  ;;  %v213_v35 = vld [vmem:[%s4634_s3 + $0x1d0] sm:$0xff] }
  0x6a   : > { %v3454_v45 = vpop.eup %3453  ;;  %2738 = vst [vmem:[%s4667_s16 + $0xb8] sm:$0xff] %v2226_v36  ;;  %v2228_v46 = vadd.f32 0.5, %v1716_v37  ;;  %v1718_v47 = vmul.f32 0.5, %v3452_v40  ;;  %3479 = vtanh.f32 %v708_v28  ;;  %v723_v39 = vmul.f32 0.5, %v211_v25  ;;  %v214_v40 = vld [vmem:[%s4634_s3 + $0x1d8] sm:$0xff] }
  0x6b   : > { %v3456_v50 = vpop.eup %3455  ;;  %2739 = vst [vmem:[%s4667_s16 + $0xc0] sm:$0xff] %v2227_v41  ;;  %v2229_v51 = vadd.f32 0.5, %v1717_v42  ;;  %v1719_v52 = vmul.f32 0.5, %v3454_v45  ;;  %3481 = vtanh.f32 %v709_v33  ;;  %v724_v44 = vmul.f32 0.5, %v212_v30  ;;  %v215_v45 = vld [vmem:[%s4634_s3 + $0x1e0] sm:$0xff] }
  0x6c   : > { %v3458_v55 = vpop.eup %3457  ;;  %2740 = vst [vmem:[%s4667_s16 + $0xc8] sm:$0xff] %v2228_v46  ;;  %v2230_v56 = vadd.f32 0.5, %v1718_v47  ;;  %v1720_v57 = vmul.f32 0.5, %v3456_v50  ;;  %3483 = vtanh.f32 %v710_v38  ;;  %v725_v49 = vmul.f32 0.5, %v213_v35  ;;  %v216_v50 = vld [vmem:[%s4634_s3 + $0x1e8] sm:$0xff] }
  0x6d   : > { %v3460_v60 = vpop.eup %3459  ;;  %2741 = vst [vmem:[%s4667_s16 + $0xd0] sm:$0xff] %v2229_v51  ;;  %v2231_v61 = vadd.f32 0.5, %v1719_v52  ;;  %v1721_v62 = vmul.f32 0.5, %v3458_v55  ;;  %3485 = vtanh.f32 %v711_v43  ;;  %v726_v54 = vmul.f32 0.5, %v214_v40  ;;  %v217_v55 = vld [vmem:[%s4634_s3 + $0x1f0] sm:$0xff] }
  0x6e   : > { %v3462_v1 = vpop.eup %3461  ;;  %2742 = vst [vmem:[%s4667_s16 + $0xd8] sm:$0xff] %v2230_v56  ;;  %v2232_v2 = vadd.f32 0.5, %v1720_v57  ;;  %v1722_v3 = vmul.f32 0.5, %v3460_v60  ;;  %3487 = vtanh.f32 %v712_v48  ;;  %v727_v59 = vmul.f32 0.5, %v215_v45  ;;  %v218_v60 = vld [vmem:[%s4634_s3 + $0x1f8] sm:$0xff] }
  0x6f   : > { %v3464_v6 = vpop.eup %3463  ;;  %2743 = vst [vmem:[%s4667_s16 + $0xe0] sm:$0xff] %v2231_v61  ;;  %v2233_v7 = vadd.f32 0.5, %v1721_v62  ;;  %v1723_v8 = vmul.f32 0.5, %v3462_v1  ;;  %3489 = vtanh.f32 %v713_v53  ;;  %v728_v0 = vmul.f32 0.5, %v216_v50  ;;  %v219_v1 = vld [vmem:[%s4634_s3 + $0x200] sm:$0xff] }
  0x70   : > { %v3466_v11 = vpop.eup %3465  ;;  %2744 = vst [vmem:[%s4667_s16 + $0xe8] sm:$0xff] %v2232_v2  ;;  %v2234_v12 = vadd.f32 0.5, %v1722_v3  ;;  %v1724_v13 = vmul.f32 0.5, %v3464_v6  ;;  %3491 = vtanh.f32 %v714_v58  ;;  %v729_v5 = vmul.f32 0.5, %v217_v55  ;;  %v220_v6 = vld [vmem:[%s4634_s3 + $0x208] sm:$0xff] }
  0x71   : > { %v3468_v16 = vpop.eup %3467  ;;  %2745 = vst [vmem:[%s4667_s16 + $0xf0] sm:$0xff] %v2233_v7  ;;  %v2235_v17 = vadd.f32 0.5, %v1723_v8  ;;  %v1725_v18 = vmul.f32 0.5, %v3466_v11  ;;  %3493 = vtanh.f32 %v715_v63  ;;  %v730_v10 = vmul.f32 0.5, %v218_v60  ;;  %v221_v11 = vld [vmem:[%s4634_s3 + $0x210] sm:$0xff] }
  0x72   : > { %v3470_v21 = vpop.eup %3469  ;;  %2746 = vst [vmem:[%s4667_s16 + $0xf8] sm:$0xff] %v2234_v12  ;;  %v2236_v22 = vadd.f32 0.5, %v1724_v13  ;;  %v1726_v23 = vmul.f32 0.5, %v3468_v16  ;;  %3495 = vtanh.f32 %v716_v4  ;;  %v731_v15 = vmul.f32 0.5, %v219_v1  ;;  %v222_v16 = vld [vmem:[%s4634_s3 + $0x218] sm:$0xff] }
  0x73   : > { %v3472_v26 = vpop.eup %3471  ;;  %2747 = vst [vmem:[%s4667_s16 + $0x100] sm:$0xff] %v2235_v17  ;;  %v2237_v27 = vadd.f32 0.5, %v1725_v18  ;;  %v1727_v28 = vmul.f32 0.5, %v3470_v21  ;;  %3497 = vtanh.f32 %v717_v9  ;;  %v732_v20 = vmul.f32 0.5, %v220_v6  ;;  %v223_v21 = vld [vmem:[%s4634_s3 + $0x220] sm:$0xff] }
  0x74   : > { %v3474_v31 = vpop.eup %3473  ;;  %2748 = vst [vmem:[%s4667_s16 + $0x108] sm:$0xff] %v2236_v22  ;;  %v2238_v32 = vadd.f32 0.5, %v1726_v23  ;;  %v1728_v33 = vmul.f32 0.5, %v3472_v26  ;;  %3499 = vtanh.f32 %v718_v14  ;;  %v733_v25 = vmul.f32 0.5, %v221_v11  ;;  %v224_v26 = vld [vmem:[%s4634_s3 + $0x228] sm:$0xff] }
  0x75   : > { %v3476_v36 = vpop.eup %3475  ;;  %2749 = vst [vmem:[%s4667_s16 + $0x110] sm:$0xff] %v2237_v27  ;;  %v2239_v37 = vadd.f32 0.5, %v1727_v28  ;;  %v1729_v38 = vmul.f32 0.5, %v3474_v31  ;;  %3501 = vtanh.f32 %v719_v19  ;;  %v734_v30 = vmul.f32 0.5, %v222_v16  ;;  %v225_v31 = vld [vmem:[%s4634_s3 + $0x230] sm:$0xff] }
  0x76   : > { %v3478_v41 = vpop.eup %3477  ;;  %2750 = vst [vmem:[%s4667_s16 + $0x118] sm:$0xff] %v2238_v32  ;;  %v2240_v42 = vadd.f32 0.5, %v1728_v33  ;;  %v1730_v43 = vmul.f32 0.5, %v3476_v36  ;;  %3503 = vtanh.f32 %v720_v24  ;;  %v735_v35 = vmul.f32 0.5, %v223_v21  ;;  %v226_v36 = vld [vmem:[%s4634_s3 + $0x238] sm:$0xff] }
  0x77   : > { %v3480_v46 = vpop.eup %3479  ;;  %2751 = vst [vmem:[%s4667_s16 + $0x120] sm:$0xff] %v2239_v37  ;;  %v2241_v47 = vadd.f32 0.5, %v1729_v38  ;;  %v1731_v48 = vmul.f32 0.5, %v3478_v41  ;;  %3505 = vtanh.f32 %v721_v29  ;;  %v736_v40 = vmul.f32 0.5, %v224_v26  ;;  %v227_v41 = vld [vmem:[%s4634_s3 + $0x240] sm:$0xff] }
  0x78   : > { %v3482_v51 = vpop.eup %3481  ;;  %2752 = vst [vmem:[%s4667_s16 + $0x128] sm:$0xff] %v2240_v42  ;;  %v2242_v52 = vadd.f32 0.5, %v1730_v43  ;;  %v1732_v53 = vmul.f32 0.5, %v3480_v46  ;;  %3507 = vtanh.f32 %v722_v34  ;;  %v737_v45 = vmul.f32 0.5, %v225_v31  ;;  %v228_v46 = vld [vmem:[%s4634_s3 + $0x248] sm:$0xff] }
  0x79   : > { %v3484_v56 = vpop.eup %3483  ;;  %2753 = vst [vmem:[%s4667_s16 + $0x130] sm:$0xff] %v2241_v47  ;;  %v2243_v57 = vadd.f32 0.5, %v1731_v48  ;;  %v1733_v58 = vmul.f32 0.5, %v3482_v51  ;;  %3509 = vtanh.f32 %v723_v39  ;;  %v738_v50 = vmul.f32 0.5, %v226_v36  ;;  %v229_v51 = vld [vmem:[%s4634_s3 + $0x250] sm:$0xff] }
  0x7a   : > { %v3486_v61 = vpop.eup %3485  ;;  %2754 = vst [vmem:[%s4667_s16 + $0x138] sm:$0xff] %v2242_v52  ;;  %v2244_v62 = vadd.f32 0.5, %v1732_v53  ;;  %v1734_v63 = vmul.f32 0.5, %v3484_v56  ;;  %3511 = vtanh.f32 %v724_v44  ;;  %v739_v55 = vmul.f32 0.5, %v227_v41  ;;  %v230_v56 = vld [vmem:[%s4634_s3 + $0x258] sm:$0xff] }
  0x7b   : > { %v3488_v2 = vpop.eup %3487  ;;  %2755 = vst [vmem:[%s4667_s16 + $0x140] sm:$0xff] %v2243_v57  ;;  %v2245_v3 = vadd.f32 0.5, %v1733_v58  ;;  %v1735_v4 = vmul.f32 0.5, %v3486_v61  ;;  %3513 = vtanh.f32 %v725_v49  ;;  %v740_v60 = vmul.f32 0.5, %v228_v46  ;;  %v231_v61 = vld [vmem:[%s4634_s3 + $0x260] sm:$0xff] }
  0x7c   : > { %v3490_v7 = vpop.eup %3489  ;;  %2756 = vst [vmem:[%s4667_s16 + $0x148] sm:$0xff] %v2244_v62  ;;  %v2246_v8 = vadd.f32 0.5, %v1734_v63  ;;  %v1736_v9 = vmul.f32 0.5, %v3488_v2  ;;  %3515 = vtanh.f32 %v726_v54  ;;  %v741_v1 = vmul.f32 0.5, %v229_v51  ;;  %v232_v2 = vld [vmem:[%s4634_s3 + $0x268] sm:$0xff] }
  0x7d   : > { %v3492_v12 = vpop.eup %3491  ;;  %2757 = vst [vmem:[%s4667_s16 + $0x150] sm:$0xff] %v2245_v3  ;;  %v2247_v13 = vadd.f32 0.5, %v1735_v4  ;;  %v1737_v14 = vmul.f32 0.5, %v3490_v7  ;;  %3517 = vtanh.f32 %v727_v59  ;;  %v742_v6 = vmul.f32 0.5, %v230_v56  ;;  %v233_v7 = vld [vmem:[%s4634_s3 + $0x270] sm:$0xff] }
  0x7e   : > { %v3494_v17 = vpop.eup %3493  ;;  %2758 = vst [vmem:[%s4667_s16 + $0x158] sm:$0xff] %v2246_v8  ;;  %v2248_v18 = vadd.f32 0.5, %v1736_v9  ;;  %v1738_v19 = vmul.f32 0.5, %v3492_v12  ;;  %3519 = vtanh.f32 %v728_v0  ;;  %v743_v11 = vmul.f32 0.5, %v231_v61  ;;  %v234_v12 = vld [vmem:[%s4634_s3 + $0x278] sm:$0xff] }
  0x7f   : > { %v3496_v22 = vpop.eup %3495  ;;  %2759 = vst [vmem:[%s4667_s16 + $0x160] sm:$0xff] %v2247_v13  ;;  %v2249_v23 = vadd.f32 0.5, %v1737_v14  ;;  %v1739_v24 = vmul.f32 0.5, %v3494_v17  ;;  %3521 = vtanh.f32 %v729_v5  ;;  %v744_v16 = vmul.f32 0.5, %v232_v2  ;;  %v235_v17 = vld [vmem:[%s4634_s3 + $0x280] sm:$0xff] }
  0x80   : > { %v3498_v27 = vpop.eup %3497  ;;  %2760 = vst [vmem:[%s4667_s16 + $0x168] sm:$0xff] %v2248_v18  ;;  %v2250_v28 = vadd.f32 0.5, %v1738_v19  ;;  %v1740_v29 = vmul.f32 0.5, %v3496_v22  ;;  %3523 = vtanh.f32 %v730_v10  ;;  %v745_v21 = vmul.f32 0.5, %v233_v7  ;;  %v236_v22 = vld [vmem:[%s4634_s3 + $0x288] sm:$0xff] }
  0x81   : > { %v3500_v32 = vpop.eup %3499  ;;  %2761 = vst [vmem:[%s4667_s16 + $0x170] sm:$0xff] %v2249_v23  ;;  %v2251_v33 = vadd.f32 0.5, %v1739_v24  ;;  %v1741_v34 = vmul.f32 0.5, %v3498_v27  ;;  %3525 = vtanh.f32 %v731_v15  ;;  %v746_v26 = vmul.f32 0.5, %v234_v12  ;;  %v237_v27 = vld [vmem:[%s4634_s3 + $0x290] sm:$0xff] }
  0x82   : > { %v3502_v37 = vpop.eup %3501  ;;  %2762 = vst [vmem:[%s4667_s16 + $0x178] sm:$0xff] %v2250_v28  ;;  %v2252_v38 = vadd.f32 0.5, %v1740_v29  ;;  %v1742_v39 = vmul.f32 0.5, %v3500_v32  ;;  %3527 = vtanh.f32 %v732_v20  ;;  %v747_v31 = vmul.f32 0.5, %v235_v17  ;;  %v238_v32 = vld [vmem:[%s4634_s3 + $0x298] sm:$0xff] }
  0x83   : > { %v3504_v42 = vpop.eup %3503  ;;  %2763 = vst [vmem:[%s4667_s16 + $0x180] sm:$0xff] %v2251_v33  ;;  %v2253_v43 = vadd.f32 0.5, %v1741_v34  ;;  %v1743_v44 = vmul.f32 0.5, %v3502_v37  ;;  %3529 = vtanh.f32 %v733_v25  ;;  %v748_v36 = vmul.f32 0.5, %v236_v22  ;;  %v239_v37 = vld [vmem:[%s4634_s3 + $0x2a0] sm:$0xff] }
  0x84   : > { %v3506_v47 = vpop.eup %3505  ;;  %2764 = vst [vmem:[%s4667_s16 + $0x188] sm:$0xff] %v2252_v38  ;;  %v2254_v48 = vadd.f32 0.5, %v1742_v39  ;;  %v1744_v49 = vmul.f32 0.5, %v3504_v42  ;;  %3531 = vtanh.f32 %v734_v30  ;;  %v749_v41 = vmul.f32 0.5, %v237_v27  ;;  %v240_v42 = vld [vmem:[%s4634_s3 + $0x2a8] sm:$0xff] }
  0x85   : > { %v3508_v52 = vpop.eup %3507  ;;  %2765 = vst [vmem:[%s4667_s16 + $0x190] sm:$0xff] %v2253_v43  ;;  %v2255_v53 = vadd.f32 0.5, %v1743_v44  ;;  %v1745_v54 = vmul.f32 0.5, %v3506_v47  ;;  %3533 = vtanh.f32 %v735_v35  ;;  %v750_v46 = vmul.f32 0.5, %v238_v32  ;;  %v241_v47 = vld [vmem:[%s4634_s3 + $0x2b0] sm:$0xff] }
  0x86   : > { %v3510_v57 = vpop.eup %3509  ;;  %2766 = vst [vmem:[%s4667_s16 + $0x198] sm:$0xff] %v2254_v48  ;;  %v2256_v58 = vadd.f32 0.5, %v1744_v49  ;;  %v1746_v59 = vmul.f32 0.5, %v3508_v52  ;;  %3535 = vtanh.f32 %v736_v40  ;;  %v751_v51 = vmul.f32 0.5, %v239_v37  ;;  %v242_v52 = vld [vmem:[%s4634_s3 + $0x2b8] sm:$0xff] }
  0x87   : > { %v3512_v62 = vpop.eup %3511  ;;  %2767 = vst [vmem:[%s4667_s16 + $0x1a0] sm:$0xff] %v2255_v53  ;;  %v2257_v63 = vadd.f32 0.5, %v1745_v54  ;;  %v1747_v0 = vmul.f32 0.5, %v3510_v57  ;;  %3537 = vtanh.f32 %v737_v45  ;;  %v752_v56 = vmul.f32 0.5, %v240_v42  ;;  %v243_v57 = vld [vmem:[%s4634_s3 + $0x2c0] sm:$0xff] }
  0x88   : > { %v3514_v3 = vpop.eup %3513  ;;  %2768 = vst [vmem:[%s4667_s16 + $0x1a8] sm:$0xff] %v2256_v58  ;;  %v2258_v4 = vadd.f32 0.5, %v1746_v59  ;;  %v1748_v5 = vmul.f32 0.5, %v3512_v62  ;;  %3539 = vtanh.f32 %v738_v50  ;;  %v753_v61 = vmul.f32 0.5, %v241_v47  ;;  %v244_v62 = vld [vmem:[%s4634_s3 + $0x2c8] sm:$0xff] }
  0x89   : > { %v3516_v8 = vpop.eup %3515  ;;  %2769 = vst [vmem:[%s4667_s16 + $0x1b0] sm:$0xff] %v2257_v63  ;;  %v2259_v9 = vadd.f32 0.5, %v1747_v0  ;;  %v1749_v10 = vmul.f32 0.5, %v3514_v3  ;;  %3541 = vtanh.f32 %v739_v55  ;;  %v754_v2 = vmul.f32 0.5, %v242_v52  ;;  %v245_v3 = vld [vmem:[%s4634_s3 + $0x2d0] sm:$0xff] }
  0x8a   : > { %v3518_v13 = vpop.eup %3517  ;;  %2770 = vst [vmem:[%s4667_s16 + $0x1b8] sm:$0xff] %v2258_v4  ;;  %v2260_v14 = vadd.f32 0.5, %v1748_v5  ;;  %v1750_v15 = vmul.f32 0.5, %v3516_v8  ;;  %3543 = vtanh.f32 %v740_v60  ;;  %v755_v7 = vmul.f32 0.5, %v243_v57  ;;  %v246_v8 = vld [vmem:[%s4634_s3 + $0x2d8] sm:$0xff] }
  0x8b   : > { %v3520_v18 = vpop.eup %3519  ;;  %2771 = vst [vmem:[%s4667_s16 + $0x1c0] sm:$0xff] %v2259_v9  ;;  %v2261_v19 = vadd.f32 0.5, %v1749_v10  ;;  %v1751_v20 = vmul.f32 0.5, %v3518_v13  ;;  %3545 = vtanh.f32 %v741_v1  ;;  %v756_v12 = vmul.f32 0.5, %v244_v62  ;;  %v247_v13 = vld [vmem:[%s4634_s3 + $0x2e0] sm:$0xff] }
  0x8c   : > { %v3522_v23 = vpop.eup %3521  ;;  %2772 = vst [vmem:[%s4667_s16 + $0x1c8] sm:$0xff] %v2260_v14  ;;  %v2262_v24 = vadd.f32 0.5, %v1750_v15  ;;  %v1752_v25 = vmul.f32 0.5, %v3520_v18  ;;  %3547 = vtanh.f32 %v742_v6  ;;  %v757_v17 = vmul.f32 0.5, %v245_v3  ;;  %v248_v18 = vld [vmem:[%s4634_s3 + $0x2e8] sm:$0xff] }
  0x8d   : > { %v3524_v28 = vpop.eup %3523  ;;  %2773 = vst [vmem:[%s4667_s16 + $0x1d0] sm:$0xff] %v2261_v19  ;;  %v2263_v29 = vadd.f32 0.5, %v1751_v20  ;;  %v1753_v30 = vmul.f32 0.5, %v3522_v23  ;;  %3549 = vtanh.f32 %v743_v11  ;;  %v758_v22 = vmul.f32 0.5, %v246_v8  ;;  %v249_v23 = vld [vmem:[%s4634_s3 + $0x2f0] sm:$0xff] }
  0x8e   : > { %v3526_v33 = vpop.eup %3525  ;;  %2774 = vst [vmem:[%s4667_s16 + $0x1d8] sm:$0xff] %v2262_v24  ;;  %v2264_v34 = vadd.f32 0.5, %v1752_v25  ;;  %v1754_v35 = vmul.f32 0.5, %v3524_v28  ;;  %3551 = vtanh.f32 %v744_v16  ;;  %v759_v27 = vmul.f32 0.5, %v247_v13  ;;  %v250_v28 = vld [vmem:[%s4634_s3 + $0x2f8] sm:$0xff] }
  0x8f   : > { %v3528_v38 = vpop.eup %3527  ;;  %2775 = vst [vmem:[%s4667_s16 + $0x1e0] sm:$0xff] %v2263_v29  ;;  %v2265_v39 = vadd.f32 0.5, %v1753_v30  ;;  %v1755_v40 = vmul.f32 0.5, %v3526_v33  ;;  %3553 = vtanh.f32 %v745_v21  ;;  %v760_v32 = vmul.f32 0.5, %v248_v18  ;;  %v251_v33 = vld [vmem:[%s4634_s3 + $0x300] sm:$0xff] }
  0x90   : > { %v3530_v43 = vpop.eup %3529  ;;  %2776 = vst [vmem:[%s4667_s16 + $0x1e8] sm:$0xff] %v2264_v34  ;;  %v2266_v44 = vadd.f32 0.5, %v1754_v35  ;;  %v1756_v45 = vmul.f32 0.5, %v3528_v38  ;;  %3555 = vtanh.f32 %v746_v26  ;;  %v761_v37 = vmul.f32 0.5, %v249_v23  ;;  %v252_v38 = vld [vmem:[%s4634_s3 + $0x308] sm:$0xff] }
  0x91   : > { %v3532_v48 = vpop.eup %3531  ;;  %2777 = vst [vmem:[%s4667_s16 + $0x1f0] sm:$0xff] %v2265_v39  ;;  %v2267_v49 = vadd.f32 0.5, %v1755_v40  ;;  %v1757_v50 = vmul.f32 0.5, %v3530_v43  ;;  %3557 = vtanh.f32 %v747_v31  ;;  %v762_v42 = vmul.f32 0.5, %v250_v28  ;;  %v253_v43 = vld [vmem:[%s4634_s3 + $0x310] sm:$0xff] }
  0x92   : > { %v3534_v53 = vpop.eup %3533  ;;  %2778 = vst [vmem:[%s4667_s16 + $0x1f8] sm:$0xff] %v2266_v44  ;;  %v2268_v54 = vadd.f32 0.5, %v1756_v45  ;;  %v1758_v55 = vmul.f32 0.5, %v3532_v48  ;;  %3559 = vtanh.f32 %v748_v36  ;;  %v763_v47 = vmul.f32 0.5, %v251_v33  ;;  %v254_v48 = vld [vmem:[%s4634_s3 + $0x318] sm:$0xff] }
  0x93   : > { %v3536_v58 = vpop.eup %3535  ;;  %2779 = vst [vmem:[%s4667_s16 + $0x200] sm:$0xff] %v2267_v49  ;;  %v2269_v59 = vadd.f32 0.5, %v1757_v50  ;;  %v1759_v60 = vmul.f32 0.5, %v3534_v53  ;;  %3561 = vtanh.f32 %v749_v41  ;;  %v764_v52 = vmul.f32 0.5, %v252_v38  ;;  %v255_v53 = vld [vmem:[%s4634_s3 + $0x320] sm:$0xff] }
  0x94   : > { %v3538_v63 = vpop.eup %3537  ;;  %2780 = vst [vmem:[%s4667_s16 + $0x208] sm:$0xff] %v2268_v54  ;;  %v2270_v0 = vadd.f32 0.5, %v1758_v55  ;;  %v1760_v1 = vmul.f32 0.5, %v3536_v58  ;;  %3563 = vtanh.f32 %v750_v46  ;;  %v765_v57 = vmul.f32 0.5, %v253_v43  ;;  %v256_v58 = vld [vmem:[%s4634_s3 + $0x328] sm:$0xff] }
  0x95   : > { %v3540_v4 = vpop.eup %3539  ;;  %2781 = vst [vmem:[%s4667_s16 + $0x210] sm:$0xff] %v2269_v59  ;;  %v2271_v5 = vadd.f32 0.5, %v1759_v60  ;;  %v1761_v6 = vmul.f32 0.5, %v3538_v63  ;;  %3565 = vtanh.f32 %v751_v51  ;;  %v766_v62 = vmul.f32 0.5, %v254_v48  ;;  %v257_v63 = vld [vmem:[%s4634_s3 + $0x330] sm:$0xff] }
  0x96   : > { %v3542_v9 = vpop.eup %3541  ;;  %2782 = vst [vmem:[%s4667_s16 + $0x218] sm:$0xff] %v2270_v0  ;;  %v2272_v10 = vadd.f32 0.5, %v1760_v1  ;;  %v1762_v11 = vmul.f32 0.5, %v3540_v4  ;;  %3567 = vtanh.f32 %v752_v56  ;;  %v767_v3 = vmul.f32 0.5, %v255_v53  ;;  %v258_v4 = vld [vmem:[%s4634_s3 + $0x338] sm:$0xff] }
  0x97   : > { %v3544_v14 = vpop.eup %3543  ;;  %2783 = vst [vmem:[%s4667_s16 + $0x220] sm:$0xff] %v2271_v5  ;;  %v2273_v15 = vadd.f32 0.5, %v1761_v6  ;;  %v1763_v16 = vmul.f32 0.5, %v3542_v9  ;;  %3569 = vtanh.f32 %v753_v61  ;;  %v768_v8 = vmul.f32 0.5, %v256_v58  ;;  %v259_v9 = vld [vmem:[%s4634_s3 + $0x340] sm:$0xff] }
  0x98   : > { %v3546_v19 = vpop.eup %3545  ;;  %2784 = vst [vmem:[%s4667_s16 + $0x228] sm:$0xff] %v2272_v10  ;;  %v2274_v20 = vadd.f32 0.5, %v1762_v11  ;;  %v1764_v21 = vmul.f32 0.5, %v3544_v14  ;;  %3571 = vtanh.f32 %v754_v2  ;;  %v769_v13 = vmul.f32 0.5, %v257_v63  ;;  %v260_v14 = vld [vmem:[%s4634_s3 + $0x348] sm:$0xff] }
  0x99   : > { %v3548_v24 = vpop.eup %3547  ;;  %2785 = vst [vmem:[%s4667_s16 + $0x230] sm:$0xff] %v2273_v15  ;;  %v2275_v25 = vadd.f32 0.5, %v1763_v16  ;;  %v1765_v26 = vmul.f32 0.5, %v3546_v19  ;;  %3573 = vtanh.f32 %v755_v7  ;;  %v770_v18 = vmul.f32 0.5, %v258_v4  ;;  %v261_v19 = vld [vmem:[%s4634_s3 + $0x350] sm:$0xff] }
  0x9a   : > { %v3550_v29 = vpop.eup %3549  ;;  %2786 = vst [vmem:[%s4667_s16 + $0x238] sm:$0xff] %v2274_v20  ;;  %v2276_v30 = vadd.f32 0.5, %v1764_v21  ;;  %v1766_v31 = vmul.f32 0.5, %v3548_v24  ;;  %3575 = vtanh.f32 %v756_v12  ;;  %v771_v23 = vmul.f32 0.5, %v259_v9  ;;  %v262_v24 = vld [vmem:[%s4634_s3 + $0x358] sm:$0xff] }
  0x9b   : > { %v3552_v34 = vpop.eup %3551  ;;  %2787 = vst [vmem:[%s4667_s16 + $0x240] sm:$0xff] %v2275_v25  ;;  %v2277_v35 = vadd.f32 0.5, %v1765_v26  ;;  %v1767_v36 = vmul.f32 0.5, %v3550_v29  ;;  %3577 = vtanh.f32 %v757_v17  ;;  %v772_v28 = vmul.f32 0.5, %v260_v14  ;;  %v263_v29 = vld [vmem:[%s4634_s3 + $0x360] sm:$0xff] }
  0x9c   : > { %v3554_v39 = vpop.eup %3553  ;;  %2788 = vst [vmem:[%s4667_s16 + $0x248] sm:$0xff] %v2276_v30  ;;  %v2278_v40 = vadd.f32 0.5, %v1766_v31  ;;  %v1768_v41 = vmul.f32 0.5, %v3552_v34  ;;  %3579 = vtanh.f32 %v758_v22  ;;  %v773_v33 = vmul.f32 0.5, %v261_v19  ;;  %v264_v34 = vld [vmem:[%s4634_s3 + $0x368] sm:$0xff] }
  0x9d   : > { %v3556_v44 = vpop.eup %3555  ;;  %2789 = vst [vmem:[%s4667_s16 + $0x250] sm:$0xff] %v2277_v35  ;;  %v2279_v45 = vadd.f32 0.5, %v1767_v36  ;;  %v1769_v46 = vmul.f32 0.5, %v3554_v39  ;;  %3581 = vtanh.f32 %v759_v27  ;;  %v774_v38 = vmul.f32 0.5, %v262_v24  ;;  %v265_v39 = vld [vmem:[%s4634_s3 + $0x370] sm:$0xff] }
  0x9e   : > { %v3558_v49 = vpop.eup %3557  ;;  %2790 = vst [vmem:[%s4667_s16 + $0x258] sm:$0xff] %v2278_v40  ;;  %v2280_v50 = vadd.f32 0.5, %v1768_v41  ;;  %v1770_v51 = vmul.f32 0.5, %v3556_v44  ;;  %3583 = vtanh.f32 %v760_v32  ;;  %v775_v43 = vmul.f32 0.5, %v263_v29  ;;  %v266_v44 = vld [vmem:[%s4634_s3 + $0x378] sm:$0xff] }
  0x9f   : > { %v3560_v54 = vpop.eup %3559  ;;  %2791 = vst [vmem:[%s4667_s16 + $0x260] sm:$0xff] %v2279_v45  ;;  %v2281_v55 = vadd.f32 0.5, %v1769_v46  ;;  %v1771_v56 = vmul.f32 0.5, %v3558_v49  ;;  %3585 = vtanh.f32 %v761_v37  ;;  %v776_v48 = vmul.f32 0.5, %v264_v34  ;;  %v267_v49 = vld [vmem:[%s4634_s3 + $0x380] sm:$0xff] }
  0xa0   : > { %v3562_v59 = vpop.eup %3561  ;;  %2792 = vst [vmem:[%s4667_s16 + $0x268] sm:$0xff] %v2280_v50  ;;  %v2282_v60 = vadd.f32 0.5, %v1770_v51  ;;  %v1772_v61 = vmul.f32 0.5, %v3560_v54  ;;  %3587 = vtanh.f32 %v762_v42  ;;  %v777_v53 = vmul.f32 0.5, %v265_v39  ;;  %v268_v54 = vld [vmem:[%s4634_s3 + $0x388] sm:$0xff] }
  0xa1   : > { %v3564_v0 = vpop.eup %3563  ;;  %2793 = vst [vmem:[%s4667_s16 + $0x270] sm:$0xff] %v2281_v55  ;;  %v2283_v1 = vadd.f32 0.5, %v1771_v56  ;;  %v1773_v2 = vmul.f32 0.5, %v3562_v59  ;;  %3589 = vtanh.f32 %v763_v47  ;;  %v778_v58 = vmul.f32 0.5, %v266_v44  ;;  %v269_v59 = vld [vmem:[%s4634_s3 + $0x390] sm:$0xff] }
  0xa2   : > { %v3566_v5 = vpop.eup %3565  ;;  %2794 = vst [vmem:[%s4667_s16 + $0x278] sm:$0xff] %v2282_v60  ;;  %v2284_v6 = vadd.f32 0.5, %v1772_v61  ;;  %v1774_v7 = vmul.f32 0.5, %v3564_v0  ;;  %3591 = vtanh.f32 %v764_v52  ;;  %v779_v63 = vmul.f32 0.5, %v267_v49  ;;  %v270_v0 = vld [vmem:[%s4634_s3 + $0x398] sm:$0xff] }
  0xa3   : > { %v3568_v10 = vpop.eup %3567  ;;  %2795 = vst [vmem:[%s4667_s16 + $0x280] sm:$0xff] %v2283_v1  ;;  %v2285_v11 = vadd.f32 0.5, %v1773_v2  ;;  %v1775_v12 = vmul.f32 0.5, %v3566_v5  ;;  %3593 = vtanh.f32 %v765_v57  ;;  %v780_v4 = vmul.f32 0.5, %v268_v54  ;;  %v271_v5 = vld [vmem:[%s4634_s3 + $0x3a0] sm:$0xff] }
  0xa4   : > { %v3570_v15 = vpop.eup %3569  ;;  %2796 = vst [vmem:[%s4667_s16 + $0x288] sm:$0xff] %v2284_v6  ;;  %v2286_v16 = vadd.f32 0.5, %v1774_v7  ;;  %v1776_v17 = vmul.f32 0.5, %v3568_v10  ;;  %3595 = vtanh.f32 %v766_v62  ;;  %v781_v9 = vmul.f32 0.5, %v269_v59  ;;  %v272_v10 = vld [vmem:[%s4634_s3 + $0x3a8] sm:$0xff] }
  0xa5   : > { %v3572_v20 = vpop.eup %3571  ;;  %2797 = vst [vmem:[%s4667_s16 + $0x290] sm:$0xff] %v2285_v11  ;;  %v2287_v21 = vadd.f32 0.5, %v1775_v12  ;;  %v1777_v22 = vmul.f32 0.5, %v3570_v15  ;;  %3597 = vtanh.f32 %v767_v3  ;;  %v782_v14 = vmul.f32 0.5, %v270_v0  ;;  %v273_v15 = vld [vmem:[%s4634_s3 + $0x3b0] sm:$0xff] }
  0xa6   : > { %v3574_v25 = vpop.eup %3573  ;;  %2798 = vst [vmem:[%s4667_s16 + $0x298] sm:$0xff] %v2286_v16  ;;  %v2288_v26 = vadd.f32 0.5, %v1776_v17  ;;  %v1778_v27 = vmul.f32 0.5, %v3572_v20  ;;  %3599 = vtanh.f32 %v768_v8  ;;  %v783_v19 = vmul.f32 0.5, %v271_v5  ;;  %v274_v20 = vld [vmem:[%s4634_s3 + $0x3b8] sm:$0xff] }
  0xa7   : > { %v3576_v30 = vpop.eup %3575  ;;  %2799 = vst [vmem:[%s4667_s16 + $0x2a0] sm:$0xff] %v2287_v21  ;;  %v2289_v31 = vadd.f32 0.5, %v1777_v22  ;;  %v1779_v32 = vmul.f32 0.5, %v3574_v25  ;;  %3601 = vtanh.f32 %v769_v13  ;;  %v784_v24 = vmul.f32 0.5, %v272_v10  ;;  %v275_v25 = vld [vmem:[%s4634_s3 + $0x3c0] sm:$0xff] }
  0xa8   : > { %v3578_v35 = vpop.eup %3577  ;;  %2800 = vst [vmem:[%s4667_s16 + $0x2a8] sm:$0xff] %v2288_v26  ;;  %v2290_v36 = vadd.f32 0.5, %v1778_v27  ;;  %v1780_v37 = vmul.f32 0.5, %v3576_v30  ;;  %3603 = vtanh.f32 %v770_v18  ;;  %v785_v29 = vmul.f32 0.5, %v273_v15  ;;  %v276_v30 = vld [vmem:[%s4634_s3 + $0x3c8] sm:$0xff] }
  0xa9   : > { %v3580_v40 = vpop.eup %3579  ;;  %2801 = vst [vmem:[%s4667_s16 + $0x2b0] sm:$0xff] %v2289_v31  ;;  %v2291_v41 = vadd.f32 0.5, %v1779_v32  ;;  %v1781_v42 = vmul.f32 0.5, %v3578_v35  ;;  %3605 = vtanh.f32 %v771_v23  ;;  %v786_v34 = vmul.f32 0.5, %v274_v20  ;;  %v277_v35 = vld [vmem:[%s4634_s3 + $0x3d0] sm:$0xff] }
  0xaa   : > { %v3582_v45 = vpop.eup %3581  ;;  %2802 = vst [vmem:[%s4667_s16 + $0x2b8] sm:$0xff] %v2290_v36  ;;  %v2292_v46 = vadd.f32 0.5, %v1780_v37  ;;  %v1782_v47 = vmul.f32 0.5, %v3580_v40  ;;  %3607 = vtanh.f32 %v772_v28  ;;  %v787_v39 = vmul.f32 0.5, %v275_v25  ;;  %v278_v40 = vld [vmem:[%s4634_s3 + $0x3d8] sm:$0xff] }
  0xab   : > { %v3584_v50 = vpop.eup %3583  ;;  %2803 = vst [vmem:[%s4667_s16 + $0x2c0] sm:$0xff] %v2291_v41  ;;  %v2293_v51 = vadd.f32 0.5, %v1781_v42  ;;  %v1783_v52 = vmul.f32 0.5, %v3582_v45  ;;  %3609 = vtanh.f32 %v773_v33  ;;  %v788_v44 = vmul.f32 0.5, %v276_v30  ;;  %v279_v45 = vld [vmem:[%s4634_s3 + $0x3e0] sm:$0xff] }
  0xac   : > { %v3586_v55 = vpop.eup %3585  ;;  %2804 = vst [vmem:[%s4667_s16 + $0x2c8] sm:$0xff] %v2292_v46  ;;  %v2294_v56 = vadd.f32 0.5, %v1782_v47  ;;  %v1784_v57 = vmul.f32 0.5, %v3584_v50  ;;  %3611 = vtanh.f32 %v774_v38  ;;  %v789_v49 = vmul.f32 0.5, %v277_v35  ;;  %v280_v50 = vld [vmem:[%s4634_s3 + $0x3e8] sm:$0xff] }
  0xad   : > { %v3588_v60 = vpop.eup %3587  ;;  %2805 = vst [vmem:[%s4667_s16 + $0x2d0] sm:$0xff] %v2293_v51  ;;  %v2295_v61 = vadd.f32 0.5, %v1783_v52  ;;  %v1785_v62 = vmul.f32 0.5, %v3586_v55  ;;  %3613 = vtanh.f32 %v775_v43  ;;  %v790_v54 = vmul.f32 0.5, %v278_v40  ;;  %v281_v55 = vld [vmem:[%s4634_s3 + $0x3f0] sm:$0xff] }
  0xae   : > { %v3590_v1 = vpop.eup %3589  ;;  %2806 = vst [vmem:[%s4667_s16 + $0x2d8] sm:$0xff] %v2294_v56  ;;  %v2296_v2 = vadd.f32 0.5, %v1784_v57  ;;  %v1786_v3 = vmul.f32 0.5, %v3588_v60  ;;  %3615 = vtanh.f32 %v776_v48  ;;  %v791_v59 = vmul.f32 0.5, %v279_v45  ;;  %v282_v60 = vld [vmem:[%s4634_s3 + $0x3f8] sm:$0xff] }
  0xaf   : > { %v3592_v6 = vpop.eup %3591  ;;  %2807 = vst [vmem:[%s4667_s16 + $0x2e0] sm:$0xff] %v2295_v61  ;;  %v2297_v7 = vadd.f32 0.5, %v1785_v62  ;;  %v1787_v8 = vmul.f32 0.5, %v3590_v1  ;;  %3617 = vtanh.f32 %v777_v53  ;;  %v792_v0 = vmul.f32 0.5, %v280_v50  ;;  %v283_v1 = vld [vmem:[%s4634_s3 + $0x400] sm:$0xff] }
  0xb0   : > { %v3594_v11 = vpop.eup %3593  ;;  %2808 = vst [vmem:[%s4667_s16 + $0x2e8] sm:$0xff] %v2296_v2  ;;  %v2298_v12 = vadd.f32 0.5, %v1786_v3  ;;  %v1788_v13 = vmul.f32 0.5, %v3592_v6  ;;  %3619 = vtanh.f32 %v778_v58  ;;  %v793_v5 = vmul.f32 0.5, %v281_v55  ;;  %v284_v6 = vld [vmem:[%s4634_s3 + $0x408] sm:$0xff] }
  0xb1   : > { %v3596_v16 = vpop.eup %3595  ;;  %2809 = vst [vmem:[%s4667_s16 + $0x2f0] sm:$0xff] %v2297_v7  ;;  %v2299_v17 = vadd.f32 0.5, %v1787_v8  ;;  %v1789_v18 = vmul.f32 0.5, %v3594_v11  ;;  %3621 = vtanh.f32 %v779_v63  ;;  %v794_v10 = vmul.f32 0.5, %v282_v60  ;;  %v285_v11 = vld [vmem:[%s4634_s3 + $0x410] sm:$0xff] }
  0xb2   : > { %v3598_v21 = vpop.eup %3597  ;;  %2810 = vst [vmem:[%s4667_s16 + $0x2f8] sm:$0xff] %v2298_v12  ;;  %v2300_v22 = vadd.f32 0.5, %v1788_v13  ;;  %v1790_v23 = vmul.f32 0.5, %v3596_v16  ;;  %3623 = vtanh.f32 %v780_v4  ;;  %v795_v15 = vmul.f32 0.5, %v283_v1  ;;  %v286_v16 = vld [vmem:[%s4634_s3 + $0x418] sm:$0xff] }
  0xb3   : > { %v3600_v26 = vpop.eup %3599  ;;  %2811 = vst [vmem:[%s4667_s16 + $0x300] sm:$0xff] %v2299_v17  ;;  %v2301_v27 = vadd.f32 0.5, %v1789_v18  ;;  %v1791_v28 = vmul.f32 0.5, %v3598_v21  ;;  %3625 = vtanh.f32 %v781_v9  ;;  %v796_v20 = vmul.f32 0.5, %v284_v6  ;;  %v287_v21 = vld [vmem:[%s4634_s3 + $0x420] sm:$0xff] }
  0xb4   : > { %v3602_v31 = vpop.eup %3601  ;;  %2812 = vst [vmem:[%s4667_s16 + $0x308] sm:$0xff] %v2300_v22  ;;  %v2302_v32 = vadd.f32 0.5, %v1790_v23  ;;  %v1792_v33 = vmul.f32 0.5, %v3600_v26  ;;  %3627 = vtanh.f32 %v782_v14  ;;  %v797_v25 = vmul.f32 0.5, %v285_v11  ;;  %v288_v26 = vld [vmem:[%s4634_s3 + $0x428] sm:$0xff] }
  0xb5   : > { %v3604_v36 = vpop.eup %3603  ;;  %2813 = vst [vmem:[%s4667_s16 + $0x310] sm:$0xff] %v2301_v27  ;;  %v2303_v37 = vadd.f32 0.5, %v1791_v28  ;;  %v1793_v38 = vmul.f32 0.5, %v3602_v31  ;;  %3629 = vtanh.f32 %v783_v19  ;;  %v798_v30 = vmul.f32 0.5, %v286_v16  ;;  %v289_v31 = vld [vmem:[%s4634_s3 + $0x430] sm:$0xff] }
  0xb6   : > { %v3606_v41 = vpop.eup %3605  ;;  %2814 = vst [vmem:[%s4667_s16 + $0x318] sm:$0xff] %v2302_v32  ;;  %v2304_v42 = vadd.f32 0.5, %v1792_v33  ;;  %v1794_v43 = vmul.f32 0.5, %v3604_v36  ;;  %3631 = vtanh.f32 %v784_v24  ;;  %v799_v35 = vmul.f32 0.5, %v287_v21  ;;  %v290_v36 = vld [vmem:[%s4634_s3 + $0x438] sm:$0xff] }
  0xb7   : > { %v3608_v46 = vpop.eup %3607  ;;  %2815 = vst [vmem:[%s4667_s16 + $0x320] sm:$0xff] %v2303_v37  ;;  %v2305_v47 = vadd.f32 0.5, %v1793_v38  ;;  %v1795_v48 = vmul.f32 0.5, %v3606_v41  ;;  %3633 = vtanh.f32 %v785_v29  ;;  %v800_v40 = vmul.f32 0.5, %v288_v26  ;;  %v291_v41 = vld [vmem:[%s4634_s3 + $0x440] sm:$0xff] }
  0xb8   : > { %v3610_v51 = vpop.eup %3609  ;;  %2816 = vst [vmem:[%s4667_s16 + $0x328] sm:$0xff] %v2304_v42  ;;  %v2306_v52 = vadd.f32 0.5, %v1794_v43  ;;  %v1796_v53 = vmul.f32 0.5, %v3608_v46  ;;  %3635 = vtanh.f32 %v786_v34  ;;  %v801_v45 = vmul.f32 0.5, %v289_v31  ;;  %v292_v46 = vld [vmem:[%s4634_s3 + $0x448] sm:$0xff] }
  0xb9   : > { %v3612_v56 = vpop.eup %3611  ;;  %2817 = vst [vmem:[%s4667_s16 + $0x330] sm:$0xff] %v2305_v47  ;;  %v2307_v57 = vadd.f32 0.5, %v1795_v48  ;;  %v1797_v58 = vmul.f32 0.5, %v3610_v51  ;;  %3637 = vtanh.f32 %v787_v39  ;;  %v802_v50 = vmul.f32 0.5, %v290_v36  ;;  %v293_v51 = vld [vmem:[%s4634_s3 + $0x450] sm:$0xff] }
  0xba   : > { %v3614_v61 = vpop.eup %3613  ;;  %2818 = vst [vmem:[%s4667_s16 + $0x338] sm:$0xff] %v2306_v52  ;;  %v2308_v62 = vadd.f32 0.5, %v1796_v53  ;;  %v1798_v63 = vmul.f32 0.5, %v3612_v56  ;;  %3639 = vtanh.f32 %v788_v44  ;;  %v803_v55 = vmul.f32 0.5, %v291_v41  ;;  %v294_v56 = vld [vmem:[%s4634_s3 + $0x458] sm:$0xff] }
  0xbb   : > { %v3616_v2 = vpop.eup %3615  ;;  %2819 = vst [vmem:[%s4667_s16 + $0x340] sm:$0xff] %v2307_v57  ;;  %v2309_v3 = vadd.f32 0.5, %v1797_v58  ;;  %v1799_v4 = vmul.f32 0.5, %v3614_v61  ;;  %3641 = vtanh.f32 %v789_v49  ;;  %v804_v60 = vmul.f32 0.5, %v292_v46  ;;  %v295_v61 = vld [vmem:[%s4634_s3 + $0x460] sm:$0xff] }
  0xbc   : > { %v3618_v7 = vpop.eup %3617  ;;  %2820 = vst [vmem:[%s4667_s16 + $0x348] sm:$0xff] %v2308_v62  ;;  %v2310_v8 = vadd.f32 0.5, %v1798_v63  ;;  %v1800_v9 = vmul.f32 0.5, %v3616_v2  ;;  %3643 = vtanh.f32 %v790_v54  ;;  %v805_v1 = vmul.f32 0.5, %v293_v51  ;;  %v296_v2 = vld [vmem:[%s4634_s3 + $0x468] sm:$0xff] }
  0xbd   : > { %v3620_v12 = vpop.eup %3619  ;;  %2821 = vst [vmem:[%s4667_s16 + $0x350] sm:$0xff] %v2309_v3  ;;  %v2311_v13 = vadd.f32 0.5, %v1799_v4  ;;  %v1801_v14 = vmul.f32 0.5, %v3618_v7  ;;  %3645 = vtanh.f32 %v791_v59  ;;  %v806_v6 = vmul.f32 0.5, %v294_v56  ;;  %v297_v7 = vld [vmem:[%s4634_s3 + $0x470] sm:$0xff] }
  0xbe   : > { %v3622_v17 = vpop.eup %3621  ;;  %2822 = vst [vmem:[%s4667_s16 + $0x358] sm:$0xff] %v2310_v8  ;;  %v2312_v18 = vadd.f32 0.5, %v1800_v9  ;;  %v1802_v19 = vmul.f32 0.5, %v3620_v12  ;;  %3647 = vtanh.f32 %v792_v0  ;;  %v807_v11 = vmul.f32 0.5, %v295_v61  ;;  %v298_v12 = vld [vmem:[%s4634_s3 + $0x478] sm:$0xff] }
  0xbf   : > { %v3624_v22 = vpop.eup %3623  ;;  %2823 = vst [vmem:[%s4667_s16 + $0x360] sm:$0xff] %v2311_v13  ;;  %v2313_v23 = vadd.f32 0.5, %v1801_v14  ;;  %v1803_v24 = vmul.f32 0.5, %v3622_v17  ;;  %3649 = vtanh.f32 %v793_v5  ;;  %v808_v16 = vmul.f32 0.5, %v296_v2  ;;  %v299_v17 = vld [vmem:[%s4634_s3 + $0x480] sm:$0xff] }
  0xc0   : > { %v3626_v27 = vpop.eup %3625  ;;  %2824 = vst [vmem:[%s4667_s16 + $0x368] sm:$0xff] %v2312_v18  ;;  %v2314_v28 = vadd.f32 0.5, %v1802_v19  ;;  %v1804_v29 = vmul.f32 0.5, %v3624_v22  ;;  %3651 = vtanh.f32 %v794_v10  ;;  %v809_v21 = vmul.f32 0.5, %v297_v7  ;;  %v300_v22 = vld [vmem:[%s4634_s3 + $0x488] sm:$0xff] }
  0xc1   : > { %v3628_v32 = vpop.eup %3627  ;;  %2825 = vst [vmem:[%s4667_s16 + $0x370] sm:$0xff] %v2313_v23  ;;  %v2315_v33 = vadd.f32 0.5, %v1803_v24  ;;  %v1805_v34 = vmul.f32 0.5, %v3626_v27  ;;  %3653 = vtanh.f32 %v795_v15  ;;  %v810_v26 = vmul.f32 0.5, %v298_v12  ;;  %v301_v27 = vld [vmem:[%s4634_s3 + $0x490] sm:$0xff] }
  0xc2   : > { %v3630_v37 = vpop.eup %3629  ;;  %2826 = vst [vmem:[%s4667_s16 + $0x378] sm:$0xff] %v2314_v28  ;;  %v2316_v38 = vadd.f32 0.5, %v1804_v29  ;;  %v1806_v39 = vmul.f32 0.5, %v3628_v32  ;;  %3655 = vtanh.f32 %v796_v20  ;;  %v811_v31 = vmul.f32 0.5, %v299_v17  ;;  %v302_v32 = vld [vmem:[%s4634_s3 + $0x498] sm:$0xff] }
  0xc3   : > { %v3632_v42 = vpop.eup %3631  ;;  %2827 = vst [vmem:[%s4667_s16 + $0x380] sm:$0xff] %v2315_v33  ;;  %v2317_v43 = vadd.f32 0.5, %v1805_v34  ;;  %v1807_v44 = vmul.f32 0.5, %v3630_v37  ;;  %3657 = vtanh.f32 %v797_v25  ;;  %v812_v36 = vmul.f32 0.5, %v300_v22  ;;  %v303_v37 = vld [vmem:[%s4634_s3 + $0x4a0] sm:$0xff] }
  0xc4   : > { %v3634_v47 = vpop.eup %3633  ;;  %2828 = vst [vmem:[%s4667_s16 + $0x388] sm:$0xff] %v2316_v38  ;;  %v2318_v48 = vadd.f32 0.5, %v1806_v39  ;;  %v1808_v49 = vmul.f32 0.5, %v3632_v42  ;;  %3659 = vtanh.f32 %v798_v30  ;;  %v813_v41 = vmul.f32 0.5, %v301_v27  ;;  %v304_v42 = vld [vmem:[%s4634_s3 + $0x4a8] sm:$0xff] }
  0xc5   : > { %v3636_v52 = vpop.eup %3635  ;;  %2829 = vst [vmem:[%s4667_s16 + $0x390] sm:$0xff] %v2317_v43  ;;  %v2319_v53 = vadd.f32 0.5, %v1807_v44  ;;  %v1809_v54 = vmul.f32 0.5, %v3634_v47  ;;  %3661 = vtanh.f32 %v799_v35  ;;  %v814_v46 = vmul.f32 0.5, %v302_v32  ;;  %v305_v47 = vld [vmem:[%s4634_s3 + $0x4b0] sm:$0xff] }
  0xc6   : > { %v3638_v57 = vpop.eup %3637  ;;  %2830 = vst [vmem:[%s4667_s16 + $0x398] sm:$0xff] %v2318_v48  ;;  %v2320_v58 = vadd.f32 0.5, %v1808_v49  ;;  %v1810_v59 = vmul.f32 0.5, %v3636_v52  ;;  %3663 = vtanh.f32 %v800_v40  ;;  %v815_v51 = vmul.f32 0.5, %v303_v37  ;;  %v306_v52 = vld [vmem:[%s4634_s3 + $0x4b8] sm:$0xff] }
  0xc7   : > { %v3640_v62 = vpop.eup %3639  ;;  %2831 = vst [vmem:[%s4667_s16 + $0x3a0] sm:$0xff] %v2319_v53  ;;  %v2321_v63 = vadd.f32 0.5, %v1809_v54  ;;  %v1811_v0 = vmul.f32 0.5, %v3638_v57  ;;  %3665 = vtanh.f32 %v801_v45  ;;  %v816_v56 = vmul.f32 0.5, %v304_v42  ;;  %v307_v57 = vld [vmem:[%s4634_s3 + $0x4c0] sm:$0xff] }
  0xc8   : > { %v3642_v3 = vpop.eup %3641  ;;  %2832 = vst [vmem:[%s4667_s16 + $0x3a8] sm:$0xff] %v2320_v58  ;;  %v2322_v4 = vadd.f32 0.5, %v1810_v59  ;;  %v1812_v5 = vmul.f32 0.5, %v3640_v62  ;;  %3667 = vtanh.f32 %v802_v50  ;;  %v817_v61 = vmul.f32 0.5, %v305_v47  ;;  %v308_v62 = vld [vmem:[%s4634_s3 + $0x4c8] sm:$0xff] }
  0xc9   : > { %v3644_v8 = vpop.eup %3643  ;;  %2833 = vst [vmem:[%s4667_s16 + $0x3b0] sm:$0xff] %v2321_v63  ;;  %v2323_v9 = vadd.f32 0.5, %v1811_v0  ;;  %v1813_v10 = vmul.f32 0.5, %v3642_v3  ;;  %3669 = vtanh.f32 %v803_v55  ;;  %v818_v2 = vmul.f32 0.5, %v306_v52  ;;  %v309_v3 = vld [vmem:[%s4634_s3 + $0x4d0] sm:$0xff] }
  0xca   : > { %v3646_v13 = vpop.eup %3645  ;;  %2834 = vst [vmem:[%s4667_s16 + $0x3b8] sm:$0xff] %v2322_v4  ;;  %v2324_v14 = vadd.f32 0.5, %v1812_v5  ;;  %v1814_v15 = vmul.f32 0.5, %v3644_v8  ;;  %3671 = vtanh.f32 %v804_v60  ;;  %v819_v7 = vmul.f32 0.5, %v307_v57  ;;  %v310_v8 = vld [vmem:[%s4634_s3 + $0x4d8] sm:$0xff] }
  0xcb   : > { %v3648_v18 = vpop.eup %3647  ;;  %2835 = vst [vmem:[%s4667_s16 + $0x3c0] sm:$0xff] %v2323_v9  ;;  %v2325_v19 = vadd.f32 0.5, %v1813_v10  ;;  %v1815_v20 = vmul.f32 0.5, %v3646_v13  ;;  %3673 = vtanh.f32 %v805_v1  ;;  %v820_v12 = vmul.f32 0.5, %v308_v62  ;;  %v311_v13 = vld [vmem:[%s4634_s3 + $0x4e0] sm:$0xff] }
  0xcc   : > { %v3650_v23 = vpop.eup %3649  ;;  %2836 = vst [vmem:[%s4667_s16 + $0x3c8] sm:$0xff] %v2324_v14  ;;  %v2326_v24 = vadd.f32 0.5, %v1814_v15  ;;  %v1816_v25 = vmul.f32 0.5, %v3648_v18  ;;  %3675 = vtanh.f32 %v806_v6  ;;  %v821_v17 = vmul.f32 0.5, %v309_v3  ;;  %v312_v18 = vld [vmem:[%s4634_s3 + $0x4e8] sm:$0xff] }
  0xcd   : > { %v3652_v28 = vpop.eup %3651  ;;  %2837 = vst [vmem:[%s4667_s16 + $0x3d0] sm:$0xff] %v2325_v19  ;;  %v2327_v29 = vadd.f32 0.5, %v1815_v20  ;;  %v1817_v30 = vmul.f32 0.5, %v3650_v23  ;;  %3677 = vtanh.f32 %v807_v11  ;;  %v822_v22 = vmul.f32 0.5, %v310_v8  ;;  %v313_v23 = vld [vmem:[%s4634_s3 + $0x4f0] sm:$0xff] }
  0xce   : > { %v3654_v33 = vpop.eup %3653  ;;  %2838 = vst [vmem:[%s4667_s16 + $0x3d8] sm:$0xff] %v2326_v24  ;;  %v2328_v34 = vadd.f32 0.5, %v1816_v25  ;;  %v1818_v35 = vmul.f32 0.5, %v3652_v28  ;;  %3679 = vtanh.f32 %v808_v16  ;;  %v823_v27 = vmul.f32 0.5, %v311_v13  ;;  %v314_v28 = vld [vmem:[%s4634_s3 + $0x4f8] sm:$0xff] }
  0xcf   : > { %v3656_v38 = vpop.eup %3655  ;;  %2839 = vst [vmem:[%s4667_s16 + $0x3e0] sm:$0xff] %v2327_v29  ;;  %v2329_v39 = vadd.f32 0.5, %v1817_v30  ;;  %v1819_v40 = vmul.f32 0.5, %v3654_v33  ;;  %3681 = vtanh.f32 %v809_v21  ;;  %v824_v32 = vmul.f32 0.5, %v312_v18  ;;  %v315_v33 = vld [vmem:[%s4634_s3 + $0x500] sm:$0xff] }
  0xd0   : > { %v3658_v43 = vpop.eup %3657  ;;  %2840 = vst [vmem:[%s4667_s16 + $0x3e8] sm:$0xff] %v2328_v34  ;;  %v2330_v44 = vadd.f32 0.5, %v1818_v35  ;;  %v1820_v45 = vmul.f32 0.5, %v3656_v38  ;;  %3683 = vtanh.f32 %v810_v26  ;;  %v825_v37 = vmul.f32 0.5, %v313_v23  ;;  %v316_v38 = vld [vmem:[%s4634_s3 + $0x508] sm:$0xff] }
  0xd1   : > { %v3660_v48 = vpop.eup %3659  ;;  %2841 = vst [vmem:[%s4667_s16 + $0x3f0] sm:$0xff] %v2329_v39  ;;  %v2331_v49 = vadd.f32 0.5, %v1819_v40  ;;  %v1821_v50 = vmul.f32 0.5, %v3658_v43  ;;  %3685 = vtanh.f32 %v811_v31  ;;  %v826_v42 = vmul.f32 0.5, %v314_v28  ;;  %v317_v43 = vld [vmem:[%s4634_s3 + $0x510] sm:$0xff] }
  0xd2   : > { %v3662_v53 = vpop.eup %3661  ;;  %2842 = vst [vmem:[%s4667_s16 + $0x3f8] sm:$0xff] %v2330_v44  ;;  %v2332_v54 = vadd.f32 0.5, %v1820_v45  ;;  %v1822_v55 = vmul.f32 0.5, %v3660_v48  ;;  %3687 = vtanh.f32 %v812_v36  ;;  %v827_v47 = vmul.f32 0.5, %v315_v33  ;;  %v318_v48 = vld [vmem:[%s4634_s3 + $0x518] sm:$0xff] }
  0xd3   : > { %v3664_v58 = vpop.eup %3663  ;;  %2843 = vst [vmem:[%s4667_s16 + $0x400] sm:$0xff] %v2331_v49  ;;  %v2333_v59 = vadd.f32 0.5, %v1821_v50  ;;  %v1823_v60 = vmul.f32 0.5, %v3662_v53  ;;  %3689 = vtanh.f32 %v813_v41  ;;  %v828_v52 = vmul.f32 0.5, %v316_v38  ;;  %v319_v53 = vld [vmem:[%s4634_s3 + $0x520] sm:$0xff] }
  0xd4   : > { %v3666_v63 = vpop.eup %3665  ;;  %2844 = vst [vmem:[%s4667_s16 + $0x408] sm:$0xff] %v2332_v54  ;;  %v2334_v0 = vadd.f32 0.5, %v1822_v55  ;;  %v1824_v1 = vmul.f32 0.5, %v3664_v58  ;;  %3691 = vtanh.f32 %v814_v46  ;;  %v829_v57 = vmul.f32 0.5, %v317_v43  ;;  %v320_v58 = vld [vmem:[%s4634_s3 + $0x528] sm:$0xff] }
  0xd5   : > { %v3668_v4 = vpop.eup %3667  ;;  %2845 = vst [vmem:[%s4667_s16 + $0x410] sm:$0xff] %v2333_v59  ;;  %v2335_v5 = vadd.f32 0.5, %v1823_v60  ;;  %v1825_v6 = vmul.f32 0.5, %v3666_v63  ;;  %3693 = vtanh.f32 %v815_v51  ;;  %v830_v62 = vmul.f32 0.5, %v318_v48  ;;  %v321_v63 = vld [vmem:[%s4634_s3 + $0x530] sm:$0xff] }
  0xd6   : > { %v3670_v9 = vpop.eup %3669  ;;  %2846 = vst [vmem:[%s4667_s16 + $0x418] sm:$0xff] %v2334_v0  ;;  %v2336_v10 = vadd.f32 0.5, %v1824_v1  ;;  %v1826_v11 = vmul.f32 0.5, %v3668_v4  ;;  %3695 = vtanh.f32 %v816_v56  ;;  %v831_v3 = vmul.f32 0.5, %v319_v53  ;;  %v322_v4 = vld [vmem:[%s4634_s3 + $0x538] sm:$0xff] }
  0xd7   : > { %v3672_v14 = vpop.eup %3671  ;;  %2847 = vst [vmem:[%s4667_s16 + $0x420] sm:$0xff] %v2335_v5  ;;  %v2337_v15 = vadd.f32 0.5, %v1825_v6  ;;  %v1827_v16 = vmul.f32 0.5, %v3670_v9  ;;  %3697 = vtanh.f32 %v817_v61  ;;  %v832_v8 = vmul.f32 0.5, %v320_v58  ;;  %v323_v9 = vld [vmem:[%s4634_s3 + $0x540] sm:$0xff] }
  0xd8   : > { %v3674_v19 = vpop.eup %3673  ;;  %2848 = vst [vmem:[%s4667_s16 + $0x428] sm:$0xff] %v2336_v10  ;;  %v2338_v20 = vadd.f32 0.5, %v1826_v11  ;;  %v1828_v21 = vmul.f32 0.5, %v3672_v14  ;;  %3699 = vtanh.f32 %v818_v2  ;;  %v833_v13 = vmul.f32 0.5, %v321_v63  ;;  %v324_v14 = vld [vmem:[%s4634_s3 + $0x548] sm:$0xff] }
  0xd9   : > { %v3676_v24 = vpop.eup %3675  ;;  %2849 = vst [vmem:[%s4667_s16 + $0x430] sm:$0xff] %v2337_v15  ;;  %v2339_v25 = vadd.f32 0.5, %v1827_v16  ;;  %v1829_v26 = vmul.f32 0.5, %v3674_v19  ;;  %3701 = vtanh.f32 %v819_v7  ;;  %v834_v18 = vmul.f32 0.5, %v322_v4  ;;  %v325_v19 = vld [vmem:[%s4634_s3 + $0x550] sm:$0xff] }
  0xda   : > { %v3678_v29 = vpop.eup %3677  ;;  %2850 = vst [vmem:[%s4667_s16 + $0x438] sm:$0xff] %v2338_v20  ;;  %v2340_v30 = vadd.f32 0.5, %v1828_v21  ;;  %v1830_v31 = vmul.f32 0.5, %v3676_v24  ;;  %3703 = vtanh.f32 %v820_v12  ;;  %v835_v23 = vmul.f32 0.5, %v323_v9  ;;  %v326_v24 = vld [vmem:[%s4634_s3 + $0x558] sm:$0xff] }
  0xdb   : > { %v3680_v34 = vpop.eup %3679  ;;  %2851 = vst [vmem:[%s4667_s16 + $0x440] sm:$0xff] %v2339_v25  ;;  %v2341_v35 = vadd.f32 0.5, %v1829_v26  ;;  %v1831_v36 = vmul.f32 0.5, %v3678_v29  ;;  %3705 = vtanh.f32 %v821_v17  ;;  %v836_v28 = vmul.f32 0.5, %v324_v14  ;;  %v327_v29 = vld [vmem:[%s4634_s3 + $0x560] sm:$0xff] }
  0xdc   : > { %v3682_v39 = vpop.eup %3681  ;;  %2852 = vst [vmem:[%s4667_s16 + $0x448] sm:$0xff] %v2340_v30  ;;  %v2342_v40 = vadd.f32 0.5, %v1830_v31  ;;  %v1832_v41 = vmul.f32 0.5, %v3680_v34  ;;  %3707 = vtanh.f32 %v822_v22  ;;  %v837_v33 = vmul.f32 0.5, %v325_v19  ;;  %v328_v34 = vld [vmem:[%s4634_s3 + $0x568] sm:$0xff] }
  0xdd   : > { %v3684_v44 = vpop.eup %3683  ;;  %2853 = vst [vmem:[%s4667_s16 + $0x450] sm:$0xff] %v2341_v35  ;;  %v2343_v45 = vadd.f32 0.5, %v1831_v36  ;;  %v1833_v46 = vmul.f32 0.5, %v3682_v39  ;;  %3709 = vtanh.f32 %v823_v27  ;;  %v838_v38 = vmul.f32 0.5, %v326_v24  ;;  %v329_v39 = vld [vmem:[%s4634_s3 + $0x570] sm:$0xff] }
  0xde   : > { %v3686_v49 = vpop.eup %3685  ;;  %2854 = vst [vmem:[%s4667_s16 + $0x458] sm:$0xff] %v2342_v40  ;;  %v2344_v50 = vadd.f32 0.5, %v1832_v41  ;;  %v1834_v51 = vmul.f32 0.5, %v3684_v44  ;;  %3711 = vtanh.f32 %v824_v32  ;;  %v839_v43 = vmul.f32 0.5, %v327_v29  ;;  %v330_v44 = vld [vmem:[%s4634_s3 + $0x578] sm:$0xff] }
  0xdf   : > { %v3688_v54 = vpop.eup %3687  ;;  %2855 = vst [vmem:[%s4667_s16 + $0x460] sm:$0xff] %v2343_v45  ;;  %v2345_v55 = vadd.f32 0.5, %v1833_v46  ;;  %v1835_v56 = vmul.f32 0.5, %v3686_v49  ;;  %3713 = vtanh.f32 %v825_v37  ;;  %v840_v48 = vmul.f32 0.5, %v328_v34  ;;  %v331_v49 = vld [vmem:[%s4634_s3 + $0x580] sm:$0xff] }
  0xe0   : > { %v3690_v59 = vpop.eup %3689  ;;  %2856 = vst [vmem:[%s4667_s16 + $0x468] sm:$0xff] %v2344_v50  ;;  %v2346_v60 = vadd.f32 0.5, %v1834_v51  ;;  %v1836_v61 = vmul.f32 0.5, %v3688_v54  ;;  %3715 = vtanh.f32 %v826_v42  ;;  %v841_v53 = vmul.f32 0.5, %v329_v39  ;;  %v332_v54 = vld [vmem:[%s4634_s3 + $0x588] sm:$0xff] }
  0xe1   : > { %v3692_v0 = vpop.eup %3691  ;;  %2857 = vst [vmem:[%s4667_s16 + $0x470] sm:$0xff] %v2345_v55  ;;  %v2347_v1 = vadd.f32 0.5, %v1835_v56  ;;  %v1837_v2 = vmul.f32 0.5, %v3690_v59  ;;  %3717 = vtanh.f32 %v827_v47  ;;  %v842_v58 = vmul.f32 0.5, %v330_v44  ;;  %v333_v59 = vld [vmem:[%s4634_s3 + $0x590] sm:$0xff] }
  0xe2   : > { %v3694_v5 = vpop.eup %3693  ;;  %2858 = vst [vmem:[%s4667_s16 + $0x478] sm:$0xff] %v2346_v60  ;;  %v2348_v6 = vadd.f32 0.5, %v1836_v61  ;;  %v1838_v7 = vmul.f32 0.5, %v3692_v0  ;;  %3719 = vtanh.f32 %v828_v52  ;;  %v843_v63 = vmul.f32 0.5, %v331_v49  ;;  %v334_v0 = vld [vmem:[%s4634_s3 + $0x598] sm:$0xff] }
  0xe3   : > { %v3696_v10 = vpop.eup %3695  ;;  %2859 = vst [vmem:[%s4667_s16 + $0x480] sm:$0xff] %v2347_v1  ;;  %v2349_v11 = vadd.f32 0.5, %v1837_v2  ;;  %v1839_v12 = vmul.f32 0.5, %v3694_v5  ;;  %3721 = vtanh.f32 %v829_v57  ;;  %v844_v4 = vmul.f32 0.5, %v332_v54  ;;  %v335_v5 = vld [vmem:[%s4634_s3 + $0x5a0] sm:$0xff] }
  0xe4   : > { %v3698_v15 = vpop.eup %3697  ;;  %2860 = vst [vmem:[%s4667_s16 + $0x488] sm:$0xff] %v2348_v6  ;;  %v2350_v16 = vadd.f32 0.5, %v1838_v7  ;;  %v1840_v17 = vmul.f32 0.5, %v3696_v10  ;;  %3723 = vtanh.f32 %v830_v62  ;;  %v845_v9 = vmul.f32 0.5, %v333_v59  ;;  %v336_v10 = vld [vmem:[%s4634_s3 + $0x5a8] sm:$0xff] }
  0xe5   : > { %v3700_v20 = vpop.eup %3699  ;;  %2861 = vst [vmem:[%s4667_s16 + $0x490] sm:$0xff] %v2349_v11  ;;  %v2351_v21 = vadd.f32 0.5, %v1839_v12  ;;  %v1841_v22 = vmul.f32 0.5, %v3698_v15  ;;  %3725 = vtanh.f32 %v831_v3  ;;  %v846_v14 = vmul.f32 0.5, %v334_v0  ;;  %v337_v15 = vld [vmem:[%s4634_s3 + $0x5b0] sm:$0xff] }
  0xe6   : > { %v3702_v25 = vpop.eup %3701  ;;  %2862 = vst [vmem:[%s4667_s16 + $0x498] sm:$0xff] %v2350_v16  ;;  %v2352_v26 = vadd.f32 0.5, %v1840_v17  ;;  %v1842_v27 = vmul.f32 0.5, %v3700_v20  ;;  %3727 = vtanh.f32 %v832_v8  ;;  %v847_v19 = vmul.f32 0.5, %v335_v5  ;;  %v338_v20 = vld [vmem:[%s4634_s3 + $0x5b8] sm:$0xff] }
  0xe7   : > { %v3704_v30 = vpop.eup %3703  ;;  %2863 = vst [vmem:[%s4667_s16 + $0x4a0] sm:$0xff] %v2351_v21  ;;  %v2353_v31 = vadd.f32 0.5, %v1841_v22  ;;  %v1843_v32 = vmul.f32 0.5, %v3702_v25  ;;  %3729 = vtanh.f32 %v833_v13  ;;  %v848_v24 = vmul.f32 0.5, %v336_v10  ;;  %v339_v25 = vld [vmem:[%s4634_s3 + $0x5c0] sm:$0xff] }
  0xe8   : > { %v3706_v35 = vpop.eup %3705  ;;  %2864 = vst [vmem:[%s4667_s16 + $0x4a8] sm:$0xff] %v2352_v26  ;;  %v2354_v36 = vadd.f32 0.5, %v1842_v27  ;;  %v1844_v37 = vmul.f32 0.5, %v3704_v30  ;;  %3731 = vtanh.f32 %v834_v18  ;;  %v849_v29 = vmul.f32 0.5, %v337_v15  ;;  %v340_v30 = vld [vmem:[%s4634_s3 + $0x5c8] sm:$0xff] }
  0xe9   : > { %v3708_v40 = vpop.eup %3707  ;;  %2865 = vst [vmem:[%s4667_s16 + $0x4b0] sm:$0xff] %v2353_v31  ;;  %v2355_v41 = vadd.f32 0.5, %v1843_v32  ;;  %v1845_v42 = vmul.f32 0.5, %v3706_v35  ;;  %3733 = vtanh.f32 %v835_v23  ;;  %v850_v34 = vmul.f32 0.5, %v338_v20  ;;  %v341_v35 = vld [vmem:[%s4634_s3 + $0x5d0] sm:$0xff] }
  0xea   : > { %v3710_v45 = vpop.eup %3709  ;;  %2866 = vst [vmem:[%s4667_s16 + $0x4b8] sm:$0xff] %v2354_v36  ;;  %v2356_v46 = vadd.f32 0.5, %v1844_v37  ;;  %v1846_v47 = vmul.f32 0.5, %v3708_v40  ;;  %3735 = vtanh.f32 %v836_v28  ;;  %v851_v39 = vmul.f32 0.5, %v339_v25  ;;  %v342_v40 = vld [vmem:[%s4634_s3 + $0x5d8] sm:$0xff] }
  0xeb   : > { %v3712_v50 = vpop.eup %3711  ;;  %2867 = vst [vmem:[%s4667_s16 + $0x4c0] sm:$0xff] %v2355_v41  ;;  %v2357_v51 = vadd.f32 0.5, %v1845_v42  ;;  %v1847_v52 = vmul.f32 0.5, %v3710_v45  ;;  %3737 = vtanh.f32 %v837_v33  ;;  %v852_v44 = vmul.f32 0.5, %v340_v30  ;;  %v343_v45 = vld [vmem:[%s4634_s3 + $0x5e0] sm:$0xff] }
  0xec   : > { %v3714_v55 = vpop.eup %3713  ;;  %2868 = vst [vmem:[%s4667_s16 + $0x4c8] sm:$0xff] %v2356_v46  ;;  %v2358_v56 = vadd.f32 0.5, %v1846_v47  ;;  %v1848_v57 = vmul.f32 0.5, %v3712_v50  ;;  %3739 = vtanh.f32 %v838_v38  ;;  %v853_v49 = vmul.f32 0.5, %v341_v35  ;;  %v344_v50 = vld [vmem:[%s4634_s3 + $0x5e8] sm:$0xff] }
  0xed   : > { %v3716_v60 = vpop.eup %3715  ;;  %2869 = vst [vmem:[%s4667_s16 + $0x4d0] sm:$0xff] %v2357_v51  ;;  %v2359_v61 = vadd.f32 0.5, %v1847_v52  ;;  %v1849_v62 = vmul.f32 0.5, %v3714_v55  ;;  %3741 = vtanh.f32 %v839_v43  ;;  %v854_v54 = vmul.f32 0.5, %v342_v40  ;;  %v345_v55 = vld [vmem:[%s4634_s3 + $0x5f0] sm:$0xff] }
  0xee   : > { %v3718_v1 = vpop.eup %3717  ;;  %2870 = vst [vmem:[%s4667_s16 + $0x4d8] sm:$0xff] %v2358_v56  ;;  %v2360_v2 = vadd.f32 0.5, %v1848_v57  ;;  %v1850_v3 = vmul.f32 0.5, %v3716_v60  ;;  %3743 = vtanh.f32 %v840_v48  ;;  %v855_v59 = vmul.f32 0.5, %v343_v45  ;;  %v346_v60 = vld [vmem:[%s4634_s3 + $0x5f8] sm:$0xff] }
  0xef   : > { %v3720_v6 = vpop.eup %3719  ;;  %2871 = vst [vmem:[%s4667_s16 + $0x4e0] sm:$0xff] %v2359_v61  ;;  %v2361_v7 = vadd.f32 0.5, %v1849_v62  ;;  %v1851_v8 = vmul.f32 0.5, %v3718_v1  ;;  %3745 = vtanh.f32 %v841_v53  ;;  %v856_v0 = vmul.f32 0.5, %v344_v50  ;;  %v347_v1 = vld [vmem:[%s4634_s3 + $0x600] sm:$0xff] }
  0xf0   : > { %v3722_v11 = vpop.eup %3721  ;;  %2872 = vst [vmem:[%s4667_s16 + $0x4e8] sm:$0xff] %v2360_v2  ;;  %v2362_v12 = vadd.f32 0.5, %v1850_v3  ;;  %v1852_v13 = vmul.f32 0.5, %v3720_v6  ;;  %3747 = vtanh.f32 %v842_v58  ;;  %v857_v5 = vmul.f32 0.5, %v345_v55  ;;  %v348_v6 = vld [vmem:[%s4634_s3 + $0x608] sm:$0xff] }
  0xf1   : > { %v3724_v16 = vpop.eup %3723  ;;  %2873 = vst [vmem:[%s4667_s16 + $0x4f0] sm:$0xff] %v2361_v7  ;;  %v2363_v17 = vadd.f32 0.5, %v1851_v8  ;;  %v1853_v18 = vmul.f32 0.5, %v3722_v11  ;;  %3749 = vtanh.f32 %v843_v63  ;;  %v858_v10 = vmul.f32 0.5, %v346_v60  ;;  %v349_v11 = vld [vmem:[%s4634_s3 + $0x610] sm:$0xff] }
  0xf2   : > { %v3726_v21 = vpop.eup %3725  ;;  %2874 = vst [vmem:[%s4667_s16 + $0x4f8] sm:$0xff] %v2362_v12  ;;  %v2364_v22 = vadd.f32 0.5, %v1852_v13  ;;  %v1854_v23 = vmul.f32 0.5, %v3724_v16  ;;  %3751 = vtanh.f32 %v844_v4  ;;  %v859_v15 = vmul.f32 0.5, %v347_v1  ;;  %v350_v16 = vld [vmem:[%s4634_s3 + $0x618] sm:$0xff] }
  0xf3   : > { %v3728_v26 = vpop.eup %3727  ;;  %2875 = vst [vmem:[%s4667_s16 + $0x500] sm:$0xff] %v2363_v17  ;;  %v2365_v27 = vadd.f32 0.5, %v1853_v18  ;;  %v1855_v28 = vmul.f32 0.5, %v3726_v21  ;;  %3753 = vtanh.f32 %v845_v9  ;;  %v860_v20 = vmul.f32 0.5, %v348_v6  ;;  %v351_v21 = vld [vmem:[%s4634_s3 + $0x620] sm:$0xff] }
  0xf4   : > { %v3730_v31 = vpop.eup %3729  ;;  %2876 = vst [vmem:[%s4667_s16 + $0x508] sm:$0xff] %v2364_v22  ;;  %v2366_v32 = vadd.f32 0.5, %v1854_v23  ;;  %v1856_v33 = vmul.f32 0.5, %v3728_v26  ;;  %3755 = vtanh.f32 %v846_v14  ;;  %v861_v25 = vmul.f32 0.5, %v349_v11  ;;  %v352_v26 = vld [vmem:[%s4634_s3 + $0x628] sm:$0xff] }
  0xf5   : > { %v3732_v36 = vpop.eup %3731  ;;  %2877 = vst [vmem:[%s4667_s16 + $0x510] sm:$0xff] %v2365_v27  ;;  %v2367_v37 = vadd.f32 0.5, %v1855_v28  ;;  %v1857_v38 = vmul.f32 0.5, %v3730_v31  ;;  %3757 = vtanh.f32 %v847_v19  ;;  %v862_v30 = vmul.f32 0.5, %v350_v16  ;;  %v353_v31 = vld [vmem:[%s4634_s3 + $0x630] sm:$0xff] }
  0xf6   : > { %v3734_v41 = vpop.eup %3733  ;;  %2878 = vst [vmem:[%s4667_s16 + $0x518] sm:$0xff] %v2366_v32  ;;  %v2368_v42 = vadd.f32 0.5, %v1856_v33  ;;  %v1858_v43 = vmul.f32 0.5, %v3732_v36  ;;  %3759 = vtanh.f32 %v848_v24  ;;  %v863_v35 = vmul.f32 0.5, %v351_v21  ;;  %v354_v36 = vld [vmem:[%s4634_s3 + $0x638] sm:$0xff] }
  0xf7   : > { %v3736_v46 = vpop.eup %3735  ;;  %2879 = vst [vmem:[%s4667_s16 + $0x520] sm:$0xff] %v2367_v37  ;;  %v2369_v47 = vadd.f32 0.5, %v1857_v38  ;;  %v1859_v48 = vmul.f32 0.5, %v3734_v41  ;;  %3761 = vtanh.f32 %v849_v29  ;;  %v864_v40 = vmul.f32 0.5, %v352_v26  ;;  %v355_v41 = vld [vmem:[%s4634_s3 + $0x640] sm:$0xff] }
  0xf8   : > { %v3738_v51 = vpop.eup %3737  ;;  %2880 = vst [vmem:[%s4667_s16 + $0x528] sm:$0xff] %v2368_v42  ;;  %v2370_v52 = vadd.f32 0.5, %v1858_v43  ;;  %v1860_v53 = vmul.f32 0.5, %v3736_v46  ;;  %3763 = vtanh.f32 %v850_v34  ;;  %v865_v45 = vmul.f32 0.5, %v353_v31  ;;  %v356_v46 = vld [vmem:[%s4634_s3 + $0x648] sm:$0xff] }
  0xf9   : > { %v3740_v56 = vpop.eup %3739  ;;  %2881 = vst [vmem:[%s4667_s16 + $0x530] sm:$0xff] %v2369_v47  ;;  %v2371_v57 = vadd.f32 0.5, %v1859_v48  ;;  %v1861_v58 = vmul.f32 0.5, %v3738_v51  ;;  %3765 = vtanh.f32 %v851_v39  ;;  %v866_v50 = vmul.f32 0.5, %v354_v36  ;;  %v357_v51 = vld [vmem:[%s4634_s3 + $0x650] sm:$0xff] }
  0xfa   : > { %v3742_v61 = vpop.eup %3741  ;;  %2882 = vst [vmem:[%s4667_s16 + $0x538] sm:$0xff] %v2370_v52  ;;  %v2372_v62 = vadd.f32 0.5, %v1860_v53  ;;  %v1862_v63 = vmul.f32 0.5, %v3740_v56  ;;  %3767 = vtanh.f32 %v852_v44  ;;  %v867_v55 = vmul.f32 0.5, %v355_v41  ;;  %v358_v56 = vld [vmem:[%s4634_s3 + $0x658] sm:$0xff] }
  0xfb   : > { %v3744_v2 = vpop.eup %3743  ;;  %2883 = vst [vmem:[%s4667_s16 + $0x540] sm:$0xff] %v2371_v57  ;;  %v2373_v3 = vadd.f32 0.5, %v1861_v58  ;;  %v1863_v4 = vmul.f32 0.5, %v3742_v61  ;;  %3769 = vtanh.f32 %v853_v49  ;;  %v868_v60 = vmul.f32 0.5, %v356_v46  ;;  %v359_v61 = vld [vmem:[%s4634_s3 + $0x660] sm:$0xff] }
  0xfc   : > { %v3746_v7 = vpop.eup %3745  ;;  %2884 = vst [vmem:[%s4667_s16 + $0x548] sm:$0xff] %v2372_v62  ;;  %v2374_v8 = vadd.f32 0.5, %v1862_v63  ;;  %v1864_v9 = vmul.f32 0.5, %v3744_v2  ;;  %3771 = vtanh.f32 %v854_v54  ;;  %v869_v1 = vmul.f32 0.5, %v357_v51  ;;  %v360_v2 = vld [vmem:[%s4634_s3 + $0x668] sm:$0xff] }
  0xfd   : > { %v3748_v12 = vpop.eup %3747  ;;  %2885 = vst [vmem:[%s4667_s16 + $0x550] sm:$0xff] %v2373_v3  ;;  %v2375_v13 = vadd.f32 0.5, %v1863_v4  ;;  %v1865_v14 = vmul.f32 0.5, %v3746_v7  ;;  %3773 = vtanh.f32 %v855_v59  ;;  %v870_v6 = vmul.f32 0.5, %v358_v56  ;;  %v361_v7 = vld [vmem:[%s4634_s3 + $0x670] sm:$0xff] }
  0xfe   : > { %v3750_v17 = vpop.eup %3749  ;;  %2886 = vst [vmem:[%s4667_s16 + $0x558] sm:$0xff] %v2374_v8  ;;  %v2376_v18 = vadd.f32 0.5, %v1864_v9  ;;  %v1866_v19 = vmul.f32 0.5, %v3748_v12  ;;  %3775 = vtanh.f32 %v856_v0  ;;  %v871_v11 = vmul.f32 0.5, %v359_v61  ;;  %v362_v12 = vld [vmem:[%s4634_s3 + $0x678] sm:$0xff] }
  0xff   : > { %v3752_v22 = vpop.eup %3751  ;;  %2887 = vst [vmem:[%s4667_s16 + $0x560] sm:$0xff] %v2375_v13  ;;  %v2377_v23 = vadd.f32 0.5, %v1865_v14  ;;  %v1867_v24 = vmul.f32 0.5, %v3750_v17  ;;  %3777 = vtanh.f32 %v857_v5  ;;  %v872_v16 = vmul.f32 0.5, %v360_v2  ;;  %v363_v17 = vld [vmem:[%s4634_s3 + $0x680] sm:$0xff] }
 0x100   : > { %v3754_v27 = vpop.eup %3753  ;;  %2888 = vst [vmem:[%s4667_s16 + $0x568] sm:$0xff] %v2376_v18  ;;  %v2378_v28 = vadd.f32 0.5, %v1866_v19  ;;  %v1868_v29 = vmul.f32 0.5, %v3752_v22  ;;  %3779 = vtanh.f32 %v858_v10  ;;  %v873_v21 = vmul.f32 0.5, %v361_v7  ;;  %v364_v22 = vld [vmem:[%s4634_s3 + $0x688] sm:$0xff] }
 0x101   : > { %v3756_v32 = vpop.eup %3755  ;;  %2889 = vst [vmem:[%s4667_s16 + $0x570] sm:$0xff] %v2377_v23  ;;  %v2379_v33 = vadd.f32 0.5, %v1867_v24  ;;  %v1869_v34 = vmul.f32 0.5, %v3754_v27  ;;  %3781 = vtanh.f32 %v859_v15  ;;  %v874_v26 = vmul.f32 0.5, %v362_v12  ;;  %v365_v27 = vld [vmem:[%s4634_s3 + $0x690] sm:$0xff] }
 0x102   : > { %v3758_v37 = vpop.eup %3757  ;;  %2890 = vst [vmem:[%s4667_s16 + $0x578] sm:$0xff] %v2378_v28  ;;  %v2380_v38 = vadd.f32 0.5, %v1868_v29  ;;  %v1870_v39 = vmul.f32 0.5, %v3756_v32  ;;  %3783 = vtanh.f32 %v860_v20  ;;  %v875_v31 = vmul.f32 0.5, %v363_v17  ;;  %v366_v32 = vld [vmem:[%s4634_s3 + $0x698] sm:$0xff] }
 0x103   : > { %v3760_v42 = vpop.eup %3759  ;;  %2891 = vst [vmem:[%s4667_s16 + $0x580] sm:$0xff] %v2379_v33  ;;  %v2381_v43 = vadd.f32 0.5, %v1869_v34  ;;  %v1871_v44 = vmul.f32 0.5, %v3758_v37  ;;  %3785 = vtanh.f32 %v861_v25  ;;  %v876_v36 = vmul.f32 0.5, %v364_v22  ;;  %v367_v37 = vld [vmem:[%s4634_s3 + $0x6a0] sm:$0xff] }
 0x104   : > { %v3762_v47 = vpop.eup %3761  ;;  %2892 = vst [vmem:[%s4667_s16 + $0x588] sm:$0xff] %v2380_v38  ;;  %v2382_v48 = vadd.f32 0.5, %v1870_v39  ;;  %v1872_v49 = vmul.f32 0.5, %v3760_v42  ;;  %3787 = vtanh.f32 %v862_v30  ;;  %v877_v41 = vmul.f32 0.5, %v365_v27  ;;  %v368_v42 = vld [vmem:[%s4634_s3 + $0x6a8] sm:$0xff] }
 0x105   : > { %v3764_v52 = vpop.eup %3763  ;;  %2893 = vst [vmem:[%s4667_s16 + $0x590] sm:$0xff] %v2381_v43  ;;  %v2383_v53 = vadd.f32 0.5, %v1871_v44  ;;  %v1873_v54 = vmul.f32 0.5, %v3762_v47  ;;  %3789 = vtanh.f32 %v863_v35  ;;  %v878_v46 = vmul.f32 0.5, %v366_v32  ;;  %v369_v47 = vld [vmem:[%s4634_s3 + $0x6b0] sm:$0xff] }
 0x106   : > { %v3766_v57 = vpop.eup %3765  ;;  %2894 = vst [vmem:[%s4667_s16 + $0x598] sm:$0xff] %v2382_v48  ;;  %v2384_v58 = vadd.f32 0.5, %v1872_v49  ;;  %v1874_v59 = vmul.f32 0.5, %v3764_v52  ;;  %3791 = vtanh.f32 %v864_v40  ;;  %v879_v51 = vmul.f32 0.5, %v367_v37  ;;  %v370_v52 = vld [vmem:[%s4634_s3 + $0x6b8] sm:$0xff] }
 0x107   : > { %v3768_v62 = vpop.eup %3767  ;;  %2895 = vst [vmem:[%s4667_s16 + $0x5a0] sm:$0xff] %v2383_v53  ;;  %v2385_v63 = vadd.f32 0.5, %v1873_v54  ;;  %v1875_v0 = vmul.f32 0.5, %v3766_v57  ;;  %3793 = vtanh.f32 %v865_v45  ;;  %v880_v56 = vmul.f32 0.5, %v368_v42  ;;  %v371_v57 = vld [vmem:[%s4634_s3 + $0x6c0] sm:$0xff] }
 0x108   : > { %v3770_v3 = vpop.eup %3769  ;;  %2896 = vst [vmem:[%s4667_s16 + $0x5a8] sm:$0xff] %v2384_v58  ;;  %v2386_v4 = vadd.f32 0.5, %v1874_v59  ;;  %v1876_v5 = vmul.f32 0.5, %v3768_v62  ;;  %3795 = vtanh.f32 %v866_v50  ;;  %v881_v61 = vmul.f32 0.5, %v369_v47  ;;  %v372_v62 = vld [vmem:[%s4634_s3 + $0x6c8] sm:$0xff] }
 0x109   : > { %v3772_v8 = vpop.eup %3771  ;;  %2897 = vst [vmem:[%s4667_s16 + $0x5b0] sm:$0xff] %v2385_v63  ;;  %v2387_v9 = vadd.f32 0.5, %v1875_v0  ;;  %v1877_v10 = vmul.f32 0.5, %v3770_v3  ;;  %3797 = vtanh.f32 %v867_v55  ;;  %v882_v2 = vmul.f32 0.5, %v370_v52  ;;  %v373_v3 = vld [vmem:[%s4634_s3 + $0x6d0] sm:$0xff] }
 0x10a   : > { %v3774_v13 = vpop.eup %3773  ;;  %2898 = vst [vmem:[%s4667_s16 + $0x5b8] sm:$0xff] %v2386_v4  ;;  %v2388_v14 = vadd.f32 0.5, %v1876_v5  ;;  %v1878_v15 = vmul.f32 0.5, %v3772_v8  ;;  %3799 = vtanh.f32 %v868_v60  ;;  %v883_v7 = vmul.f32 0.5, %v371_v57  ;;  %v374_v8 = vld [vmem:[%s4634_s3 + $0x6d8] sm:$0xff] }
 0x10b   : > { %v3776_v18 = vpop.eup %3775  ;;  %2899 = vst [vmem:[%s4667_s16 + $0x5c0] sm:$0xff] %v2387_v9  ;;  %v2389_v19 = vadd.f32 0.5, %v1877_v10  ;;  %v1879_v20 = vmul.f32 0.5, %v3774_v13  ;;  %3801 = vtanh.f32 %v869_v1  ;;  %v884_v12 = vmul.f32 0.5, %v372_v62  ;;  %v375_v13 = vld [vmem:[%s4634_s3 + $0x6e0] sm:$0xff] }
 0x10c   : > { %v3778_v23 = vpop.eup %3777  ;;  %2900 = vst [vmem:[%s4667_s16 + $0x5c8] sm:$0xff] %v2388_v14  ;;  %v2390_v24 = vadd.f32 0.5, %v1878_v15  ;;  %v1880_v25 = vmul.f32 0.5, %v3776_v18  ;;  %3803 = vtanh.f32 %v870_v6  ;;  %v885_v17 = vmul.f32 0.5, %v373_v3  ;;  %v376_v18 = vld [vmem:[%s4634_s3 + $0x6e8] sm:$0xff] }
 0x10d   : > { %v3780_v28 = vpop.eup %3779  ;;  %2901 = vst [vmem:[%s4667_s16 + $0x5d0] sm:$0xff] %v2389_v19  ;;  %v2391_v29 = vadd.f32 0.5, %v1879_v20  ;;  %v1881_v30 = vmul.f32 0.5, %v3778_v23  ;;  %3805 = vtanh.f32 %v871_v11  ;;  %v886_v22 = vmul.f32 0.5, %v374_v8  ;;  %v377_v23 = vld [vmem:[%s4634_s3 + $0x6f0] sm:$0xff] }
 0x10e   : > { %v3782_v33 = vpop.eup %3781  ;;  %2902 = vst [vmem:[%s4667_s16 + $0x5d8] sm:$0xff] %v2390_v24  ;;  %v2392_v34 = vadd.f32 0.5, %v1880_v25  ;;  %v1882_v35 = vmul.f32 0.5, %v3780_v28  ;;  %3807 = vtanh.f32 %v872_v16  ;;  %v887_v27 = vmul.f32 0.5, %v375_v13  ;;  %v378_v28 = vld [vmem:[%s4634_s3 + $0x6f8] sm:$0xff] }
 0x10f   : > { %v3784_v38 = vpop.eup %3783  ;;  %2903 = vst [vmem:[%s4667_s16 + $0x5e0] sm:$0xff] %v2391_v29  ;;  %v2393_v39 = vadd.f32 0.5, %v1881_v30  ;;  %v1883_v40 = vmul.f32 0.5, %v3782_v33  ;;  %3809 = vtanh.f32 %v873_v21  ;;  %v888_v32 = vmul.f32 0.5, %v376_v18  ;;  %v379_v33 = vld [vmem:[%s4634_s3 + $0x700] sm:$0xff] }
 0x110   : > { %v3786_v43 = vpop.eup %3785  ;;  %2904 = vst [vmem:[%s4667_s16 + $0x5e8] sm:$0xff] %v2392_v34  ;;  %v2394_v44 = vadd.f32 0.5, %v1882_v35  ;;  %v1884_v45 = vmul.f32 0.5, %v3784_v38  ;;  %3811 = vtanh.f32 %v874_v26  ;;  %v889_v37 = vmul.f32 0.5, %v377_v23  ;;  %v380_v38 = vld [vmem:[%s4634_s3 + $0x708] sm:$0xff] }
 0x111   : > { %v3788_v48 = vpop.eup %3787  ;;  %2905 = vst [vmem:[%s4667_s16 + $0x5f0] sm:$0xff] %v2393_v39  ;;  %v2395_v49 = vadd.f32 0.5, %v1883_v40  ;;  %v1885_v50 = vmul.f32 0.5, %v3786_v43  ;;  %3813 = vtanh.f32 %v875_v31  ;;  %v890_v42 = vmul.f32 0.5, %v378_v28  ;;  %v381_v43 = vld [vmem:[%s4634_s3 + $0x710] sm:$0xff] }
 0x112   : > { %v3790_v53 = vpop.eup %3789  ;;  %2906 = vst [vmem:[%s4667_s16 + $0x5f8] sm:$0xff] %v2394_v44  ;;  %v2396_v54 = vadd.f32 0.5, %v1884_v45  ;;  %v1886_v55 = vmul.f32 0.5, %v3788_v48  ;;  %3815 = vtanh.f32 %v876_v36  ;;  %v891_v47 = vmul.f32 0.5, %v379_v33  ;;  %v382_v48 = vld [vmem:[%s4634_s3 + $0x718] sm:$0xff] }
 0x113   : > { %v3792_v58 = vpop.eup %3791  ;;  %2907 = vst [vmem:[%s4667_s16 + $0x600] sm:$0xff] %v2395_v49  ;;  %v2397_v59 = vadd.f32 0.5, %v1885_v50  ;;  %v1887_v60 = vmul.f32 0.5, %v3790_v53  ;;  %3817 = vtanh.f32 %v877_v41  ;;  %v892_v52 = vmul.f32 0.5, %v380_v38  ;;  %v383_v53 = vld [vmem:[%s4634_s3 + $0x720] sm:$0xff] }
 0x114   : > { %v3794_v63 = vpop.eup %3793  ;;  %2908 = vst [vmem:[%s4667_s16 + $0x608] sm:$0xff] %v2396_v54  ;;  %v2398_v0 = vadd.f32 0.5, %v1886_v55  ;;  %v1888_v1 = vmul.f32 0.5, %v3792_v58  ;;  %3819 = vtanh.f32 %v878_v46  ;;  %v893_v57 = vmul.f32 0.5, %v381_v43  ;;  %v384_v58 = vld [vmem:[%s4634_s3 + $0x728] sm:$0xff] }
 0x115   : > { %v3796_v4 = vpop.eup %3795  ;;  %2909 = vst [vmem:[%s4667_s16 + $0x610] sm:$0xff] %v2397_v59  ;;  %v2399_v5 = vadd.f32 0.5, %v1887_v60  ;;  %v1889_v6 = vmul.f32 0.5, %v3794_v63  ;;  %3821 = vtanh.f32 %v879_v51  ;;  %v894_v62 = vmul.f32 0.5, %v382_v48  ;;  %v385_v63 = vld [vmem:[%s4634_s3 + $0x730] sm:$0xff] }
 0x116   : > { %v3798_v9 = vpop.eup %3797  ;;  %2910 = vst [vmem:[%s4667_s16 + $0x618] sm:$0xff] %v2398_v0  ;;  %v2400_v10 = vadd.f32 0.5, %v1888_v1  ;;  %v1890_v11 = vmul.f32 0.5, %v3796_v4  ;;  %3823 = vtanh.f32 %v880_v56  ;;  %v895_v3 = vmul.f32 0.5, %v383_v53  ;;  %v386_v4 = vld [vmem:[%s4634_s3 + $0x738] sm:$0xff] }
 0x117   : > { %v3800_v14 = vpop.eup %3799  ;;  %2911 = vst [vmem:[%s4667_s16 + $0x620] sm:$0xff] %v2399_v5  ;;  %v2401_v15 = vadd.f32 0.5, %v1889_v6  ;;  %v1891_v16 = vmul.f32 0.5, %v3798_v9  ;;  %3825 = vtanh.f32 %v881_v61  ;;  %v896_v8 = vmul.f32 0.5, %v384_v58  ;;  %v387_v9 = vld [vmem:[%s4634_s3 + $0x740] sm:$0xff] }
 0x118   : > { %v3802_v19 = vpop.eup %3801  ;;  %2912 = vst [vmem:[%s4667_s16 + $0x628] sm:$0xff] %v2400_v10  ;;  %v2402_v20 = vadd.f32 0.5, %v1890_v11  ;;  %v1892_v21 = vmul.f32 0.5, %v3800_v14  ;;  %3827 = vtanh.f32 %v882_v2  ;;  %v897_v13 = vmul.f32 0.5, %v385_v63  ;;  %v388_v14 = vld [vmem:[%s4634_s3 + $0x748] sm:$0xff] }
 0x119   : > { %v3804_v24 = vpop.eup %3803  ;;  %2913 = vst [vmem:[%s4667_s16 + $0x630] sm:$0xff] %v2401_v15  ;;  %v2403_v25 = vadd.f32 0.5, %v1891_v16  ;;  %v1893_v26 = vmul.f32 0.5, %v3802_v19  ;;  %3829 = vtanh.f32 %v883_v7  ;;  %v898_v18 = vmul.f32 0.5, %v386_v4  ;;  %v389_v19 = vld [vmem:[%s4634_s3 + $0x750] sm:$0xff] }
 0x11a   : > { %v3806_v29 = vpop.eup %3805  ;;  %2914 = vst [vmem:[%s4667_s16 + $0x638] sm:$0xff] %v2402_v20  ;;  %v2404_v30 = vadd.f32 0.5, %v1892_v21  ;;  %v1894_v31 = vmul.f32 0.5, %v3804_v24  ;;  %3831 = vtanh.f32 %v884_v12  ;;  %v899_v23 = vmul.f32 0.5, %v387_v9  ;;  %v390_v24 = vld [vmem:[%s4634_s3 + $0x758] sm:$0xff] }
 0x11b   : > { %v3808_v34 = vpop.eup %3807  ;;  %2915 = vst [vmem:[%s4667_s16 + $0x640] sm:$0xff] %v2403_v25  ;;  %v2405_v35 = vadd.f32 0.5, %v1893_v26  ;;  %v1895_v36 = vmul.f32 0.5, %v3806_v29  ;;  %3833 = vtanh.f32 %v885_v17  ;;  %v900_v28 = vmul.f32 0.5, %v388_v14  ;;  %v391_v29 = vld [vmem:[%s4634_s3 + $0x760] sm:$0xff] }
 0x11c   : > { %v3810_v39 = vpop.eup %3809  ;;  %2916 = vst [vmem:[%s4667_s16 + $0x648] sm:$0xff] %v2404_v30  ;;  %v2406_v40 = vadd.f32 0.5, %v1894_v31  ;;  %v1896_v41 = vmul.f32 0.5, %v3808_v34  ;;  %3835 = vtanh.f32 %v886_v22  ;;  %v901_v33 = vmul.f32 0.5, %v389_v19  ;;  %v392_v34 = vld [vmem:[%s4634_s3 + $0x768] sm:$0xff] }
 0x11d   : > { %v3812_v44 = vpop.eup %3811  ;;  %2917 = vst [vmem:[%s4667_s16 + $0x650] sm:$0xff] %v2405_v35  ;;  %v2407_v45 = vadd.f32 0.5, %v1895_v36  ;;  %v1897_v46 = vmul.f32 0.5, %v3810_v39  ;;  %3837 = vtanh.f32 %v887_v27  ;;  %v902_v38 = vmul.f32 0.5, %v390_v24  ;;  %v393_v39 = vld [vmem:[%s4634_s3 + $0x770] sm:$0xff] }
 0x11e   : > { %v3814_v49 = vpop.eup %3813  ;;  %2918 = vst [vmem:[%s4667_s16 + $0x658] sm:$0xff] %v2406_v40  ;;  %v2408_v50 = vadd.f32 0.5, %v1896_v41  ;;  %v1898_v51 = vmul.f32 0.5, %v3812_v44  ;;  %3839 = vtanh.f32 %v888_v32  ;;  %v903_v43 = vmul.f32 0.5, %v391_v29  ;;  %v394_v44 = vld [vmem:[%s4634_s3 + $0x778] sm:$0xff] }
 0x11f   : > { %v3816_v54 = vpop.eup %3815  ;;  %2919 = vst [vmem:[%s4667_s16 + $0x660] sm:$0xff] %v2407_v45  ;;  %v2409_v55 = vadd.f32 0.5, %v1897_v46  ;;  %v1899_v56 = vmul.f32 0.5, %v3814_v49  ;;  %3841 = vtanh.f32 %v889_v37  ;;  %v904_v48 = vmul.f32 0.5, %v392_v34  ;;  %v395_v49 = vld [vmem:[%s4634_s3 + $0x780] sm:$0xff] }
 0x120   : > { %v3818_v59 = vpop.eup %3817  ;;  %2920 = vst [vmem:[%s4667_s16 + $0x668] sm:$0xff] %v2408_v50  ;;  %v2410_v60 = vadd.f32 0.5, %v1898_v51  ;;  %v1900_v61 = vmul.f32 0.5, %v3816_v54  ;;  %3843 = vtanh.f32 %v890_v42  ;;  %v905_v53 = vmul.f32 0.5, %v393_v39  ;;  %v396_v54 = vld [vmem:[%s4634_s3 + $0x788] sm:$0xff] }
 0x121   : > { %v3820_v0 = vpop.eup %3819  ;;  %2921 = vst [vmem:[%s4667_s16 + $0x670] sm:$0xff] %v2409_v55  ;;  %v2411_v1 = vadd.f32 0.5, %v1899_v56  ;;  %v1901_v2 = vmul.f32 0.5, %v3818_v59  ;;  %3845 = vtanh.f32 %v891_v47  ;;  %v906_v58 = vmul.f32 0.5, %v394_v44  ;;  %v397_v59 = vld [vmem:[%s4634_s3 + $0x790] sm:$0xff] }
 0x122   : > { %v3822_v5 = vpop.eup %3821  ;;  %2922 = vst [vmem:[%s4667_s16 + $0x678] sm:$0xff] %v2410_v60  ;;  %v2412_v6 = vadd.f32 0.5, %v1900_v61  ;;  %v1902_v7 = vmul.f32 0.5, %v3820_v0  ;;  %3847 = vtanh.f32 %v892_v52  ;;  %v907_v63 = vmul.f32 0.5, %v395_v49  ;;  %v398_v0 = vld [vmem:[%s4634_s3 + $0x798] sm:$0xff] }
 0x123   : > { %v3824_v10 = vpop.eup %3823  ;;  %2923 = vst [vmem:[%s4667_s16 + $0x680] sm:$0xff] %v2411_v1  ;;  %v2413_v11 = vadd.f32 0.5, %v1901_v2  ;;  %v1903_v12 = vmul.f32 0.5, %v3822_v5  ;;  %3849 = vtanh.f32 %v893_v57  ;;  %v908_v4 = vmul.f32 0.5, %v396_v54  ;;  %v399_v5 = vld [vmem:[%s4634_s3 + $0x7a0] sm:$0xff] }
 0x124   : > { %v3826_v15 = vpop.eup %3825  ;;  %2924 = vst [vmem:[%s4667_s16 + $0x688] sm:$0xff] %v2412_v6  ;;  %v2414_v16 = vadd.f32 0.5, %v1902_v7  ;;  %v1904_v17 = vmul.f32 0.5, %v3824_v10  ;;  %3851 = vtanh.f32 %v894_v62  ;;  %v909_v9 = vmul.f32 0.5, %v397_v59  ;;  %v400_v10 = vld [vmem:[%s4634_s3 + $0x7a8] sm:$0xff] }
 0x125   : > { %v3828_v20 = vpop.eup %3827  ;;  %2925 = vst [vmem:[%s4667_s16 + $0x690] sm:$0xff] %v2413_v11  ;;  %v2415_v21 = vadd.f32 0.5, %v1903_v12  ;;  %v1905_v22 = vmul.f32 0.5, %v3826_v15  ;;  %3853 = vtanh.f32 %v895_v3  ;;  %v910_v14 = vmul.f32 0.5, %v398_v0  ;;  %v401_v15 = vld [vmem:[%s4634_s3 + $0x7b0] sm:$0xff] }
 0x126   : > { %v3830_v25 = vpop.eup %3829  ;;  %2926 = vst [vmem:[%s4667_s16 + $0x698] sm:$0xff] %v2414_v16  ;;  %v2416_v26 = vadd.f32 0.5, %v1904_v17  ;;  %v1906_v27 = vmul.f32 0.5, %v3828_v20  ;;  %3855 = vtanh.f32 %v896_v8  ;;  %v911_v19 = vmul.f32 0.5, %v399_v5  ;;  %v402_v20 = vld [vmem:[%s4634_s3 + $0x7b8] sm:$0xff] }
 0x127   : > { %v3832_v30 = vpop.eup %3831  ;;  %2927 = vst [vmem:[%s4667_s16 + $0x6a0] sm:$0xff] %v2415_v21  ;;  %v2417_v31 = vadd.f32 0.5, %v1905_v22  ;;  %v1907_v32 = vmul.f32 0.5, %v3830_v25  ;;  %3857 = vtanh.f32 %v897_v13  ;;  %v912_v24 = vmul.f32 0.5, %v400_v10  ;;  %v403_v25 = vld [vmem:[%s4634_s3 + $0x7c0] sm:$0xff] }
 0x128   : > { %v3834_v35 = vpop.eup %3833  ;;  %2928 = vst [vmem:[%s4667_s16 + $0x6a8] sm:$0xff] %v2416_v26  ;;  %v2418_v36 = vadd.f32 0.5, %v1906_v27  ;;  %v1908_v37 = vmul.f32 0.5, %v3832_v30  ;;  %3859 = vtanh.f32 %v898_v18  ;;  %v913_v29 = vmul.f32 0.5, %v401_v15  ;;  %v404_v30 = vld [vmem:[%s4634_s3 + $0x7c8] sm:$0xff] }
 0x129   : > { %v3836_v40 = vpop.eup %3835  ;;  %2929 = vst [vmem:[%s4667_s16 + $0x6b0] sm:$0xff] %v2417_v31  ;;  %v2419_v41 = vadd.f32 0.5, %v1907_v32  ;;  %v1909_v42 = vmul.f32 0.5, %v3834_v35  ;;  %3861 = vtanh.f32 %v899_v23  ;;  %v914_v34 = vmul.f32 0.5, %v402_v20  ;;  %v405_v35 = vld [vmem:[%s4634_s3 + $0x7d0] sm:$0xff] }
 0x12a   : > { %v3838_v45 = vpop.eup %3837  ;;  %2930 = vst [vmem:[%s4667_s16 + $0x6b8] sm:$0xff] %v2418_v36  ;;  %v2420_v46 = vadd.f32 0.5, %v1908_v37  ;;  %v1910_v47 = vmul.f32 0.5, %v3836_v40  ;;  %3863 = vtanh.f32 %v900_v28  ;;  %v915_v39 = vmul.f32 0.5, %v403_v25  ;;  %v406_v40 = vld [vmem:[%s4634_s3 + $0x7d8] sm:$0xff] }
 0x12b   : > { %v3840_v50 = vpop.eup %3839  ;;  %2931 = vst [vmem:[%s4667_s16 + $0x6c0] sm:$0xff] %v2419_v41  ;;  %v2421_v51 = vadd.f32 0.5, %v1909_v42  ;;  %v1911_v52 = vmul.f32 0.5, %v3838_v45  ;;  %3865 = vtanh.f32 %v901_v33  ;;  %v916_v44 = vmul.f32 0.5, %v404_v30  ;;  %v407_v45 = vld [vmem:[%s4634_s3 + $0x7e0] sm:$0xff] }
 0x12c   : > { %v3842_v55 = vpop.eup %3841  ;;  %2932 = vst [vmem:[%s4667_s16 + $0x6c8] sm:$0xff] %v2420_v46  ;;  %v2422_v56 = vadd.f32 0.5, %v1910_v47  ;;  %v1912_v57 = vmul.f32 0.5, %v3840_v50  ;;  %3867 = vtanh.f32 %v902_v38  ;;  %v917_v49 = vmul.f32 0.5, %v405_v35  ;;  %v408_v50 = vld [vmem:[%s4634_s3 + $0x7e8] sm:$0xff] }
 0x12d   : > { %v3844_v60 = vpop.eup %3843  ;;  %2933 = vst [vmem:[%s4667_s16 + $0x6d0] sm:$0xff] %v2421_v51  ;;  %v2423_v61 = vadd.f32 0.5, %v1911_v52  ;;  %v1913_v62 = vmul.f32 0.5, %v3842_v55  ;;  %3869 = vtanh.f32 %v903_v43  ;;  %v918_v54 = vmul.f32 0.5, %v406_v40  ;;  %v409_v55 = vld [vmem:[%s4634_s3 + $0x7f0] sm:$0xff] }
 0x12e   : > { %v3846_v1 = vpop.eup %3845  ;;  %2934 = vst [vmem:[%s4667_s16 + $0x6d8] sm:$0xff] %v2422_v56  ;;  %v2424_v2 = vadd.f32 0.5, %v1912_v57  ;;  %v1914_v3 = vmul.f32 0.5, %v3844_v60  ;;  %3871 = vtanh.f32 %v904_v48  ;;  %v919_v59 = vmul.f32 0.5, %v407_v45  ;;  %v410_v60 = vld [vmem:[%s4634_s3 + $0x7f8] sm:$0xff] }
 0x12f   : > { %v3848_v6 = vpop.eup %3847  ;;  %2935 = vst [vmem:[%s4667_s16 + $0x6e0] sm:$0xff] %v2423_v61  ;;  %v2425_v7 = vadd.f32 0.5, %v1913_v62  ;;  %v1915_v8 = vmul.f32 0.5, %v3846_v1  ;;  %3873 = vtanh.f32 %v905_v53  ;;  %v920_v0 = vmul.f32 0.5, %v408_v50  ;;  %v411_v1 = vld [vmem:[%s4634_s3 + $0x800] sm:$0xff] }
 0x130   : > { %v3850_v11 = vpop.eup %3849  ;;  %2936 = vst [vmem:[%s4667_s16 + $0x6e8] sm:$0xff] %v2424_v2  ;;  %v2426_v12 = vadd.f32 0.5, %v1914_v3  ;;  %v1916_v13 = vmul.f32 0.5, %v3848_v6  ;;  %3875 = vtanh.f32 %v906_v58  ;;  %v921_v5 = vmul.f32 0.5, %v409_v55  ;;  %v412_v6 = vld [vmem:[%s4634_s3 + $0x808] sm:$0xff] }
 0x131   : > { %v3852_v16 = vpop.eup %3851  ;;  %2937 = vst [vmem:[%s4667_s16 + $0x6f0] sm:$0xff] %v2425_v7  ;;  %v2427_v17 = vadd.f32 0.5, %v1915_v8  ;;  %v1917_v18 = vmul.f32 0.5, %v3850_v11  ;;  %3877 = vtanh.f32 %v907_v63  ;;  %v922_v10 = vmul.f32 0.5, %v410_v60  ;;  %v413_v11 = vld [vmem:[%s4634_s3 + $0x810] sm:$0xff] }
 0x132   : > { %v3854_v21 = vpop.eup %3853  ;;  %2938 = vst [vmem:[%s4667_s16 + $0x6f8] sm:$0xff] %v2426_v12  ;;  %v2428_v22 = vadd.f32 0.5, %v1916_v13  ;;  %v1918_v23 = vmul.f32 0.5, %v3852_v16  ;;  %3879 = vtanh.f32 %v908_v4  ;;  %v923_v15 = vmul.f32 0.5, %v411_v1  ;;  %v414_v16 = vld [vmem:[%s4634_s3 + $0x818] sm:$0xff] }
 0x133   : > { %v3856_v26 = vpop.eup %3855  ;;  %2939 = vst [vmem:[%s4667_s16 + $0x700] sm:$0xff] %v2427_v17  ;;  %v2429_v27 = vadd.f32 0.5, %v1917_v18  ;;  %v1919_v28 = vmul.f32 0.5, %v3854_v21  ;;  %3881 = vtanh.f32 %v909_v9  ;;  %v924_v20 = vmul.f32 0.5, %v412_v6  ;;  %v415_v21 = vld [vmem:[%s4634_s3 + $0x820] sm:$0xff] }
 0x134   : > { %v3858_v31 = vpop.eup %3857  ;;  %2940 = vst [vmem:[%s4667_s16 + $0x708] sm:$0xff] %v2428_v22  ;;  %v2430_v32 = vadd.f32 0.5, %v1918_v23  ;;  %v1920_v33 = vmul.f32 0.5, %v3856_v26  ;;  %3883 = vtanh.f32 %v910_v14  ;;  %v925_v25 = vmul.f32 0.5, %v413_v11  ;;  %v416_v26 = vld [vmem:[%s4634_s3 + $0x828] sm:$0xff] }
 0x135   : > { %v3860_v36 = vpop.eup %3859  ;;  %2941 = vst [vmem:[%s4667_s16 + $0x710] sm:$0xff] %v2429_v27  ;;  %v2431_v37 = vadd.f32 0.5, %v1919_v28  ;;  %v1921_v38 = vmul.f32 0.5, %v3858_v31  ;;  %3885 = vtanh.f32 %v911_v19  ;;  %v926_v30 = vmul.f32 0.5, %v414_v16  ;;  %v417_v31 = vld [vmem:[%s4634_s3 + $0x830] sm:$0xff] }
 0x136   : > { %v3862_v41 = vpop.eup %3861  ;;  %2942 = vst [vmem:[%s4667_s16 + $0x718] sm:$0xff] %v2430_v32  ;;  %v2432_v42 = vadd.f32 0.5, %v1920_v33  ;;  %v1922_v43 = vmul.f32 0.5, %v3860_v36  ;;  %3887 = vtanh.f32 %v912_v24  ;;  %v927_v35 = vmul.f32 0.5, %v415_v21  ;;  %v418_v36 = vld [vmem:[%s4634_s3 + $0x838] sm:$0xff] }
 0x137   : > { %v3864_v46 = vpop.eup %3863  ;;  %2943 = vst [vmem:[%s4667_s16 + $0x720] sm:$0xff] %v2431_v37  ;;  %v2433_v47 = vadd.f32 0.5, %v1921_v38  ;;  %v1923_v48 = vmul.f32 0.5, %v3862_v41  ;;  %3889 = vtanh.f32 %v913_v29  ;;  %v928_v40 = vmul.f32 0.5, %v416_v26  ;;  %v419_v41 = vld [vmem:[%s4634_s3 + $0x840] sm:$0xff] }
 0x138   : > { %v3866_v51 = vpop.eup %3865  ;;  %2944 = vst [vmem:[%s4667_s16 + $0x728] sm:$0xff] %v2432_v42  ;;  %v2434_v52 = vadd.f32 0.5, %v1922_v43  ;;  %v1924_v53 = vmul.f32 0.5, %v3864_v46  ;;  %3891 = vtanh.f32 %v914_v34  ;;  %v929_v45 = vmul.f32 0.5, %v417_v31  ;;  %v420_v46 = vld [vmem:[%s4634_s3 + $0x848] sm:$0xff] }
 0x139   : > { %v3868_v56 = vpop.eup %3867  ;;  %2945 = vst [vmem:[%s4667_s16 + $0x730] sm:$0xff] %v2433_v47  ;;  %v2435_v57 = vadd.f32 0.5, %v1923_v48  ;;  %v1925_v58 = vmul.f32 0.5, %v3866_v51  ;;  %3893 = vtanh.f32 %v915_v39  ;;  %v930_v50 = vmul.f32 0.5, %v418_v36  ;;  %v421_v51 = vld [vmem:[%s4634_s3 + $0x850] sm:$0xff] }
 0x13a   : > { %v3870_v61 = vpop.eup %3869  ;;  %2946 = vst [vmem:[%s4667_s16 + $0x738] sm:$0xff] %v2434_v52  ;;  %v2436_v62 = vadd.f32 0.5, %v1924_v53  ;;  %v1926_v63 = vmul.f32 0.5, %v3868_v56  ;;  %3895 = vtanh.f32 %v916_v44  ;;  %v931_v55 = vmul.f32 0.5, %v419_v41  ;;  %v422_v56 = vld [vmem:[%s4634_s3 + $0x858] sm:$0xff] }
 0x13b   : > { %v3872_v2 = vpop.eup %3871  ;;  %2947 = vst [vmem:[%s4667_s16 + $0x740] sm:$0xff] %v2435_v57  ;;  %v2437_v3 = vadd.f32 0.5, %v1925_v58  ;;  %v1927_v4 = vmul.f32 0.5, %v3870_v61  ;;  %3897 = vtanh.f32 %v917_v49  ;;  %v932_v60 = vmul.f32 0.5, %v420_v46  ;;  %v423_v61 = vld [vmem:[%s4634_s3 + $0x860] sm:$0xff] }
 0x13c   : > { %v3874_v7 = vpop.eup %3873  ;;  %2948 = vst [vmem:[%s4667_s16 + $0x748] sm:$0xff] %v2436_v62  ;;  %v2438_v8 = vadd.f32 0.5, %v1926_v63  ;;  %v1928_v9 = vmul.f32 0.5, %v3872_v2  ;;  %3899 = vtanh.f32 %v918_v54  ;;  %v933_v1 = vmul.f32 0.5, %v421_v51  ;;  %v424_v2 = vld [vmem:[%s4634_s3 + $0x868] sm:$0xff] }
 0x13d   : > { %v3876_v12 = vpop.eup %3875  ;;  %2949 = vst [vmem:[%s4667_s16 + $0x750] sm:$0xff] %v2437_v3  ;;  %v2439_v13 = vadd.f32 0.5, %v1927_v4  ;;  %v1929_v14 = vmul.f32 0.5, %v3874_v7  ;;  %3901 = vtanh.f32 %v919_v59  ;;  %v934_v6 = vmul.f32 0.5, %v422_v56  ;;  %v425_v7 = vld [vmem:[%s4634_s3 + $0x870] sm:$0xff] }
 0x13e   : > { %v3878_v17 = vpop.eup %3877  ;;  %2950 = vst [vmem:[%s4667_s16 + $0x758] sm:$0xff] %v2438_v8  ;;  %v2440_v18 = vadd.f32 0.5, %v1928_v9  ;;  %v1930_v19 = vmul.f32 0.5, %v3876_v12  ;;  %3903 = vtanh.f32 %v920_v0  ;;  %v935_v11 = vmul.f32 0.5, %v423_v61  ;;  %v426_v12 = vld [vmem:[%s4634_s3 + $0x878] sm:$0xff] }
 0x13f   : > { %v3880_v22 = vpop.eup %3879  ;;  %2951 = vst [vmem:[%s4667_s16 + $0x760] sm:$0xff] %v2439_v13  ;;  %v2441_v23 = vadd.f32 0.5, %v1929_v14  ;;  %v1931_v24 = vmul.f32 0.5, %v3878_v17  ;;  %3905 = vtanh.f32 %v921_v5  ;;  %v936_v16 = vmul.f32 0.5, %v424_v2  ;;  %v427_v17 = vld [vmem:[%s4634_s3 + $0x880] sm:$0xff] }
 0x140   : > { %v3882_v27 = vpop.eup %3881  ;;  %2952 = vst [vmem:[%s4667_s16 + $0x768] sm:$0xff] %v2440_v18  ;;  %v2442_v28 = vadd.f32 0.5, %v1930_v19  ;;  %v1932_v29 = vmul.f32 0.5, %v3880_v22  ;;  %3907 = vtanh.f32 %v922_v10  ;;  %v937_v21 = vmul.f32 0.5, %v425_v7  ;;  %v428_v22 = vld [vmem:[%s4634_s3 + $0x888] sm:$0xff] }
 0x141   : > { %v3884_v32 = vpop.eup %3883  ;;  %2953 = vst [vmem:[%s4667_s16 + $0x770] sm:$0xff] %v2441_v23  ;;  %v2443_v33 = vadd.f32 0.5, %v1931_v24  ;;  %v1933_v34 = vmul.f32 0.5, %v3882_v27  ;;  %3909 = vtanh.f32 %v923_v15  ;;  %v938_v26 = vmul.f32 0.5, %v426_v12  ;;  %v429_v27 = vld [vmem:[%s4634_s3 + $0x890] sm:$0xff] }
 0x142   : > { %v3886_v37 = vpop.eup %3885  ;;  %2954 = vst [vmem:[%s4667_s16 + $0x778] sm:$0xff] %v2442_v28  ;;  %v2444_v38 = vadd.f32 0.5, %v1932_v29  ;;  %v1934_v39 = vmul.f32 0.5, %v3884_v32  ;;  %3911 = vtanh.f32 %v924_v20  ;;  %v939_v31 = vmul.f32 0.5, %v427_v17  ;;  %v430_v32 = vld [vmem:[%s4634_s3 + $0x898] sm:$0xff] }
 0x143   : > { %v3888_v42 = vpop.eup %3887  ;;  %2955 = vst [vmem:[%s4667_s16 + $0x780] sm:$0xff] %v2443_v33  ;;  %v2445_v43 = vadd.f32 0.5, %v1933_v34  ;;  %v1935_v44 = vmul.f32 0.5, %v3886_v37  ;;  %3913 = vtanh.f32 %v925_v25  ;;  %v940_v36 = vmul.f32 0.5, %v428_v22  ;;  %v431_v37 = vld [vmem:[%s4634_s3 + $0x8a0] sm:$0xff] }
 0x144   : > { %v3890_v47 = vpop.eup %3889  ;;  %2956 = vst [vmem:[%s4667_s16 + $0x788] sm:$0xff] %v2444_v38  ;;  %v2446_v48 = vadd.f32 0.5, %v1934_v39  ;;  %v1936_v49 = vmul.f32 0.5, %v3888_v42  ;;  %3915 = vtanh.f32 %v926_v30  ;;  %v941_v41 = vmul.f32 0.5, %v429_v27  ;;  %v432_v42 = vld [vmem:[%s4634_s3 + $0x8a8] sm:$0xff] }
 0x145   : > { %v3892_v52 = vpop.eup %3891  ;;  %2957 = vst [vmem:[%s4667_s16 + $0x790] sm:$0xff] %v2445_v43  ;;  %v2447_v53 = vadd.f32 0.5, %v1935_v44  ;;  %v1937_v54 = vmul.f32 0.5, %v3890_v47  ;;  %3917 = vtanh.f32 %v927_v35  ;;  %v942_v46 = vmul.f32 0.5, %v430_v32  ;;  %v433_v47 = vld [vmem:[%s4634_s3 + $0x8b0] sm:$0xff] }
 0x146   : > { %v3894_v57 = vpop.eup %3893  ;;  %2958 = vst [vmem:[%s4667_s16 + $0x798] sm:$0xff] %v2446_v48  ;;  %v2448_v58 = vadd.f32 0.5, %v1936_v49  ;;  %v1938_v59 = vmul.f32 0.5, %v3892_v52  ;;  %3919 = vtanh.f32 %v928_v40  ;;  %v943_v51 = vmul.f32 0.5, %v431_v37  ;;  %v434_v52 = vld [vmem:[%s4634_s3 + $0x8b8] sm:$0xff] }
 0x147   : > { %v3896_v62 = vpop.eup %3895  ;;  %2959 = vst [vmem:[%s4667_s16 + $0x7a0] sm:$0xff] %v2447_v53  ;;  %v2449_v63 = vadd.f32 0.5, %v1937_v54  ;;  %v1939_v0 = vmul.f32 0.5, %v3894_v57  ;;  %3921 = vtanh.f32 %v929_v45  ;;  %v944_v56 = vmul.f32 0.5, %v432_v42  ;;  %v435_v57 = vld [vmem:[%s4634_s3 + $0x8c0] sm:$0xff] }
 0x148   : > { %v3898_v3 = vpop.eup %3897  ;;  %2960 = vst [vmem:[%s4667_s16 + $0x7a8] sm:$0xff] %v2448_v58  ;;  %v2450_v4 = vadd.f32 0.5, %v1938_v59  ;;  %v1940_v5 = vmul.f32 0.5, %v3896_v62  ;;  %3923 = vtanh.f32 %v930_v50  ;;  %v945_v61 = vmul.f32 0.5, %v433_v47  ;;  %v436_v62 = vld [vmem:[%s4634_s3 + $0x8c8] sm:$0xff] }
 0x149   : > { %v3900_v8 = vpop.eup %3899  ;;  %2961 = vst [vmem:[%s4667_s16 + $0x7b0] sm:$0xff] %v2449_v63  ;;  %v2451_v9 = vadd.f32 0.5, %v1939_v0  ;;  %v1941_v10 = vmul.f32 0.5, %v3898_v3  ;;  %3925 = vtanh.f32 %v931_v55  ;;  %v946_v2 = vmul.f32 0.5, %v434_v52  ;;  %v437_v3 = vld [vmem:[%s4634_s3 + $0x8d0] sm:$0xff] }
 0x14a   : > { %v3902_v13 = vpop.eup %3901  ;;  %2962 = vst [vmem:[%s4667_s16 + $0x7b8] sm:$0xff] %v2450_v4  ;;  %v2452_v14 = vadd.f32 0.5, %v1940_v5  ;;  %v1942_v15 = vmul.f32 0.5, %v3900_v8  ;;  %3927 = vtanh.f32 %v932_v60  ;;  %v947_v7 = vmul.f32 0.5, %v435_v57  ;;  %v438_v8 = vld [vmem:[%s4634_s3 + $0x8d8] sm:$0xff] }
 0x14b   : > { %v3904_v18 = vpop.eup %3903  ;;  %2963 = vst [vmem:[%s4667_s16 + $0x7c0] sm:$0xff] %v2451_v9  ;;  %v2453_v19 = vadd.f32 0.5, %v1941_v10  ;;  %v1943_v20 = vmul.f32 0.5, %v3902_v13  ;;  %3929 = vtanh.f32 %v933_v1  ;;  %v948_v12 = vmul.f32 0.5, %v436_v62  ;;  %v439_v13 = vld [vmem:[%s4634_s3 + $0x8e0] sm:$0xff] }
 0x14c   : > { %v3906_v23 = vpop.eup %3905  ;;  %2964 = vst [vmem:[%s4667_s16 + $0x7c8] sm:$0xff] %v2452_v14  ;;  %v2454_v24 = vadd.f32 0.5, %v1942_v15  ;;  %v1944_v25 = vmul.f32 0.5, %v3904_v18  ;;  %3931 = vtanh.f32 %v934_v6  ;;  %v949_v17 = vmul.f32 0.5, %v437_v3  ;;  %v440_v18 = vld [vmem:[%s4634_s3 + $0x8e8] sm:$0xff] }
 0x14d   : > { %v3908_v28 = vpop.eup %3907  ;;  %2965 = vst [vmem:[%s4667_s16 + $0x7d0] sm:$0xff] %v2453_v19  ;;  %v2455_v29 = vadd.f32 0.5, %v1943_v20  ;;  %v1945_v30 = vmul.f32 0.5, %v3906_v23  ;;  %3933 = vtanh.f32 %v935_v11  ;;  %v950_v22 = vmul.f32 0.5, %v438_v8  ;;  %v441_v23 = vld [vmem:[%s4634_s3 + $0x8f0] sm:$0xff] }
 0x14e   : > { %v3910_v33 = vpop.eup %3909  ;;  %2966 = vst [vmem:[%s4667_s16 + $0x7d8] sm:$0xff] %v2454_v24  ;;  %v2456_v34 = vadd.f32 0.5, %v1944_v25  ;;  %v1946_v35 = vmul.f32 0.5, %v3908_v28  ;;  %3935 = vtanh.f32 %v936_v16  ;;  %v951_v27 = vmul.f32 0.5, %v439_v13  ;;  %v442_v28 = vld [vmem:[%s4634_s3 + $0x8f8] sm:$0xff] }
 0x14f   : > { %v3912_v38 = vpop.eup %3911  ;;  %2967 = vst [vmem:[%s4667_s16 + $0x7e0] sm:$0xff] %v2455_v29  ;;  %v2457_v39 = vadd.f32 0.5, %v1945_v30  ;;  %v1947_v40 = vmul.f32 0.5, %v3910_v33  ;;  %3937 = vtanh.f32 %v937_v21  ;;  %v952_v32 = vmul.f32 0.5, %v440_v18  ;;  %v443_v33 = vld [vmem:[%s4634_s3 + $0x900] sm:$0xff] }
 0x150   : > { %v3914_v43 = vpop.eup %3913  ;;  %2968 = vst [vmem:[%s4667_s16 + $0x7e8] sm:$0xff] %v2456_v34  ;;  %v2458_v44 = vadd.f32 0.5, %v1946_v35  ;;  %v1948_v45 = vmul.f32 0.5, %v3912_v38  ;;  %3939 = vtanh.f32 %v938_v26  ;;  %v953_v37 = vmul.f32 0.5, %v441_v23  ;;  %v444_v38 = vld [vmem:[%s4634_s3 + $0x908] sm:$0xff] }
 0x151   : > { %v3916_v48 = vpop.eup %3915  ;;  %2969 = vst [vmem:[%s4667_s16 + $0x7f0] sm:$0xff] %v2457_v39  ;;  %v2459_v49 = vadd.f32 0.5, %v1947_v40  ;;  %v1949_v50 = vmul.f32 0.5, %v3914_v43  ;;  %3941 = vtanh.f32 %v939_v31  ;;  %v954_v42 = vmul.f32 0.5, %v442_v28  ;;  %v445_v43 = vld [vmem:[%s4634_s3 + $0x910] sm:$0xff] }
 0x152   : > { %v3918_v53 = vpop.eup %3917  ;;  %2970 = vst [vmem:[%s4667_s16 + $0x7f8] sm:$0xff] %v2458_v44  ;;  %v2460_v54 = vadd.f32 0.5, %v1948_v45  ;;  %v1950_v55 = vmul.f32 0.5, %v3916_v48  ;;  %3943 = vtanh.f32 %v940_v36  ;;  %v955_v47 = vmul.f32 0.5, %v443_v33  ;;  %v446_v48 = vld [vmem:[%s4634_s3 + $0x918] sm:$0xff] }
 0x153   : > { %v3920_v58 = vpop.eup %3919  ;;  %2971 = vst [vmem:[%s4667_s16 + $0x800] sm:$0xff] %v2459_v49  ;;  %v2461_v59 = vadd.f32 0.5, %v1949_v50  ;;  %v1951_v60 = vmul.f32 0.5, %v3918_v53  ;;  %3945 = vtanh.f32 %v941_v41  ;;  %v956_v52 = vmul.f32 0.5, %v444_v38  ;;  %v447_v53 = vld [vmem:[%s4634_s3 + $0x920] sm:$0xff] }
 0x154   : > { %v3922_v63 = vpop.eup %3921  ;;  %2972 = vst [vmem:[%s4667_s16 + $0x808] sm:$0xff] %v2460_v54  ;;  %v2462_v0 = vadd.f32 0.5, %v1950_v55  ;;  %v1952_v1 = vmul.f32 0.5, %v3920_v58  ;;  %3947 = vtanh.f32 %v942_v46  ;;  %v957_v57 = vmul.f32 0.5, %v445_v43  ;;  %v448_v58 = vld [vmem:[%s4634_s3 + $0x928] sm:$0xff] }
 0x155   : > { %v3924_v4 = vpop.eup %3923  ;;  %2973 = vst [vmem:[%s4667_s16 + $0x810] sm:$0xff] %v2461_v59  ;;  %v2463_v5 = vadd.f32 0.5, %v1951_v60  ;;  %v1953_v6 = vmul.f32 0.5, %v3922_v63  ;;  %3949 = vtanh.f32 %v943_v51  ;;  %v958_v62 = vmul.f32 0.5, %v446_v48  ;;  %v449_v63 = vld [vmem:[%s4634_s3 + $0x930] sm:$0xff] }
 0x156   : > { %v3926_v9 = vpop.eup %3925  ;;  %2974 = vst [vmem:[%s4667_s16 + $0x818] sm:$0xff] %v2462_v0  ;;  %v2464_v10 = vadd.f32 0.5, %v1952_v1  ;;  %v1954_v11 = vmul.f32 0.5, %v3924_v4  ;;  %3951 = vtanh.f32 %v944_v56  ;;  %v959_v3 = vmul.f32 0.5, %v447_v53  ;;  %v450_v4 = vld [vmem:[%s4634_s3 + $0x938] sm:$0xff] }
 0x157   : > { %v3928_v14 = vpop.eup %3927  ;;  %2975 = vst [vmem:[%s4667_s16 + $0x820] sm:$0xff] %v2463_v5  ;;  %v2465_v15 = vadd.f32 0.5, %v1953_v6  ;;  %v1955_v16 = vmul.f32 0.5, %v3926_v9  ;;  %3953 = vtanh.f32 %v945_v61  ;;  %v960_v8 = vmul.f32 0.5, %v448_v58  ;;  %v451_v9 = vld [vmem:[%s4634_s3 + $0x940] sm:$0xff] }
 0x158   : > { %v3930_v19 = vpop.eup %3929  ;;  %2976 = vst [vmem:[%s4667_s16 + $0x828] sm:$0xff] %v2464_v10  ;;  %v2466_v20 = vadd.f32 0.5, %v1954_v11  ;;  %v1956_v21 = vmul.f32 0.5, %v3928_v14  ;;  %3955 = vtanh.f32 %v946_v2  ;;  %v961_v13 = vmul.f32 0.5, %v449_v63  ;;  %v452_v14 = vld [vmem:[%s4634_s3 + $0x948] sm:$0xff] }
 0x159   : > { %v3932_v24 = vpop.eup %3931  ;;  %2977 = vst [vmem:[%s4667_s16 + $0x830] sm:$0xff] %v2465_v15  ;;  %v2467_v25 = vadd.f32 0.5, %v1955_v16  ;;  %v1957_v26 = vmul.f32 0.5, %v3930_v19  ;;  %3957 = vtanh.f32 %v947_v7  ;;  %v962_v18 = vmul.f32 0.5, %v450_v4  ;;  %v453_v19 = vld [vmem:[%s4634_s3 + $0x950] sm:$0xff] }
 0x15a   : > { %v3934_v29 = vpop.eup %3933  ;;  %2978 = vst [vmem:[%s4667_s16 + $0x838] sm:$0xff] %v2466_v20  ;;  %v2468_v30 = vadd.f32 0.5, %v1956_v21  ;;  %v1958_v31 = vmul.f32 0.5, %v3932_v24  ;;  %3959 = vtanh.f32 %v948_v12  ;;  %v963_v23 = vmul.f32 0.5, %v451_v9  ;;  %v454_v24 = vld [vmem:[%s4634_s3 + $0x958] sm:$0xff] }
 0x15b   : > { %v3936_v34 = vpop.eup %3935  ;;  %2979 = vst [vmem:[%s4667_s16 + $0x840] sm:$0xff] %v2467_v25  ;;  %v2469_v35 = vadd.f32 0.5, %v1957_v26  ;;  %v1959_v36 = vmul.f32 0.5, %v3934_v29  ;;  %3961 = vtanh.f32 %v949_v17  ;;  %v964_v28 = vmul.f32 0.5, %v452_v14  ;;  %v455_v29 = vld [vmem:[%s4634_s3 + $0x960] sm:$0xff] }
 0x15c   : > { %v3938_v39 = vpop.eup %3937  ;;  %2980 = vst [vmem:[%s4667_s16 + $0x848] sm:$0xff] %v2468_v30  ;;  %v2470_v40 = vadd.f32 0.5, %v1958_v31  ;;  %v1960_v41 = vmul.f32 0.5, %v3936_v34  ;;  %3963 = vtanh.f32 %v950_v22  ;;  %v965_v33 = vmul.f32 0.5, %v453_v19  ;;  %v456_v34 = vld [vmem:[%s4634_s3 + $0x968] sm:$0xff] }
 0x15d   : > { %v3940_v44 = vpop.eup %3939  ;;  %2981 = vst [vmem:[%s4667_s16 + $0x850] sm:$0xff] %v2469_v35  ;;  %v2471_v45 = vadd.f32 0.5, %v1959_v36  ;;  %v1961_v46 = vmul.f32 0.5, %v3938_v39  ;;  %3965 = vtanh.f32 %v951_v27  ;;  %v966_v38 = vmul.f32 0.5, %v454_v24  ;;  %v457_v39 = vld [vmem:[%s4634_s3 + $0x970] sm:$0xff] }
 0x15e   : > { %v3942_v49 = vpop.eup %3941  ;;  %2982 = vst [vmem:[%s4667_s16 + $0x858] sm:$0xff] %v2470_v40  ;;  %v2472_v50 = vadd.f32 0.5, %v1960_v41  ;;  %v1962_v51 = vmul.f32 0.5, %v3940_v44  ;;  %3967 = vtanh.f32 %v952_v32  ;;  %v967_v43 = vmul.f32 0.5, %v455_v29  ;;  %v458_v44 = vld [vmem:[%s4634_s3 + $0x978] sm:$0xff] }
 0x15f   : > { %v3944_v54 = vpop.eup %3943  ;;  %2983 = vst [vmem:[%s4667_s16 + $0x860] sm:$0xff] %v2471_v45  ;;  %v2473_v55 = vadd.f32 0.5, %v1961_v46  ;;  %v1963_v56 = vmul.f32 0.5, %v3942_v49  ;;  %3969 = vtanh.f32 %v953_v37  ;;  %v968_v48 = vmul.f32 0.5, %v456_v34  ;;  %v459_v49 = vld [vmem:[%s4634_s3 + $0x980] sm:$0xff] }
 0x160   : > { %v3946_v59 = vpop.eup %3945  ;;  %2984 = vst [vmem:[%s4667_s16 + $0x868] sm:$0xff] %v2472_v50  ;;  %v2474_v60 = vadd.f32 0.5, %v1962_v51  ;;  %v1964_v61 = vmul.f32 0.5, %v3944_v54  ;;  %3971 = vtanh.f32 %v954_v42  ;;  %v969_v53 = vmul.f32 0.5, %v457_v39  ;;  %v460_v54 = vld [vmem:[%s4634_s3 + $0x988] sm:$0xff] }
 0x161   : > { %v3948_v0 = vpop.eup %3947  ;;  %2985 = vst [vmem:[%s4667_s16 + $0x870] sm:$0xff] %v2473_v55  ;;  %v2475_v1 = vadd.f32 0.5, %v1963_v56  ;;  %v1965_v2 = vmul.f32 0.5, %v3946_v59  ;;  %3973 = vtanh.f32 %v955_v47  ;;  %v970_v58 = vmul.f32 0.5, %v458_v44  ;;  %v461_v59 = vld [vmem:[%s4634_s3 + $0x990] sm:$0xff] }
 0x162   : > { %v3950_v5 = vpop.eup %3949  ;;  %2986 = vst [vmem:[%s4667_s16 + $0x878] sm:$0xff] %v2474_v60  ;;  %v2476_v6 = vadd.f32 0.5, %v1964_v61  ;;  %v1966_v7 = vmul.f32 0.5, %v3948_v0  ;;  %3975 = vtanh.f32 %v956_v52  ;;  %v971_v63 = vmul.f32 0.5, %v459_v49  ;;  %v462_v0 = vld [vmem:[%s4634_s3 + $0x998] sm:$0xff] }
 0x163   : > { %v3952_v10 = vpop.eup %3951  ;;  %2987 = vst [vmem:[%s4667_s16 + $0x880] sm:$0xff] %v2475_v1  ;;  %v2477_v11 = vadd.f32 0.5, %v1965_v2  ;;  %v1967_v12 = vmul.f32 0.5, %v3950_v5  ;;  %3977 = vtanh.f32 %v957_v57  ;;  %v972_v4 = vmul.f32 0.5, %v460_v54  ;;  %v463_v5 = vld [vmem:[%s4634_s3 + $0x9a0] sm:$0xff] }
 0x164   : > { %v3954_v15 = vpop.eup %3953  ;;  %2988 = vst [vmem:[%s4667_s16 + $0x888] sm:$0xff] %v2476_v6  ;;  %v2478_v16 = vadd.f32 0.5, %v1966_v7  ;;  %v1968_v17 = vmul.f32 0.5, %v3952_v10  ;;  %3979 = vtanh.f32 %v958_v62  ;;  %v973_v9 = vmul.f32 0.5, %v461_v59  ;;  %v464_v10 = vld [vmem:[%s4634_s3 + $0x9a8] sm:$0xff] }
 0x165   : > { %v3956_v20 = vpop.eup %3955  ;;  %2989 = vst [vmem:[%s4667_s16 + $0x890] sm:$0xff] %v2477_v11  ;;  %v2479_v21 = vadd.f32 0.5, %v1967_v12  ;;  %v1969_v22 = vmul.f32 0.5, %v3954_v15  ;;  %3981 = vtanh.f32 %v959_v3  ;;  %v974_v14 = vmul.f32 0.5, %v462_v0  ;;  %v465_v15 = vld [vmem:[%s4634_s3 + $0x9b0] sm:$0xff] }
 0x166   : > { %v3958_v25 = vpop.eup %3957  ;;  %2990 = vst [vmem:[%s4667_s16 + $0x898] sm:$0xff] %v2478_v16  ;;  %v2480_v26 = vadd.f32 0.5, %v1968_v17  ;;  %v1970_v27 = vmul.f32 0.5, %v3956_v20  ;;  %3983 = vtanh.f32 %v960_v8  ;;  %v975_v19 = vmul.f32 0.5, %v463_v5  ;;  %v466_v20 = vld [vmem:[%s4634_s3 + $0x9b8] sm:$0xff] }
 0x167   : > { %v3960_v30 = vpop.eup %3959  ;;  %2991 = vst [vmem:[%s4667_s16 + $0x8a0] sm:$0xff] %v2479_v21  ;;  %v2481_v31 = vadd.f32 0.5, %v1969_v22  ;;  %v1971_v32 = vmul.f32 0.5, %v3958_v25  ;;  %3985 = vtanh.f32 %v961_v13  ;;  %v976_v24 = vmul.f32 0.5, %v464_v10  ;;  %v467_v25 = vld [vmem:[%s4634_s3 + $0x9c0] sm:$0xff] }
 0x168   : > { %v3962_v35 = vpop.eup %3961  ;;  %2992 = vst [vmem:[%s4667_s16 + $0x8a8] sm:$0xff] %v2480_v26  ;;  %v2482_v36 = vadd.f32 0.5, %v1970_v27  ;;  %v1972_v37 = vmul.f32 0.5, %v3960_v30  ;;  %3987 = vtanh.f32 %v962_v18  ;;  %v977_v29 = vmul.f32 0.5, %v465_v15  ;;  %v468_v30 = vld [vmem:[%s4634_s3 + $0x9c8] sm:$0xff] }
 0x169   : > { %v3964_v40 = vpop.eup %3963  ;;  %2993 = vst [vmem:[%s4667_s16 + $0x8b0] sm:$0xff] %v2481_v31  ;;  %v2483_v41 = vadd.f32 0.5, %v1971_v32  ;;  %v1973_v42 = vmul.f32 0.5, %v3962_v35  ;;  %3989 = vtanh.f32 %v963_v23  ;;  %v978_v34 = vmul.f32 0.5, %v466_v20  ;;  %v469_v35 = vld [vmem:[%s4634_s3 + $0x9d0] sm:$0xff] }
 0x16a   : > { %v3966_v45 = vpop.eup %3965  ;;  %2994 = vst [vmem:[%s4667_s16 + $0x8b8] sm:$0xff] %v2482_v36  ;;  %v2484_v46 = vadd.f32 0.5, %v1972_v37  ;;  %v1974_v47 = vmul.f32 0.5, %v3964_v40  ;;  %3991 = vtanh.f32 %v964_v28  ;;  %v979_v39 = vmul.f32 0.5, %v467_v25  ;;  %v470_v40 = vld [vmem:[%s4634_s3 + $0x9d8] sm:$0xff] }
 0x16b   : > { %v3968_v50 = vpop.eup %3967  ;;  %2995 = vst [vmem:[%s4667_s16 + $0x8c0] sm:$0xff] %v2483_v41  ;;  %v2485_v51 = vadd.f32 0.5, %v1973_v42  ;;  %v1975_v52 = vmul.f32 0.5, %v3966_v45  ;;  %3993 = vtanh.f32 %v965_v33  ;;  %v980_v44 = vmul.f32 0.5, %v468_v30  ;;  %v471_v45 = vld [vmem:[%s4634_s3 + $0x9e0] sm:$0xff] }
 0x16c   : > { %v3970_v55 = vpop.eup %3969  ;;  %2996 = vst [vmem:[%s4667_s16 + $0x8c8] sm:$0xff] %v2484_v46  ;;  %v2486_v56 = vadd.f32 0.5, %v1974_v47  ;;  %v1976_v57 = vmul.f32 0.5, %v3968_v50  ;;  %3995 = vtanh.f32 %v966_v38  ;;  %v981_v49 = vmul.f32 0.5, %v469_v35  ;;  %v472_v50 = vld [vmem:[%s4634_s3 + $0x9e8] sm:$0xff] }
 0x16d   : > { %v3972_v60 = vpop.eup %3971  ;;  %2997 = vst [vmem:[%s4667_s16 + $0x8d0] sm:$0xff] %v2485_v51  ;;  %v2487_v61 = vadd.f32 0.5, %v1975_v52  ;;  %v1977_v62 = vmul.f32 0.5, %v3970_v55  ;;  %3997 = vtanh.f32 %v967_v43  ;;  %v982_v54 = vmul.f32 0.5, %v470_v40  ;;  %v473_v55 = vld [vmem:[%s4634_s3 + $0x9f0] sm:$0xff] }
 0x16e   : > { %v3974_v1 = vpop.eup %3973  ;;  %2998 = vst [vmem:[%s4667_s16 + $0x8d8] sm:$0xff] %v2486_v56  ;;  %v2488_v2 = vadd.f32 0.5, %v1976_v57  ;;  %v1978_v3 = vmul.f32 0.5, %v3972_v60  ;;  %3999 = vtanh.f32 %v968_v48  ;;  %v983_v59 = vmul.f32 0.5, %v471_v45  ;;  %v474_v60 = vld [vmem:[%s4634_s3 + $0x9f8] sm:$0xff] }
 0x16f   : > { %v3976_v6 = vpop.eup %3975  ;;  %2999 = vst [vmem:[%s4667_s16 + $0x8e0] sm:$0xff] %v2487_v61  ;;  %v2489_v7 = vadd.f32 0.5, %v1977_v62  ;;  %v1979_v8 = vmul.f32 0.5, %v3974_v1  ;;  %4001 = vtanh.f32 %v969_v53  ;;  %v984_v0 = vmul.f32 0.5, %v472_v50  ;;  %v475_v1 = vld [vmem:[%s4634_s3 + $0xa00] sm:$0xff] }
 0x170   : > { %v3978_v11 = vpop.eup %3977  ;;  %3000 = vst [vmem:[%s4667_s16 + $0x8e8] sm:$0xff] %v2488_v2  ;;  %v2490_v12 = vadd.f32 0.5, %v1978_v3  ;;  %v1980_v13 = vmul.f32 0.5, %v3976_v6  ;;  %4003 = vtanh.f32 %v970_v58  ;;  %v985_v5 = vmul.f32 0.5, %v473_v55  ;;  %v476_v6 = vld [vmem:[%s4634_s3 + $0xa08] sm:$0xff] }
 0x171   : > { %v3980_v16 = vpop.eup %3979  ;;  %3001 = vst [vmem:[%s4667_s16 + $0x8f0] sm:$0xff] %v2489_v7  ;;  %v2491_v17 = vadd.f32 0.5, %v1979_v8  ;;  %v1981_v18 = vmul.f32 0.5, %v3978_v11  ;;  %4005 = vtanh.f32 %v971_v63  ;;  %v986_v10 = vmul.f32 0.5, %v474_v60  ;;  %v477_v11 = vld [vmem:[%s4634_s3 + $0xa10] sm:$0xff] }
 0x172   : > { %v3982_v21 = vpop.eup %3981  ;;  %3002 = vst [vmem:[%s4667_s16 + $0x8f8] sm:$0xff] %v2490_v12  ;;  %v2492_v22 = vadd.f32 0.5, %v1980_v13  ;;  %v1982_v23 = vmul.f32 0.5, %v3980_v16  ;;  %4007 = vtanh.f32 %v972_v4  ;;  %v987_v15 = vmul.f32 0.5, %v475_v1  ;;  %v478_v16 = vld [vmem:[%s4634_s3 + $0xa18] sm:$0xff] }
 0x173   : > { %v3984_v26 = vpop.eup %3983  ;;  %3003 = vst [vmem:[%s4667_s16 + $0x900] sm:$0xff] %v2491_v17  ;;  %v2493_v27 = vadd.f32 0.5, %v1981_v18  ;;  %v1983_v28 = vmul.f32 0.5, %v3982_v21  ;;  %4009 = vtanh.f32 %v973_v9  ;;  %v988_v20 = vmul.f32 0.5, %v476_v6  ;;  %v479_v21 = vld [vmem:[%s4634_s3 + $0xa20] sm:$0xff] }
 0x174   : > { %v3986_v31 = vpop.eup %3985  ;;  %3004 = vst [vmem:[%s4667_s16 + $0x908] sm:$0xff] %v2492_v22  ;;  %v2494_v32 = vadd.f32 0.5, %v1982_v23  ;;  %v1984_v33 = vmul.f32 0.5, %v3984_v26  ;;  %4011 = vtanh.f32 %v974_v14  ;;  %v989_v25 = vmul.f32 0.5, %v477_v11  ;;  %v480_v26 = vld [vmem:[%s4634_s3 + $0xa28] sm:$0xff] }
 0x175   : > { %v3988_v36 = vpop.eup %3987  ;;  %3005 = vst [vmem:[%s4667_s16 + $0x910] sm:$0xff] %v2493_v27  ;;  %v2495_v37 = vadd.f32 0.5, %v1983_v28  ;;  %v1985_v38 = vmul.f32 0.5, %v3986_v31  ;;  %4013 = vtanh.f32 %v975_v19  ;;  %v990_v30 = vmul.f32 0.5, %v478_v16  ;;  %v481_v31 = vld [vmem:[%s4634_s3 + $0xa30] sm:$0xff] }
 0x176   : > { %v3990_v41 = vpop.eup %3989  ;;  %3006 = vst [vmem:[%s4667_s16 + $0x918] sm:$0xff] %v2494_v32  ;;  %v2496_v42 = vadd.f32 0.5, %v1984_v33  ;;  %v1986_v43 = vmul.f32 0.5, %v3988_v36  ;;  %4015 = vtanh.f32 %v976_v24  ;;  %v991_v35 = vmul.f32 0.5, %v479_v21  ;;  %v482_v36 = vld [vmem:[%s4634_s3 + $0xa38] sm:$0xff] }
 0x177   : > { %v3992_v46 = vpop.eup %3991  ;;  %3007 = vst [vmem:[%s4667_s16 + $0x920] sm:$0xff] %v2495_v37  ;;  %v2497_v47 = vadd.f32 0.5, %v1985_v38  ;;  %v1987_v48 = vmul.f32 0.5, %v3990_v41  ;;  %4017 = vtanh.f32 %v977_v29  ;;  %v992_v40 = vmul.f32 0.5, %v480_v26  ;;  %v483_v41 = vld [vmem:[%s4634_s3 + $0xa40] sm:$0xff] }
 0x178   : > { %v3994_v51 = vpop.eup %3993  ;;  %3008 = vst [vmem:[%s4667_s16 + $0x928] sm:$0xff] %v2496_v42  ;;  %v2498_v52 = vadd.f32 0.5, %v1986_v43  ;;  %v1988_v53 = vmul.f32 0.5, %v3992_v46  ;;  %4019 = vtanh.f32 %v978_v34  ;;  %v993_v45 = vmul.f32 0.5, %v481_v31  ;;  %v484_v46 = vld [vmem:[%s4634_s3 + $0xa48] sm:$0xff] }
 0x179   : > { %v3996_v56 = vpop.eup %3995  ;;  %3009 = vst [vmem:[%s4667_s16 + $0x930] sm:$0xff] %v2497_v47  ;;  %v2499_v57 = vadd.f32 0.5, %v1987_v48  ;;  %v1989_v58 = vmul.f32 0.5, %v3994_v51  ;;  %4021 = vtanh.f32 %v979_v39  ;;  %v994_v50 = vmul.f32 0.5, %v482_v36  ;;  %v485_v51 = vld [vmem:[%s4634_s3 + $0xa50] sm:$0xff] }
 0x17a   : > { %v3998_v61 = vpop.eup %3997  ;;  %3010 = vst [vmem:[%s4667_s16 + $0x938] sm:$0xff] %v2498_v52  ;;  %v2500_v62 = vadd.f32 0.5, %v1988_v53  ;;  %v1990_v63 = vmul.f32 0.5, %v3996_v56  ;;  %4023 = vtanh.f32 %v980_v44  ;;  %v995_v55 = vmul.f32 0.5, %v483_v41  ;;  %v486_v56 = vld [vmem:[%s4634_s3 + $0xa58] sm:$0xff] }
 0x17b   : > { %v4000_v2 = vpop.eup %3999  ;;  %3011 = vst [vmem:[%s4667_s16 + $0x940] sm:$0xff] %v2499_v57  ;;  %v2501_v3 = vadd.f32 0.5, %v1989_v58  ;;  %v1991_v4 = vmul.f32 0.5, %v3998_v61  ;;  %4025 = vtanh.f32 %v981_v49  ;;  %v996_v60 = vmul.f32 0.5, %v484_v46  ;;  %v487_v61 = vld [vmem:[%s4634_s3 + $0xa60] sm:$0xff] }
 0x17c   : > { %v4002_v7 = vpop.eup %4001  ;;  %3012 = vst [vmem:[%s4667_s16 + $0x948] sm:$0xff] %v2500_v62  ;;  %v2502_v8 = vadd.f32 0.5, %v1990_v63  ;;  %v1992_v9 = vmul.f32 0.5, %v4000_v2  ;;  %4027 = vtanh.f32 %v982_v54  ;;  %v997_v1 = vmul.f32 0.5, %v485_v51  ;;  %v488_v2 = vld [vmem:[%s4634_s3 + $0xa68] sm:$0xff] }
 0x17d   : > { %v4004_v12 = vpop.eup %4003  ;;  %3013 = vst [vmem:[%s4667_s16 + $0x950] sm:$0xff] %v2501_v3  ;;  %v2503_v13 = vadd.f32 0.5, %v1991_v4  ;;  %v1993_v14 = vmul.f32 0.5, %v4002_v7  ;;  %4029 = vtanh.f32 %v983_v59  ;;  %v998_v6 = vmul.f32 0.5, %v486_v56  ;;  %v489_v7 = vld [vmem:[%s4634_s3 + $0xa70] sm:$0xff] }
 0x17e   : > { %v4006_v17 = vpop.eup %4005  ;;  %3014 = vst [vmem:[%s4667_s16 + $0x958] sm:$0xff] %v2502_v8  ;;  %v2504_v18 = vadd.f32 0.5, %v1992_v9  ;;  %v1994_v19 = vmul.f32 0.5, %v4004_v12  ;;  %4031 = vtanh.f32 %v984_v0  ;;  %v999_v11 = vmul.f32 0.5, %v487_v61  ;;  %v490_v12 = vld [vmem:[%s4634_s3 + $0xa78] sm:$0xff] }
 0x17f   : > { %v4008_v22 = vpop.eup %4007  ;;  %3015 = vst [vmem:[%s4667_s16 + $0x960] sm:$0xff] %v2503_v13  ;;  %v2505_v23 = vadd.f32 0.5, %v1993_v14  ;;  %v1995_v24 = vmul.f32 0.5, %v4006_v17  ;;  %4033 = vtanh.f32 %v985_v5  ;;  %v1000_v16 = vmul.f32 0.5, %v488_v2  ;;  %v491_v17 = vld [vmem:[%s4634_s3 + $0xa80] sm:$0xff] }
 0x180   : > { %v4010_v27 = vpop.eup %4009  ;;  %3016 = vst [vmem:[%s4667_s16 + $0x968] sm:$0xff] %v2504_v18  ;;  %v2506_v28 = vadd.f32 0.5, %v1994_v19  ;;  %v1996_v29 = vmul.f32 0.5, %v4008_v22  ;;  %4035 = vtanh.f32 %v986_v10  ;;  %v1001_v21 = vmul.f32 0.5, %v489_v7  ;;  %v492_v22 = vld [vmem:[%s4634_s3 + $0xa88] sm:$0xff] }
 0x181   : > { %v4012_v32 = vpop.eup %4011  ;;  %3017 = vst [vmem:[%s4667_s16 + $0x970] sm:$0xff] %v2505_v23  ;;  %v2507_v33 = vadd.f32 0.5, %v1995_v24  ;;  %v1997_v34 = vmul.f32 0.5, %v4010_v27  ;;  %4037 = vtanh.f32 %v987_v15  ;;  %v1002_v26 = vmul.f32 0.5, %v490_v12  ;;  %v493_v27 = vld [vmem:[%s4634_s3 + $0xa90] sm:$0xff] }
 0x182   : > { %v4014_v37 = vpop.eup %4013  ;;  %3018 = vst [vmem:[%s4667_s16 + $0x978] sm:$0xff] %v2506_v28  ;;  %v2508_v38 = vadd.f32 0.5, %v1996_v29  ;;  %v1998_v39 = vmul.f32 0.5, %v4012_v32  ;;  %4039 = vtanh.f32 %v988_v20  ;;  %v1003_v31 = vmul.f32 0.5, %v491_v17  ;;  %v494_v32 = vld [vmem:[%s4634_s3 + $0xa98] sm:$0xff] }
 0x183   : > { %v4016_v42 = vpop.eup %4015  ;;  %3019 = vst [vmem:[%s4667_s16 + $0x980] sm:$0xff] %v2507_v33  ;;  %v2509_v43 = vadd.f32 0.5, %v1997_v34  ;;  %v1999_v44 = vmul.f32 0.5, %v4014_v37  ;;  %4041 = vtanh.f32 %v989_v25  ;;  %v1004_v36 = vmul.f32 0.5, %v492_v22  ;;  %v495_v37 = vld [vmem:[%s4634_s3 + $0xaa0] sm:$0xff] }
 0x184   : > { %v4018_v47 = vpop.eup %4017  ;;  %3020 = vst [vmem:[%s4667_s16 + $0x988] sm:$0xff] %v2508_v38  ;;  %v2510_v48 = vadd.f32 0.5, %v1998_v39  ;;  %v2000_v49 = vmul.f32 0.5, %v4016_v42  ;;  %4043 = vtanh.f32 %v990_v30  ;;  %v1005_v41 = vmul.f32 0.5, %v493_v27  ;;  %v496_v42 = vld [vmem:[%s4634_s3 + $0xaa8] sm:$0xff] }
 0x185   : > { %v4020_v52 = vpop.eup %4019  ;;  %3021 = vst [vmem:[%s4667_s16 + $0x990] sm:$0xff] %v2509_v43  ;;  %v2511_v53 = vadd.f32 0.5, %v1999_v44  ;;  %v2001_v54 = vmul.f32 0.5, %v4018_v47  ;;  %4045 = vtanh.f32 %v991_v35  ;;  %v1006_v46 = vmul.f32 0.5, %v494_v32  ;;  %v497_v47 = vld [vmem:[%s4634_s3 + $0xab0] sm:$0xff] }
 0x186   : > { %v4022_v57 = vpop.eup %4021  ;;  %3022 = vst [vmem:[%s4667_s16 + $0x998] sm:$0xff] %v2510_v48  ;;  %v2512_v58 = vadd.f32 0.5, %v2000_v49  ;;  %v2002_v59 = vmul.f32 0.5, %v4020_v52  ;;  %4047 = vtanh.f32 %v992_v40  ;;  %v1007_v51 = vmul.f32 0.5, %v495_v37  ;;  %v498_v52 = vld [vmem:[%s4634_s3 + $0xab8] sm:$0xff] }
 0x187   : > { %v4024_v62 = vpop.eup %4023  ;;  %3023 = vst [vmem:[%s4667_s16 + $0x9a0] sm:$0xff] %v2511_v53  ;;  %v2513_v63 = vadd.f32 0.5, %v2001_v54  ;;  %v2003_v0 = vmul.f32 0.5, %v4022_v57  ;;  %4049 = vtanh.f32 %v993_v45  ;;  %v1008_v56 = vmul.f32 0.5, %v496_v42  ;;  %v499_v57 = vld [vmem:[%s4634_s3 + $0xac0] sm:$0xff] }
 0x188   : > { %v4026_v3 = vpop.eup %4025  ;;  %3024 = vst [vmem:[%s4667_s16 + $0x9a8] sm:$0xff] %v2512_v58  ;;  %v2514_v4 = vadd.f32 0.5, %v2002_v59  ;;  %v2004_v5 = vmul.f32 0.5, %v4024_v62  ;;  %4051 = vtanh.f32 %v994_v50  ;;  %v1009_v61 = vmul.f32 0.5, %v497_v47  ;;  %v500_v62 = vld [vmem:[%s4634_s3 + $0xac8] sm:$0xff] }
 0x189   : > { %v4028_v8 = vpop.eup %4027  ;;  %3025 = vst [vmem:[%s4667_s16 + $0x9b0] sm:$0xff] %v2513_v63  ;;  %v2515_v9 = vadd.f32 0.5, %v2003_v0  ;;  %v2005_v10 = vmul.f32 0.5, %v4026_v3  ;;  %4053 = vtanh.f32 %v995_v55  ;;  %v1010_v2 = vmul.f32 0.5, %v498_v52  ;;  %v501_v3 = vld [vmem:[%s4634_s3 + $0xad0] sm:$0xff] }
 0x18a   : > { %v4030_v13 = vpop.eup %4029  ;;  %3026 = vst [vmem:[%s4667_s16 + $0x9b8] sm:$0xff] %v2514_v4  ;;  %v2516_v14 = vadd.f32 0.5, %v2004_v5  ;;  %v2006_v15 = vmul.f32 0.5, %v4028_v8  ;;  %4055 = vtanh.f32 %v996_v60  ;;  %v1011_v7 = vmul.f32 0.5, %v499_v57  ;;  %v502_v8 = vld [vmem:[%s4634_s3 + $0xad8] sm:$0xff] }
 0x18b   : > { %v4032_v18 = vpop.eup %4031  ;;  %3027 = vst [vmem:[%s4667_s16 + $0x9c0] sm:$0xff] %v2515_v9  ;;  %v2517_v19 = vadd.f32 0.5, %v2005_v10  ;;  %v2007_v20 = vmul.f32 0.5, %v4030_v13  ;;  %4057 = vtanh.f32 %v997_v1  ;;  %v1012_v12 = vmul.f32 0.5, %v500_v62  ;;  %v503_v13 = vld [vmem:[%s4634_s3 + $0xae0] sm:$0xff] }
 0x18c   : > { %v4034_v23 = vpop.eup %4033  ;;  %3028 = vst [vmem:[%s4667_s16 + $0x9c8] sm:$0xff] %v2516_v14  ;;  %v2518_v24 = vadd.f32 0.5, %v2006_v15  ;;  %v2008_v25 = vmul.f32 0.5, %v4032_v18  ;;  %4059 = vtanh.f32 %v998_v6  ;;  %v1013_v17 = vmul.f32 0.5, %v501_v3  ;;  %v504_v18 = vld [vmem:[%s4634_s3 + $0xae8] sm:$0xff] }
 0x18d   : > { %v4036_v28 = vpop.eup %4035  ;;  %3029 = vst [vmem:[%s4667_s16 + $0x9d0] sm:$0xff] %v2517_v19  ;;  %v2519_v29 = vadd.f32 0.5, %v2007_v20  ;;  %v2009_v30 = vmul.f32 0.5, %v4034_v23  ;;  %4061 = vtanh.f32 %v999_v11  ;;  %v1014_v22 = vmul.f32 0.5, %v502_v8  ;;  %v505_v23 = vld [vmem:[%s4634_s3 + $0xaf0] sm:$0xff] }
 0x18e   : > { %v4038_v33 = vpop.eup %4037  ;;  %3030 = vst [vmem:[%s4667_s16 + $0x9d8] sm:$0xff] %v2518_v24  ;;  %v2520_v34 = vadd.f32 0.5, %v2008_v25  ;;  %v2010_v35 = vmul.f32 0.5, %v4036_v28  ;;  %4063 = vtanh.f32 %v1000_v16  ;;  %v1015_v27 = vmul.f32 0.5, %v503_v13  ;;  %v506_v28 = vld [vmem:[%s4634_s3 + $0xaf8] sm:$0xff] }
 0x18f   : > { %v4040_v38 = vpop.eup %4039  ;;  %3031 = vst [vmem:[%s4667_s16 + $0x9e0] sm:$0xff] %v2519_v29  ;;  %v2521_v39 = vadd.f32 0.5, %v2009_v30  ;;  %v2011_v40 = vmul.f32 0.5, %v4038_v33  ;;  %4065 = vtanh.f32 %v1001_v21  ;;  %v1016_v32 = vmul.f32 0.5, %v504_v18  ;;  %v507_v33 = vld [vmem:[%s4634_s3 + $0xb00] sm:$0xff] }
 0x190   : > { %v4042_v43 = vpop.eup %4041  ;;  %3032 = vst [vmem:[%s4667_s16 + $0x9e8] sm:$0xff] %v2520_v34  ;;  %v2522_v44 = vadd.f32 0.5, %v2010_v35  ;;  %v2012_v45 = vmul.f32 0.5, %v4040_v38  ;;  %4067 = vtanh.f32 %v1002_v26  ;;  %v1017_v37 = vmul.f32 0.5, %v505_v23  ;;  %v508_v38 = vld [vmem:[%s4634_s3 + $0xb08] sm:$0xff] }
 0x191   : > { %v4044_v48 = vpop.eup %4043  ;;  %3033 = vst [vmem:[%s4667_s16 + $0x9f0] sm:$0xff] %v2521_v39  ;;  %v2523_v49 = vadd.f32 0.5, %v2011_v40  ;;  %v2013_v50 = vmul.f32 0.5, %v4042_v43  ;;  %4069 = vtanh.f32 %v1003_v31  ;;  %v1018_v42 = vmul.f32 0.5, %v506_v28  ;;  %v509_v43 = vld [vmem:[%s4634_s3 + $0xb10] sm:$0xff] }
 0x192   : > { %v4046_v53 = vpop.eup %4045  ;;  %3034 = vst [vmem:[%s4667_s16 + $0x9f8] sm:$0xff] %v2522_v44  ;;  %v2524_v54 = vadd.f32 0.5, %v2012_v45  ;;  %v2014_v55 = vmul.f32 0.5, %v4044_v48  ;;  %4071 = vtanh.f32 %v1004_v36  ;;  %v1019_v47 = vmul.f32 0.5, %v507_v33  ;;  %v510_v48 = vld [vmem:[%s4634_s3 + $0xb18] sm:$0xff] }
 0x193   : > { %v4048_v58 = vpop.eup %4047  ;;  %3035 = vst [vmem:[%s4667_s16 + $0xa00] sm:$0xff] %v2523_v49  ;;  %v2525_v59 = vadd.f32 0.5, %v2013_v50  ;;  %v2015_v60 = vmul.f32 0.5, %v4046_v53  ;;  %4073 = vtanh.f32 %v1005_v41  ;;  %v1020_v52 = vmul.f32 0.5, %v508_v38  ;;  %v511_v53 = vld [vmem:[%s4634_s3 + $0xb20] sm:$0xff] }
 0x194   : > { %v4050_v63 = vpop.eup %4049  ;;  %3036 = vst [vmem:[%s4667_s16 + $0xa08] sm:$0xff] %v2524_v54  ;;  %v2526_v0 = vadd.f32 0.5, %v2014_v55  ;;  %v2016_v1 = vmul.f32 0.5, %v4048_v58  ;;  %4075 = vtanh.f32 %v1006_v46  ;;  %v1021_v57 = vmul.f32 0.5, %v509_v43  ;;  %v512_v58 = vld [vmem:[%s4634_s3 + $0xb28] sm:$0xff] }
 0x195   : > { %v4052_v4 = vpop.eup %4051  ;;  %3037 = vst [vmem:[%s4667_s16 + $0xa10] sm:$0xff] %v2525_v59  ;;  %v2527_v5 = vadd.f32 0.5, %v2015_v60  ;;  %v2017_v6 = vmul.f32 0.5, %v4050_v63  ;;  %4077 = vtanh.f32 %v1007_v51  ;;  %v1022_v62 = vmul.f32 0.5, %v510_v48  ;;  %v513_v63 = vld [vmem:[%s4634_s3 + $0xb30] sm:$0xff] }
 0x196   : > { %v4054_v9 = vpop.eup %4053  ;;  %3038 = vst [vmem:[%s4667_s16 + $0xa18] sm:$0xff] %v2526_v0  ;;  %v2528_v10 = vadd.f32 0.5, %v2016_v1  ;;  %v2018_v11 = vmul.f32 0.5, %v4052_v4  ;;  %4079 = vtanh.f32 %v1008_v56  ;;  %v1023_v3 = vmul.f32 0.5, %v511_v53  ;;  %v514_v4 = vld [vmem:[%s4634_s3 + $0xb38] sm:$0xff] }
 0x197   : > { %v4056_v14 = vpop.eup %4055  ;;  %3039 = vst [vmem:[%s4667_s16 + $0xa20] sm:$0xff] %v2527_v5  ;;  %v2529_v15 = vadd.f32 0.5, %v2017_v6  ;;  %v2019_v16 = vmul.f32 0.5, %v4054_v9  ;;  %4081 = vtanh.f32 %v1009_v61  ;;  %v1024_v8 = vmul.f32 0.5, %v512_v58  ;;  %v515_v9 = vld [vmem:[%s4634_s3 + $0xb40] sm:$0xff] }
 0x198   : > { %v4058_v19 = vpop.eup %4057  ;;  %3040 = vst [vmem:[%s4667_s16 + $0xa28] sm:$0xff] %v2528_v10  ;;  %v2530_v20 = vadd.f32 0.5, %v2018_v11  ;;  %v2020_v21 = vmul.f32 0.5, %v4056_v14  ;;  %4083 = vtanh.f32 %v1010_v2  ;;  %v1025_v13 = vmul.f32 0.5, %v513_v63  ;;  %v516_v14 = vld [vmem:[%s4634_s3 + $0xb48] sm:$0xff] }
 0x199   : > { %v4060_v24 = vpop.eup %4059  ;;  %3041 = vst [vmem:[%s4667_s16 + $0xa30] sm:$0xff] %v2529_v15  ;;  %v2531_v25 = vadd.f32 0.5, %v2019_v16  ;;  %v2021_v26 = vmul.f32 0.5, %v4058_v19  ;;  %4085 = vtanh.f32 %v1011_v7  ;;  %v1026_v18 = vmul.f32 0.5, %v514_v4  ;;  %v517_v19 = vld [vmem:[%s4634_s3 + $0xb50] sm:$0xff] }
 0x19a   : > { %v4062_v29 = vpop.eup %4061  ;;  %3042 = vst [vmem:[%s4667_s16 + $0xa38] sm:$0xff] %v2530_v20  ;;  %v2532_v30 = vadd.f32 0.5, %v2020_v21  ;;  %v2022_v31 = vmul.f32 0.5, %v4060_v24  ;;  %4087 = vtanh.f32 %v1012_v12  ;;  %v1027_v23 = vmul.f32 0.5, %v515_v9  ;;  %v518_v24 = vld [vmem:[%s4634_s3 + $0xb58] sm:$0xff] }
 0x19b   : > { %v4064_v34 = vpop.eup %4063  ;;  %3043 = vst [vmem:[%s4667_s16 + $0xa40] sm:$0xff] %v2531_v25  ;;  %v2533_v35 = vadd.f32 0.5, %v2021_v26  ;;  %v2023_v36 = vmul.f32 0.5, %v4062_v29  ;;  %4089 = vtanh.f32 %v1013_v17  ;;  %v1028_v28 = vmul.f32 0.5, %v516_v14  ;;  %v519_v29 = vld [vmem:[%s4634_s3 + $0xb60] sm:$0xff] }
 0x19c   : > { %v4066_v39 = vpop.eup %4065  ;;  %3044 = vst [vmem:[%s4667_s16 + $0xa48] sm:$0xff] %v2532_v30  ;;  %v2534_v40 = vadd.f32 0.5, %v2022_v31  ;;  %v2024_v41 = vmul.f32 0.5, %v4064_v34  ;;  %4091 = vtanh.f32 %v1014_v22  ;;  %v1029_v33 = vmul.f32 0.5, %v517_v19  ;;  %v520_v34 = vld [vmem:[%s4634_s3 + $0xb68] sm:$0xff] }
 0x19d   : > { %v4068_v44 = vpop.eup %4067  ;;  %3045 = vst [vmem:[%s4667_s16 + $0xa50] sm:$0xff] %v2533_v35  ;;  %v2535_v45 = vadd.f32 0.5, %v2023_v36  ;;  %v2025_v46 = vmul.f32 0.5, %v4066_v39  ;;  %4093 = vtanh.f32 %v1015_v27  ;;  %v1030_v38 = vmul.f32 0.5, %v518_v24  ;;  %v521_v39 = vld [vmem:[%s4634_s3 + $0xb70] sm:$0xff] }
 0x19e   : > { %v4070_v49 = vpop.eup %4069  ;;  %3046 = vst [vmem:[%s4667_s16 + $0xa58] sm:$0xff] %v2534_v40  ;;  %v2536_v50 = vadd.f32 0.5, %v2024_v41  ;;  %v2026_v51 = vmul.f32 0.5, %v4068_v44  ;;  %4095 = vtanh.f32 %v1016_v32  ;;  %v1031_v43 = vmul.f32 0.5, %v519_v29  ;;  %v522_v44 = vld [vmem:[%s4634_s3 + $0xb78] sm:$0xff] }
 0x19f   : > { %v4072_v54 = vpop.eup %4071  ;;  %3047 = vst [vmem:[%s4667_s16 + $0xa60] sm:$0xff] %v2535_v45  ;;  %v2537_v55 = vadd.f32 0.5, %v2025_v46  ;;  %v2027_v56 = vmul.f32 0.5, %v4070_v49  ;;  %4097 = vtanh.f32 %v1017_v37  ;;  %v1032_v48 = vmul.f32 0.5, %v520_v34  ;;  %v523_v49 = vld [vmem:[%s4634_s3 + $0xb80] sm:$0xff] }
 0x1a0   : > { %v4074_v59 = vpop.eup %4073  ;;  %3048 = vst [vmem:[%s4667_s16 + $0xa68] sm:$0xff] %v2536_v50  ;;  %v2538_v60 = vadd.f32 0.5, %v2026_v51  ;;  %v2028_v61 = vmul.f32 0.5, %v4072_v54  ;;  %4099 = vtanh.f32 %v1018_v42  ;;  %v1033_v53 = vmul.f32 0.5, %v521_v39  ;;  %v524_v54 = vld [vmem:[%s4634_s3 + $0xb88] sm:$0xff] }
 0x1a1   : > { %v4076_v0 = vpop.eup %4075  ;;  %3049 = vst [vmem:[%s4667_s16 + $0xa70] sm:$0xff] %v2537_v55  ;;  %v2539_v1 = vadd.f32 0.5, %v2027_v56  ;;  %v2029_v2 = vmul.f32 0.5, %v4074_v59  ;;  %4101 = vtanh.f32 %v1019_v47  ;;  %v1034_v58 = vmul.f32 0.5, %v522_v44  ;;  %v525_v59 = vld [vmem:[%s4634_s3 + $0xb90] sm:$0xff] }
 0x1a2   : > { %v4078_v5 = vpop.eup %4077  ;;  %3050 = vst [vmem:[%s4667_s16 + $0xa78] sm:$0xff] %v2538_v60  ;;  %v2540_v6 = vadd.f32 0.5, %v2028_v61  ;;  %v2030_v7 = vmul.f32 0.5, %v4076_v0  ;;  %4103 = vtanh.f32 %v1020_v52  ;;  %v1035_v63 = vmul.f32 0.5, %v523_v49  ;;  %v526_v0 = vld [vmem:[%s4634_s3 + $0xb98] sm:$0xff] }
 0x1a3   : > { %v4080_v10 = vpop.eup %4079  ;;  %3051 = vst [vmem:[%s4667_s16 + $0xa80] sm:$0xff] %v2539_v1  ;;  %v2541_v11 = vadd.f32 0.5, %v2029_v2  ;;  %v2031_v12 = vmul.f32 0.5, %v4078_v5  ;;  %4105 = vtanh.f32 %v1021_v57  ;;  %v1036_v4 = vmul.f32 0.5, %v524_v54  ;;  %v527_v5 = vld [vmem:[%s4634_s3 + $0xba0] sm:$0xff] }
 0x1a4   : > { %v4082_v15 = vpop.eup %4081  ;;  %3052 = vst [vmem:[%s4667_s16 + $0xa88] sm:$0xff] %v2540_v6  ;;  %v2542_v16 = vadd.f32 0.5, %v2030_v7  ;;  %v2032_v17 = vmul.f32 0.5, %v4080_v10  ;;  %4107 = vtanh.f32 %v1022_v62  ;;  %v1037_v9 = vmul.f32 0.5, %v525_v59  ;;  %v528_v10 = vld [vmem:[%s4634_s3 + $0xba8] sm:$0xff] }
 0x1a5   : > { %v4084_v20 = vpop.eup %4083  ;;  %3053 = vst [vmem:[%s4667_s16 + $0xa90] sm:$0xff] %v2541_v11  ;;  %v2543_v21 = vadd.f32 0.5, %v2031_v12  ;;  %v2033_v22 = vmul.f32 0.5, %v4082_v15  ;;  %4109 = vtanh.f32 %v1023_v3  ;;  %v1038_v14 = vmul.f32 0.5, %v526_v0  ;;  %v529_v15 = vld [vmem:[%s4634_s3 + $0xbb0] sm:$0xff] }
 0x1a6   : > { %v4086_v25 = vpop.eup %4085  ;;  %3054 = vst [vmem:[%s4667_s16 + $0xa98] sm:$0xff] %v2542_v16  ;;  %v2544_v26 = vadd.f32 0.5, %v2032_v17  ;;  %v2034_v27 = vmul.f32 0.5, %v4084_v20  ;;  %4111 = vtanh.f32 %v1024_v8  ;;  %v1039_v19 = vmul.f32 0.5, %v527_v5  ;;  %v530_v20 = vld [vmem:[%s4634_s3 + $0xbb8] sm:$0xff] }
 0x1a7   : > { %v4088_v30 = vpop.eup %4087  ;;  %3055 = vst [vmem:[%s4667_s16 + $0xaa0] sm:$0xff] %v2543_v21  ;;  %v2545_v31 = vadd.f32 0.5, %v2033_v22  ;;  %v2035_v32 = vmul.f32 0.5, %v4086_v25  ;;  %4113 = vtanh.f32 %v1025_v13  ;;  %v1040_v24 = vmul.f32 0.5, %v528_v10  ;;  %v531_v25 = vld [vmem:[%s4634_s3 + $0xbc0] sm:$0xff] }
 0x1a8   : > { %v4090_v35 = vpop.eup %4089  ;;  %3056 = vst [vmem:[%s4667_s16 + $0xaa8] sm:$0xff] %v2544_v26  ;;  %v2546_v36 = vadd.f32 0.5, %v2034_v27  ;;  %v2036_v37 = vmul.f32 0.5, %v4088_v30  ;;  %4115 = vtanh.f32 %v1026_v18  ;;  %v1041_v29 = vmul.f32 0.5, %v529_v15  ;;  %v532_v30 = vld [vmem:[%s4634_s3 + $0xbc8] sm:$0xff] }
 0x1a9   : > { %v4092_v40 = vpop.eup %4091  ;;  %3057 = vst [vmem:[%s4667_s16 + $0xab0] sm:$0xff] %v2545_v31  ;;  %v2547_v41 = vadd.f32 0.5, %v2035_v32  ;;  %v2037_v42 = vmul.f32 0.5, %v4090_v35  ;;  %4117 = vtanh.f32 %v1027_v23  ;;  %v1042_v34 = vmul.f32 0.5, %v530_v20  ;;  %v533_v35 = vld [vmem:[%s4634_s3 + $0xbd0] sm:$0xff] }
 0x1aa   : > { %v4094_v45 = vpop.eup %4093  ;;  %3058 = vst [vmem:[%s4667_s16 + $0xab8] sm:$0xff] %v2546_v36  ;;  %v2548_v46 = vadd.f32 0.5, %v2036_v37  ;;  %v2038_v47 = vmul.f32 0.5, %v4092_v40  ;;  %4119 = vtanh.f32 %v1028_v28  ;;  %v1043_v39 = vmul.f32 0.5, %v531_v25  ;;  %v534_v40 = vld [vmem:[%s4634_s3 + $0xbd8] sm:$0xff] }
 0x1ab   : > { %v4096_v50 = vpop.eup %4095  ;;  %3059 = vst [vmem:[%s4667_s16 + $0xac0] sm:$0xff] %v2547_v41  ;;  %v2549_v51 = vadd.f32 0.5, %v2037_v42  ;;  %v2039_v52 = vmul.f32 0.5, %v4094_v45  ;;  %4121 = vtanh.f32 %v1029_v33  ;;  %v1044_v44 = vmul.f32 0.5, %v532_v30  ;;  %v535_v45 = vld [vmem:[%s4634_s3 + $0xbe0] sm:$0xff] }
 0x1ac   : > { %v4098_v55 = vpop.eup %4097  ;;  %3060 = vst [vmem:[%s4667_s16 + $0xac8] sm:$0xff] %v2548_v46  ;;  %v2550_v56 = vadd.f32 0.5, %v2038_v47  ;;  %v2040_v57 = vmul.f32 0.5, %v4096_v50  ;;  %4123 = vtanh.f32 %v1030_v38  ;;  %v1045_v49 = vmul.f32 0.5, %v533_v35  ;;  %v536_v50 = vld [vmem:[%s4634_s3 + $0xbe8] sm:$0xff] }
 0x1ad   : > { %v4100_v60 = vpop.eup %4099  ;;  %3061 = vst [vmem:[%s4667_s16 + $0xad0] sm:$0xff] %v2549_v51  ;;  %v2551_v61 = vadd.f32 0.5, %v2039_v52  ;;  %v2041_v62 = vmul.f32 0.5, %v4098_v55  ;;  %4125 = vtanh.f32 %v1031_v43  ;;  %v1046_v54 = vmul.f32 0.5, %v534_v40  ;;  %v537_v55 = vld [vmem:[%s4634_s3 + $0xbf0] sm:$0xff] }
 0x1ae   : > { %v4102_v1 = vpop.eup %4101  ;;  %3062 = vst [vmem:[%s4667_s16 + $0xad8] sm:$0xff] %v2550_v56  ;;  %v2552_v2 = vadd.f32 0.5, %v2040_v57  ;;  %v2042_v3 = vmul.f32 0.5, %v4100_v60  ;;  %4127 = vtanh.f32 %v1032_v48  ;;  %v1047_v59 = vmul.f32 0.5, %v535_v45  ;;  %v538_v60 = vld [vmem:[%s4634_s3 + $0xbf8] sm:$0xff] }
 0x1af   : > { %v4104_v6 = vpop.eup %4103  ;;  %3063 = vst [vmem:[%s4667_s16 + $0xae0] sm:$0xff] %v2551_v61  ;;  %v2553_v7 = vadd.f32 0.5, %v2041_v62  ;;  %v2043_v8 = vmul.f32 0.5, %v4102_v1  ;;  %4129 = vtanh.f32 %v1033_v53  ;;  %v1048_v0 = vmul.f32 0.5, %v536_v50  ;;  %v539_v1 = vld [vmem:[%s4634_s3 + $0xc00] sm:$0xff] }
 0x1b0   : > { %v4106_v11 = vpop.eup %4105  ;;  %3064 = vst [vmem:[%s4667_s16 + $0xae8] sm:$0xff] %v2552_v2  ;;  %v2554_v12 = vadd.f32 0.5, %v2042_v3  ;;  %v2044_v13 = vmul.f32 0.5, %v4104_v6  ;;  %4131 = vtanh.f32 %v1034_v58  ;;  %v1049_v5 = vmul.f32 0.5, %v537_v55  ;;  %v540_v6 = vld [vmem:[%s4634_s3 + $0xc08] sm:$0xff] }
 0x1b1   : > { %v4108_v16 = vpop.eup %4107  ;;  %3065 = vst [vmem:[%s4667_s16 + $0xaf0] sm:$0xff] %v2553_v7  ;;  %v2555_v17 = vadd.f32 0.5, %v2043_v8  ;;  %v2045_v18 = vmul.f32 0.5, %v4106_v11  ;;  %4133 = vtanh.f32 %v1035_v63  ;;  %v1050_v10 = vmul.f32 0.5, %v538_v60  ;;  %v541_v11 = vld [vmem:[%s4634_s3 + $0xc10] sm:$0xff] }
 0x1b2   : > { %v4110_v21 = vpop.eup %4109  ;;  %3066 = vst [vmem:[%s4667_s16 + $0xaf8] sm:$0xff] %v2554_v12  ;;  %v2556_v22 = vadd.f32 0.5, %v2044_v13  ;;  %v2046_v23 = vmul.f32 0.5, %v4108_v16  ;;  %4135 = vtanh.f32 %v1036_v4  ;;  %v1051_v15 = vmul.f32 0.5, %v539_v1  ;;  %v542_v16 = vld [vmem:[%s4634_s3 + $0xc18] sm:$0xff] }
 0x1b3   : > { %v4112_v26 = vpop.eup %4111  ;;  %3067 = vst [vmem:[%s4667_s16 + $0xb00] sm:$0xff] %v2555_v17  ;;  %v2557_v27 = vadd.f32 0.5, %v2045_v18  ;;  %v2047_v28 = vmul.f32 0.5, %v4110_v21  ;;  %4137 = vtanh.f32 %v1037_v9  ;;  %v1052_v20 = vmul.f32 0.5, %v540_v6  ;;  %v543_v21 = vld [vmem:[%s4634_s3 + $0xc20] sm:$0xff] }
 0x1b4   : > { %v4114_v31 = vpop.eup %4113  ;;  %3068 = vst [vmem:[%s4667_s16 + $0xb08] sm:$0xff] %v2556_v22  ;;  %v2558_v32 = vadd.f32 0.5, %v2046_v23  ;;  %v2048_v33 = vmul.f32 0.5, %v4112_v26  ;;  %4139 = vtanh.f32 %v1038_v14  ;;  %v1053_v25 = vmul.f32 0.5, %v541_v11  ;;  %v544_v26 = vld [vmem:[%s4634_s3 + $0xc28] sm:$0xff] }
 0x1b5   : > { %v4116_v36 = vpop.eup %4115  ;;  %3069 = vst [vmem:[%s4667_s16 + $0xb10] sm:$0xff] %v2557_v27  ;;  %v2559_v37 = vadd.f32 0.5, %v2047_v28  ;;  %v2049_v38 = vmul.f32 0.5, %v4114_v31  ;;  %4141 = vtanh.f32 %v1039_v19  ;;  %v1054_v30 = vmul.f32 0.5, %v542_v16  ;;  %v545_v31 = vld [vmem:[%s4634_s3 + $0xc30] sm:$0xff] }
 0x1b6   : > { %v4118_v41 = vpop.eup %4117  ;;  %3070 = vst [vmem:[%s4667_s16 + $0xb18] sm:$0xff] %v2558_v32  ;;  %v2560_v42 = vadd.f32 0.5, %v2048_v33  ;;  %v2050_v43 = vmul.f32 0.5, %v4116_v36  ;;  %4143 = vtanh.f32 %v1040_v24  ;;  %v1055_v35 = vmul.f32 0.5, %v543_v21  ;;  %v546_v36 = vld [vmem:[%s4634_s3 + $0xc38] sm:$0xff] }
 0x1b7   : > { %v4120_v46 = vpop.eup %4119  ;;  %3071 = vst [vmem:[%s4667_s16 + $0xb20] sm:$0xff] %v2559_v37  ;;  %v2561_v47 = vadd.f32 0.5, %v2049_v38  ;;  %v2051_v48 = vmul.f32 0.5, %v4118_v41  ;;  %4145 = vtanh.f32 %v1041_v29  ;;  %v1056_v40 = vmul.f32 0.5, %v544_v26  ;;  %v547_v41 = vld [vmem:[%s4634_s3 + $0xc40] sm:$0xff] }
 0x1b8   : > { %v4122_v51 = vpop.eup %4121  ;;  %3072 = vst [vmem:[%s4667_s16 + $0xb28] sm:$0xff] %v2560_v42  ;;  %v2562_v52 = vadd.f32 0.5, %v2050_v43  ;;  %v2052_v53 = vmul.f32 0.5, %v4120_v46  ;;  %4147 = vtanh.f32 %v1042_v34  ;;  %v1057_v45 = vmul.f32 0.5, %v545_v31  ;;  %v548_v46 = vld [vmem:[%s4634_s3 + $0xc48] sm:$0xff] }
 0x1b9   : > { %v4124_v56 = vpop.eup %4123  ;;  %3073 = vst [vmem:[%s4667_s16 + $0xb30] sm:$0xff] %v2561_v47  ;;  %v2563_v57 = vadd.f32 0.5, %v2051_v48  ;;  %v2053_v58 = vmul.f32 0.5, %v4122_v51  ;;  %4149 = vtanh.f32 %v1043_v39  ;;  %v1058_v50 = vmul.f32 0.5, %v546_v36  ;;  %v549_v51 = vld [vmem:[%s4634_s3 + $0xc50] sm:$0xff] }
 0x1ba   : > { %v4126_v61 = vpop.eup %4125  ;;  %3074 = vst [vmem:[%s4667_s16 + $0xb38] sm:$0xff] %v2562_v52  ;;  %v2564_v62 = vadd.f32 0.5, %v2052_v53  ;;  %v2054_v63 = vmul.f32 0.5, %v4124_v56  ;;  %4151 = vtanh.f32 %v1044_v44  ;;  %v1059_v55 = vmul.f32 0.5, %v547_v41  ;;  %v550_v56 = vld [vmem:[%s4634_s3 + $0xc58] sm:$0xff] }
 0x1bb   : > { %v4128_v2 = vpop.eup %4127  ;;  %3075 = vst [vmem:[%s4667_s16 + $0xb40] sm:$0xff] %v2563_v57  ;;  %v2565_v3 = vadd.f32 0.5, %v2053_v58  ;;  %v2055_v4 = vmul.f32 0.5, %v4126_v61  ;;  %4153 = vtanh.f32 %v1045_v49  ;;  %v1060_v60 = vmul.f32 0.5, %v548_v46  ;;  %v551_v61 = vld [vmem:[%s4634_s3 + $0xc60] sm:$0xff] }
 0x1bc   : > { %v4130_v7 = vpop.eup %4129  ;;  %3076 = vst [vmem:[%s4667_s16 + $0xb48] sm:$0xff] %v2564_v62  ;;  %v2566_v8 = vadd.f32 0.5, %v2054_v63  ;;  %v2056_v9 = vmul.f32 0.5, %v4128_v2  ;;  %4155 = vtanh.f32 %v1046_v54  ;;  %v1061_v1 = vmul.f32 0.5, %v549_v51  ;;  %v552_v2 = vld [vmem:[%s4634_s3 + $0xc68] sm:$0xff] }
 0x1bd   : > { %v4132_v12 = vpop.eup %4131  ;;  %3077 = vst [vmem:[%s4667_s16 + $0xb50] sm:$0xff] %v2565_v3  ;;  %v2567_v13 = vadd.f32 0.5, %v2055_v4  ;;  %v2057_v14 = vmul.f32 0.5, %v4130_v7  ;;  %4157 = vtanh.f32 %v1047_v59  ;;  %v1062_v6 = vmul.f32 0.5, %v550_v56  ;;  %v553_v7 = vld [vmem:[%s4634_s3 + $0xc70] sm:$0xff] }
 0x1be   : > { %v4134_v17 = vpop.eup %4133  ;;  %3078 = vst [vmem:[%s4667_s16 + $0xb58] sm:$0xff] %v2566_v8  ;;  %v2568_v18 = vadd.f32 0.5, %v2056_v9  ;;  %v2058_v19 = vmul.f32 0.5, %v4132_v12  ;;  %4159 = vtanh.f32 %v1048_v0  ;;  %v1063_v11 = vmul.f32 0.5, %v551_v61  ;;  %v554_v12 = vld [vmem:[%s4634_s3 + $0xc78] sm:$0xff] }
 0x1bf   : > { %v4136_v22 = vpop.eup %4135  ;;  %3079 = vst [vmem:[%s4667_s16 + $0xb60] sm:$0xff] %v2567_v13  ;;  %v2569_v23 = vadd.f32 0.5, %v2057_v14  ;;  %v2059_v24 = vmul.f32 0.5, %v4134_v17  ;;  %4161 = vtanh.f32 %v1049_v5  ;;  %v1064_v16 = vmul.f32 0.5, %v552_v2  ;;  %v555_v17 = vld [vmem:[%s4634_s3 + $0xc80] sm:$0xff] }
 0x1c0   : > { %v4138_v27 = vpop.eup %4137  ;;  %3080 = vst [vmem:[%s4667_s16 + $0xb68] sm:$0xff] %v2568_v18  ;;  %v2570_v28 = vadd.f32 0.5, %v2058_v19  ;;  %v2060_v29 = vmul.f32 0.5, %v4136_v22  ;;  %4163 = vtanh.f32 %v1050_v10  ;;  %v1065_v21 = vmul.f32 0.5, %v553_v7  ;;  %v556_v22 = vld [vmem:[%s4634_s3 + $0xc88] sm:$0xff] }
 0x1c1   : > { %v4140_v32 = vpop.eup %4139  ;;  %3081 = vst [vmem:[%s4667_s16 + $0xb70] sm:$0xff] %v2569_v23  ;;  %v2571_v33 = vadd.f32 0.5, %v2059_v24  ;;  %v2061_v34 = vmul.f32 0.5, %v4138_v27  ;;  %4165 = vtanh.f32 %v1051_v15  ;;  %v1066_v26 = vmul.f32 0.5, %v554_v12  ;;  %v557_v27 = vld [vmem:[%s4634_s3 + $0xc90] sm:$0xff] }
 0x1c2   : > { %v4142_v37 = vpop.eup %4141  ;;  %3082 = vst [vmem:[%s4667_s16 + $0xb78] sm:$0xff] %v2570_v28  ;;  %v2572_v38 = vadd.f32 0.5, %v2060_v29  ;;  %v2062_v39 = vmul.f32 0.5, %v4140_v32  ;;  %4167 = vtanh.f32 %v1052_v20  ;;  %v1067_v31 = vmul.f32 0.5, %v555_v17  ;;  %v558_v32 = vld [vmem:[%s4634_s3 + $0xc98] sm:$0xff] }
 0x1c3   : > { %v4144_v42 = vpop.eup %4143  ;;  %3083 = vst [vmem:[%s4667_s16 + $0xb80] sm:$0xff] %v2571_v33  ;;  %v2573_v43 = vadd.f32 0.5, %v2061_v34  ;;  %v2063_v44 = vmul.f32 0.5, %v4142_v37  ;;  %4169 = vtanh.f32 %v1053_v25  ;;  %v1068_v36 = vmul.f32 0.5, %v556_v22  ;;  %v559_v37 = vld [vmem:[%s4634_s3 + $0xca0] sm:$0xff] }
 0x1c4   : > { %v4146_v47 = vpop.eup %4145  ;;  %3084 = vst [vmem:[%s4667_s16 + $0xb88] sm:$0xff] %v2572_v38  ;;  %v2574_v48 = vadd.f32 0.5, %v2062_v39  ;;  %v2064_v49 = vmul.f32 0.5, %v4144_v42  ;;  %4171 = vtanh.f32 %v1054_v30  ;;  %v1069_v41 = vmul.f32 0.5, %v557_v27  ;;  %v560_v42 = vld [vmem:[%s4634_s3 + $0xca8] sm:$0xff] }
 0x1c5   : > { %v4148_v52 = vpop.eup %4147  ;;  %3085 = vst [vmem:[%s4667_s16 + $0xb90] sm:$0xff] %v2573_v43  ;;  %v2575_v53 = vadd.f32 0.5, %v2063_v44  ;;  %v2065_v54 = vmul.f32 0.5, %v4146_v47  ;;  %4173 = vtanh.f32 %v1055_v35  ;;  %v1070_v46 = vmul.f32 0.5, %v558_v32  ;;  %v561_v47 = vld [vmem:[%s4634_s3 + $0xcb0] sm:$0xff] }
 0x1c6   : > { %v4150_v57 = vpop.eup %4149  ;;  %3086 = vst [vmem:[%s4667_s16 + $0xb98] sm:$0xff] %v2574_v48  ;;  %v2576_v58 = vadd.f32 0.5, %v2064_v49  ;;  %v2066_v59 = vmul.f32 0.5, %v4148_v52  ;;  %4175 = vtanh.f32 %v1056_v40  ;;  %v1071_v51 = vmul.f32 0.5, %v559_v37  ;;  %v562_v52 = vld [vmem:[%s4634_s3 + $0xcb8] sm:$0xff] }
 0x1c7   : > { %v4152_v62 = vpop.eup %4151  ;;  %3087 = vst [vmem:[%s4667_s16 + $0xba0] sm:$0xff] %v2575_v53  ;;  %v2577_v63 = vadd.f32 0.5, %v2065_v54  ;;  %v2067_v0 = vmul.f32 0.5, %v4150_v57  ;;  %4177 = vtanh.f32 %v1057_v45  ;;  %v1072_v56 = vmul.f32 0.5, %v560_v42  ;;  %v563_v57 = vld [vmem:[%s4634_s3 + $0xcc0] sm:$0xff] }
 0x1c8   : > { %v4154_v3 = vpop.eup %4153  ;;  %3088 = vst [vmem:[%s4667_s16 + $0xba8] sm:$0xff] %v2576_v58  ;;  %v2578_v4 = vadd.f32 0.5, %v2066_v59  ;;  %v2068_v5 = vmul.f32 0.5, %v4152_v62  ;;  %4179 = vtanh.f32 %v1058_v50  ;;  %v1073_v61 = vmul.f32 0.5, %v561_v47  ;;  %v564_v62 = vld [vmem:[%s4634_s3 + $0xcc8] sm:$0xff] }
 0x1c9   : > { %v4156_v8 = vpop.eup %4155  ;;  %3089 = vst [vmem:[%s4667_s16 + $0xbb0] sm:$0xff] %v2577_v63  ;;  %v2579_v9 = vadd.f32 0.5, %v2067_v0  ;;  %v2069_v10 = vmul.f32 0.5, %v4154_v3  ;;  %4181 = vtanh.f32 %v1059_v55  ;;  %v1074_v2 = vmul.f32 0.5, %v562_v52  ;;  %v565_v3 = vld [vmem:[%s4634_s3 + $0xcd0] sm:$0xff] }
 0x1ca   : > { %v4158_v13 = vpop.eup %4157  ;;  %3090 = vst [vmem:[%s4667_s16 + $0xbb8] sm:$0xff] %v2578_v4  ;;  %v2580_v14 = vadd.f32 0.5, %v2068_v5  ;;  %v2070_v15 = vmul.f32 0.5, %v4156_v8  ;;  %4183 = vtanh.f32 %v1060_v60  ;;  %v1075_v7 = vmul.f32 0.5, %v563_v57  ;;  %v566_v8 = vld [vmem:[%s4634_s3 + $0xcd8] sm:$0xff] }
 0x1cb   : > { %v4160_v18 = vpop.eup %4159  ;;  %3091 = vst [vmem:[%s4667_s16 + $0xbc0] sm:$0xff] %v2579_v9  ;;  %v2581_v19 = vadd.f32 0.5, %v2069_v10  ;;  %v2071_v20 = vmul.f32 0.5, %v4158_v13  ;;  %4185 = vtanh.f32 %v1061_v1  ;;  %v1076_v12 = vmul.f32 0.5, %v564_v62  ;;  %v567_v13 = vld [vmem:[%s4634_s3 + $0xce0] sm:$0xff] }
 0x1cc   : > { %v4162_v23 = vpop.eup %4161  ;;  %3092 = vst [vmem:[%s4667_s16 + $0xbc8] sm:$0xff] %v2580_v14  ;;  %v2582_v24 = vadd.f32 0.5, %v2070_v15  ;;  %v2072_v25 = vmul.f32 0.5, %v4160_v18  ;;  %4187 = vtanh.f32 %v1062_v6  ;;  %v1077_v17 = vmul.f32 0.5, %v565_v3  ;;  %v568_v18 = vld [vmem:[%s4634_s3 + $0xce8] sm:$0xff] }
 0x1cd   : > { %v4164_v28 = vpop.eup %4163  ;;  %3093 = vst [vmem:[%s4667_s16 + $0xbd0] sm:$0xff] %v2581_v19  ;;  %v2583_v29 = vadd.f32 0.5, %v2071_v20  ;;  %v2073_v30 = vmul.f32 0.5, %v4162_v23  ;;  %4189 = vtanh.f32 %v1063_v11  ;;  %v1078_v22 = vmul.f32 0.5, %v566_v8  ;;  %v569_v23 = vld [vmem:[%s4634_s3 + $0xcf0] sm:$0xff] }
 0x1ce   : > { %v4166_v33 = vpop.eup %4165  ;;  %3094 = vst [vmem:[%s4667_s16 + $0xbd8] sm:$0xff] %v2582_v24  ;;  %v2584_v34 = vadd.f32 0.5, %v2072_v25  ;;  %v2074_v35 = vmul.f32 0.5, %v4164_v28  ;;  %4191 = vtanh.f32 %v1064_v16  ;;  %v1079_v27 = vmul.f32 0.5, %v567_v13  ;;  %v570_v28 = vld [vmem:[%s4634_s3 + $0xcf8] sm:$0xff] }
 0x1cf   : > { %v4168_v38 = vpop.eup %4167  ;;  %3095 = vst [vmem:[%s4667_s16 + $0xbe0] sm:$0xff] %v2583_v29  ;;  %v2585_v39 = vadd.f32 0.5, %v2073_v30  ;;  %v2075_v40 = vmul.f32 0.5, %v4166_v33  ;;  %4193 = vtanh.f32 %v1065_v21  ;;  %v1080_v32 = vmul.f32 0.5, %v568_v18  ;;  %v571_v33 = vld [vmem:[%s4634_s3 + $0xd00] sm:$0xff] }
 0x1d0   : > { %v4170_v43 = vpop.eup %4169  ;;  %3096 = vst [vmem:[%s4667_s16 + $0xbe8] sm:$0xff] %v2584_v34  ;;  %v2586_v44 = vadd.f32 0.5, %v2074_v35  ;;  %v2076_v45 = vmul.f32 0.5, %v4168_v38  ;;  %4195 = vtanh.f32 %v1066_v26  ;;  %v1081_v37 = vmul.f32 0.5, %v569_v23  ;;  %v572_v38 = vld [vmem:[%s4634_s3 + $0xd08] sm:$0xff] }
 0x1d1   : > { %v4172_v48 = vpop.eup %4171  ;;  %3097 = vst [vmem:[%s4667_s16 + $0xbf0] sm:$0xff] %v2585_v39  ;;  %v2587_v49 = vadd.f32 0.5, %v2075_v40  ;;  %v2077_v50 = vmul.f32 0.5, %v4170_v43  ;;  %4197 = vtanh.f32 %v1067_v31  ;;  %v1082_v42 = vmul.f32 0.5, %v570_v28  ;;  %v573_v43 = vld [vmem:[%s4634_s3 + $0xd10] sm:$0xff] }
 0x1d2   : > { %v4174_v53 = vpop.eup %4173  ;;  %3098 = vst [vmem:[%s4667_s16 + $0xbf8] sm:$0xff] %v2586_v44  ;;  %v2588_v54 = vadd.f32 0.5, %v2076_v45  ;;  %v2078_v55 = vmul.f32 0.5, %v4172_v48  ;;  %4199 = vtanh.f32 %v1068_v36  ;;  %v1083_v47 = vmul.f32 0.5, %v571_v33  ;;  %v574_v48 = vld [vmem:[%s4634_s3 + $0xd18] sm:$0xff] }
 0x1d3   : > { %v4176_v58 = vpop.eup %4175  ;;  %3099 = vst [vmem:[%s4667_s16 + $0xc00] sm:$0xff] %v2587_v49  ;;  %v2589_v59 = vadd.f32 0.5, %v2077_v50  ;;  %v2079_v60 = vmul.f32 0.5, %v4174_v53  ;;  %4201 = vtanh.f32 %v1069_v41  ;;  %v1084_v52 = vmul.f32 0.5, %v572_v38  ;;  %v575_v53 = vld [vmem:[%s4634_s3 + $0xd20] sm:$0xff] }
 0x1d4   : > { %v4178_v63 = vpop.eup %4177  ;;  %3100 = vst [vmem:[%s4667_s16 + $0xc08] sm:$0xff] %v2588_v54  ;;  %v2590_v0 = vadd.f32 0.5, %v2078_v55  ;;  %v2080_v1 = vmul.f32 0.5, %v4176_v58  ;;  %4203 = vtanh.f32 %v1070_v46  ;;  %v1085_v57 = vmul.f32 0.5, %v573_v43  ;;  %v576_v58 = vld [vmem:[%s4634_s3 + $0xd28] sm:$0xff] }
 0x1d5   : > { %v4180_v4 = vpop.eup %4179  ;;  %3101 = vst [vmem:[%s4667_s16 + $0xc10] sm:$0xff] %v2589_v59  ;;  %v2591_v5 = vadd.f32 0.5, %v2079_v60  ;;  %v2081_v6 = vmul.f32 0.5, %v4178_v63  ;;  %4205 = vtanh.f32 %v1071_v51  ;;  %v1086_v62 = vmul.f32 0.5, %v574_v48  ;;  %v577_v63 = vld [vmem:[%s4634_s3 + $0xd30] sm:$0xff] }
 0x1d6   : > { %v4182_v9 = vpop.eup %4181  ;;  %3102 = vst [vmem:[%s4667_s16 + $0xc18] sm:$0xff] %v2590_v0  ;;  %v2592_v10 = vadd.f32 0.5, %v2080_v1  ;;  %v2082_v11 = vmul.f32 0.5, %v4180_v4  ;;  %4207 = vtanh.f32 %v1072_v56  ;;  %v1087_v3 = vmul.f32 0.5, %v575_v53  ;;  %v578_v4 = vld [vmem:[%s4634_s3 + $0xd38] sm:$0xff] }
 0x1d7   : > { %v4184_v14 = vpop.eup %4183  ;;  %3103 = vst [vmem:[%s4667_s16 + $0xc20] sm:$0xff] %v2591_v5  ;;  %v2593_v15 = vadd.f32 0.5, %v2081_v6  ;;  %v2083_v16 = vmul.f32 0.5, %v4182_v9  ;;  %4209 = vtanh.f32 %v1073_v61  ;;  %v1088_v8 = vmul.f32 0.5, %v576_v58  ;;  %v579_v9 = vld [vmem:[%s4634_s3 + $0xd40] sm:$0xff] }
 0x1d8   : > { %v4186_v19 = vpop.eup %4185  ;;  %3104 = vst [vmem:[%s4667_s16 + $0xc28] sm:$0xff] %v2592_v10  ;;  %v2594_v20 = vadd.f32 0.5, %v2082_v11  ;;  %v2084_v21 = vmul.f32 0.5, %v4184_v14  ;;  %4211 = vtanh.f32 %v1074_v2  ;;  %v1089_v13 = vmul.f32 0.5, %v577_v63  ;;  %v580_v14 = vld [vmem:[%s4634_s3 + $0xd48] sm:$0xff] }
 0x1d9   : > { %v4188_v24 = vpop.eup %4187  ;;  %3105 = vst [vmem:[%s4667_s16 + $0xc30] sm:$0xff] %v2593_v15  ;;  %v2595_v25 = vadd.f32 0.5, %v2083_v16  ;;  %v2085_v26 = vmul.f32 0.5, %v4186_v19  ;;  %4213 = vtanh.f32 %v1075_v7  ;;  %v1090_v18 = vmul.f32 0.5, %v578_v4  ;;  %v581_v19 = vld [vmem:[%s4634_s3 + $0xd50] sm:$0xff] }
 0x1da   : > { %v4190_v29 = vpop.eup %4189  ;;  %3106 = vst [vmem:[%s4667_s16 + $0xc38] sm:$0xff] %v2594_v20  ;;  %v2596_v30 = vadd.f32 0.5, %v2084_v21  ;;  %v2086_v31 = vmul.f32 0.5, %v4188_v24  ;;  %4215 = vtanh.f32 %v1076_v12  ;;  %v1091_v23 = vmul.f32 0.5, %v579_v9  ;;  %v582_v24 = vld [vmem:[%s4634_s3 + $0xd58] sm:$0xff] }
 0x1db   : > { %v4192_v34 = vpop.eup %4191  ;;  %3107 = vst [vmem:[%s4667_s16 + $0xc40] sm:$0xff] %v2595_v25  ;;  %v2597_v35 = vadd.f32 0.5, %v2085_v26  ;;  %v2087_v36 = vmul.f32 0.5, %v4190_v29  ;;  %4217 = vtanh.f32 %v1077_v17  ;;  %v1092_v28 = vmul.f32 0.5, %v580_v14  ;;  %v583_v29 = vld [vmem:[%s4634_s3 + $0xd60] sm:$0xff] }
 0x1dc   : > { %v4194_v39 = vpop.eup %4193  ;;  %3108 = vst [vmem:[%s4667_s16 + $0xc48] sm:$0xff] %v2596_v30  ;;  %v2598_v40 = vadd.f32 0.5, %v2086_v31  ;;  %v2088_v41 = vmul.f32 0.5, %v4192_v34  ;;  %4219 = vtanh.f32 %v1078_v22  ;;  %v1093_v33 = vmul.f32 0.5, %v581_v19  ;;  %v584_v34 = vld [vmem:[%s4634_s3 + $0xd68] sm:$0xff] }
 0x1dd   : > { %v4196_v44 = vpop.eup %4195  ;;  %3109 = vst [vmem:[%s4667_s16 + $0xc50] sm:$0xff] %v2597_v35  ;;  %v2599_v45 = vadd.f32 0.5, %v2087_v36  ;;  %v2089_v46 = vmul.f32 0.5, %v4194_v39  ;;  %4221 = vtanh.f32 %v1079_v27  ;;  %v1094_v38 = vmul.f32 0.5, %v582_v24  ;;  %v585_v39 = vld [vmem:[%s4634_s3 + $0xd70] sm:$0xff] }
 0x1de   : > { %v4198_v49 = vpop.eup %4197  ;;  %3110 = vst [vmem:[%s4667_s16 + $0xc58] sm:$0xff] %v2598_v40  ;;  %v2600_v50 = vadd.f32 0.5, %v2088_v41  ;;  %v2090_v51 = vmul.f32 0.5, %v4196_v44  ;;  %4223 = vtanh.f32 %v1080_v32  ;;  %v1095_v43 = vmul.f32 0.5, %v583_v29  ;;  %v586_v44 = vld [vmem:[%s4634_s3 + $0xd78] sm:$0xff] }
 0x1df   : > { %v4200_v54 = vpop.eup %4199  ;;  %3111 = vst [vmem:[%s4667_s16 + $0xc60] sm:$0xff] %v2599_v45  ;;  %v2601_v55 = vadd.f32 0.5, %v2089_v46  ;;  %v2091_v56 = vmul.f32 0.5, %v4198_v49  ;;  %4225 = vtanh.f32 %v1081_v37  ;;  %v1096_v48 = vmul.f32 0.5, %v584_v34  ;;  %v587_v49 = vld [vmem:[%s4634_s3 + $0xd80] sm:$0xff] }
 0x1e0   : > { %v4202_v59 = vpop.eup %4201  ;;  %3112 = vst [vmem:[%s4667_s16 + $0xc68] sm:$0xff] %v2600_v50  ;;  %v2602_v60 = vadd.f32 0.5, %v2090_v51  ;;  %v2092_v61 = vmul.f32 0.5, %v4200_v54  ;;  %4227 = vtanh.f32 %v1082_v42  ;;  %v1097_v53 = vmul.f32 0.5, %v585_v39  ;;  %v588_v54 = vld [vmem:[%s4634_s3 + $0xd88] sm:$0xff] }
 0x1e1   : > { %v4204_v0 = vpop.eup %4203  ;;  %3113 = vst [vmem:[%s4667_s16 + $0xc70] sm:$0xff] %v2601_v55  ;;  %v2603_v1 = vadd.f32 0.5, %v2091_v56  ;;  %v2093_v2 = vmul.f32 0.5, %v4202_v59  ;;  %4229 = vtanh.f32 %v1083_v47  ;;  %v1098_v58 = vmul.f32 0.5, %v586_v44  ;;  %v589_v59 = vld [vmem:[%s4634_s3 + $0xd90] sm:$0xff] }
 0x1e2   : > { %v4206_v5 = vpop.eup %4205  ;;  %3114 = vst [vmem:[%s4667_s16 + $0xc78] sm:$0xff] %v2602_v60  ;;  %v2604_v6 = vadd.f32 0.5, %v2092_v61  ;;  %v2094_v7 = vmul.f32 0.5, %v4204_v0  ;;  %4231 = vtanh.f32 %v1084_v52  ;;  %v1099_v63 = vmul.f32 0.5, %v587_v49  ;;  %v590_v0 = vld [vmem:[%s4634_s3 + $0xd98] sm:$0xff] }
 0x1e3   : > { %v4208_v10 = vpop.eup %4207  ;;  %3115 = vst [vmem:[%s4667_s16 + $0xc80] sm:$0xff] %v2603_v1  ;;  %v2605_v11 = vadd.f32 0.5, %v2093_v2  ;;  %v2095_v12 = vmul.f32 0.5, %v4206_v5  ;;  %4233 = vtanh.f32 %v1085_v57  ;;  %v1100_v4 = vmul.f32 0.5, %v588_v54  ;;  %v591_v5 = vld [vmem:[%s4634_s3 + $0xda0] sm:$0xff] }
 0x1e4   : > { %v4210_v15 = vpop.eup %4209  ;;  %3116 = vst [vmem:[%s4667_s16 + $0xc88] sm:$0xff] %v2604_v6  ;;  %v2606_v16 = vadd.f32 0.5, %v2094_v7  ;;  %v2096_v17 = vmul.f32 0.5, %v4208_v10  ;;  %4235 = vtanh.f32 %v1086_v62  ;;  %v1101_v9 = vmul.f32 0.5, %v589_v59  ;;  %v592_v10 = vld [vmem:[%s4634_s3 + $0xda8] sm:$0xff] }
 0x1e5   : > { %v4212_v20 = vpop.eup %4211  ;;  %3117 = vst [vmem:[%s4667_s16 + $0xc90] sm:$0xff] %v2605_v11  ;;  %v2607_v21 = vadd.f32 0.5, %v2095_v12  ;;  %v2097_v22 = vmul.f32 0.5, %v4210_v15  ;;  %4237 = vtanh.f32 %v1087_v3  ;;  %v1102_v14 = vmul.f32 0.5, %v590_v0  ;;  %v593_v15 = vld [vmem:[%s4634_s3 + $0xdb0] sm:$0xff] }
 0x1e6   : > { %v4214_v25 = vpop.eup %4213  ;;  %3118 = vst [vmem:[%s4667_s16 + $0xc98] sm:$0xff] %v2606_v16  ;;  %v2608_v26 = vadd.f32 0.5, %v2096_v17  ;;  %v2098_v27 = vmul.f32 0.5, %v4212_v20  ;;  %4239 = vtanh.f32 %v1088_v8  ;;  %v1103_v19 = vmul.f32 0.5, %v591_v5  ;;  %v594_v20 = vld [vmem:[%s4634_s3 + $0xdb8] sm:$0xff] }
 0x1e7   : > { %v4216_v30 = vpop.eup %4215  ;;  %3119 = vst [vmem:[%s4667_s16 + $0xca0] sm:$0xff] %v2607_v21  ;;  %v2609_v31 = vadd.f32 0.5, %v2097_v22  ;;  %v2099_v32 = vmul.f32 0.5, %v4214_v25  ;;  %4241 = vtanh.f32 %v1089_v13  ;;  %v1104_v24 = vmul.f32 0.5, %v592_v10  ;;  %v595_v25 = vld [vmem:[%s4634_s3 + $0xdc0] sm:$0xff] }
 0x1e8   : > { %v4218_v35 = vpop.eup %4217  ;;  %3120 = vst [vmem:[%s4667_s16 + $0xca8] sm:$0xff] %v2608_v26  ;;  %v2610_v36 = vadd.f32 0.5, %v2098_v27  ;;  %v2100_v37 = vmul.f32 0.5, %v4216_v30  ;;  %4243 = vtanh.f32 %v1090_v18  ;;  %v1105_v29 = vmul.f32 0.5, %v593_v15  ;;  %v596_v30 = vld [vmem:[%s4634_s3 + $0xdc8] sm:$0xff] }
 0x1e9   : > { %v4220_v40 = vpop.eup %4219  ;;  %3121 = vst [vmem:[%s4667_s16 + $0xcb0] sm:$0xff] %v2609_v31  ;;  %v2611_v41 = vadd.f32 0.5, %v2099_v32  ;;  %v2101_v42 = vmul.f32 0.5, %v4218_v35  ;;  %4245 = vtanh.f32 %v1091_v23  ;;  %v1106_v34 = vmul.f32 0.5, %v594_v20  ;;  %v597_v35 = vld [vmem:[%s4634_s3 + $0xdd0] sm:$0xff] }
 0x1ea   : > { %v4222_v45 = vpop.eup %4221  ;;  %3122 = vst [vmem:[%s4667_s16 + $0xcb8] sm:$0xff] %v2610_v36  ;;  %v2612_v46 = vadd.f32 0.5, %v2100_v37  ;;  %v2102_v47 = vmul.f32 0.5, %v4220_v40  ;;  %4247 = vtanh.f32 %v1092_v28  ;;  %v1107_v39 = vmul.f32 0.5, %v595_v25  ;;  %v598_v40 = vld [vmem:[%s4634_s3 + $0xdd8] sm:$0xff] }
 0x1eb   : > { %v4224_v50 = vpop.eup %4223  ;;  %3123 = vst [vmem:[%s4667_s16 + $0xcc0] sm:$0xff] %v2611_v41  ;;  %v2613_v51 = vadd.f32 0.5, %v2101_v42  ;;  %v2103_v52 = vmul.f32 0.5, %v4222_v45  ;;  %4249 = vtanh.f32 %v1093_v33  ;;  %v1108_v44 = vmul.f32 0.5, %v596_v30  ;;  %v599_v45 = vld [vmem:[%s4634_s3 + $0xde0] sm:$0xff] }
 0x1ec   : > { %v4226_v55 = vpop.eup %4225  ;;  %3124 = vst [vmem:[%s4667_s16 + $0xcc8] sm:$0xff] %v2612_v46  ;;  %v2614_v56 = vadd.f32 0.5, %v2102_v47  ;;  %v2104_v57 = vmul.f32 0.5, %v4224_v50  ;;  %4251 = vtanh.f32 %v1094_v38  ;;  %v1109_v49 = vmul.f32 0.5, %v597_v35  ;;  %v600_v50 = vld [vmem:[%s4634_s3 + $0xde8] sm:$0xff] }
 0x1ed   : > { %v4228_v60 = vpop.eup %4227  ;;  %3125 = vst [vmem:[%s4667_s16 + $0xcd0] sm:$0xff] %v2613_v51  ;;  %v2615_v61 = vadd.f32 0.5, %v2103_v52  ;;  %v2105_v62 = vmul.f32 0.5, %v4226_v55  ;;  %4253 = vtanh.f32 %v1095_v43  ;;  %v1110_v54 = vmul.f32 0.5, %v598_v40  ;;  %v601_v55 = vld [vmem:[%s4634_s3 + $0xdf0] sm:$0xff] }
 0x1ee   : > { %v4230_v1 = vpop.eup %4229  ;;  %3126 = vst [vmem:[%s4667_s16 + $0xcd8] sm:$0xff] %v2614_v56  ;;  %v2616_v2 = vadd.f32 0.5, %v2104_v57  ;;  %v2106_v3 = vmul.f32 0.5, %v4228_v60  ;;  %4255 = vtanh.f32 %v1096_v48  ;;  %v1111_v59 = vmul.f32 0.5, %v599_v45  ;;  %v602_v60 = vld [vmem:[%s4634_s3 + $0xdf8] sm:$0xff] }
 0x1ef   : > { %v4232_v6 = vpop.eup %4231  ;;  %3127 = vst [vmem:[%s4667_s16 + $0xce0] sm:$0xff] %v2615_v61  ;;  %v2617_v7 = vadd.f32 0.5, %v2105_v62  ;;  %v2107_v8 = vmul.f32 0.5, %v4230_v1  ;;  %4257 = vtanh.f32 %v1097_v53  ;;  %v1112_v0 = vmul.f32 0.5, %v600_v50  ;;  %v603_v1 = vld [vmem:[%s4634_s3 + $0xe00] sm:$0xff] }
 0x1f0   : > { %v4234_v11 = vpop.eup %4233  ;;  %3128 = vst [vmem:[%s4667_s16 + $0xce8] sm:$0xff] %v2616_v2  ;;  %v2618_v12 = vadd.f32 0.5, %v2106_v3  ;;  %v2108_v13 = vmul.f32 0.5, %v4232_v6  ;;  %4259 = vtanh.f32 %v1098_v58  ;;  %v1113_v5 = vmul.f32 0.5, %v601_v55  ;;  %v604_v6 = vld [vmem:[%s4634_s3 + $0xe08] sm:$0xff] }
 0x1f1   : > { %v4236_v16 = vpop.eup %4235  ;;  %3129 = vst [vmem:[%s4667_s16 + $0xcf0] sm:$0xff] %v2617_v7  ;;  %v2619_v17 = vadd.f32 0.5, %v2107_v8  ;;  %v2109_v18 = vmul.f32 0.5, %v4234_v11  ;;  %4261 = vtanh.f32 %v1099_v63  ;;  %v1114_v10 = vmul.f32 0.5, %v602_v60  ;;  %v605_v11 = vld [vmem:[%s4634_s3 + $0xe10] sm:$0xff] }
 0x1f2   : > { %v4238_v21 = vpop.eup %4237  ;;  %3130 = vst [vmem:[%s4667_s16 + $0xcf8] sm:$0xff] %v2618_v12  ;;  %v2620_v22 = vadd.f32 0.5, %v2108_v13  ;;  %v2110_v23 = vmul.f32 0.5, %v4236_v16  ;;  %4263 = vtanh.f32 %v1100_v4  ;;  %v1115_v15 = vmul.f32 0.5, %v603_v1  ;;  %v606_v16 = vld [vmem:[%s4634_s3 + $0xe18] sm:$0xff] }
 0x1f3   : > { %v4240_v26 = vpop.eup %4239  ;;  %3131 = vst [vmem:[%s4667_s16 + $0xd00] sm:$0xff] %v2619_v17  ;;  %v2621_v27 = vadd.f32 0.5, %v2109_v18  ;;  %v2111_v28 = vmul.f32 0.5, %v4238_v21  ;;  %4265 = vtanh.f32 %v1101_v9  ;;  %v1116_v20 = vmul.f32 0.5, %v604_v6  ;;  %v607_v21 = vld [vmem:[%s4634_s3 + $0xe20] sm:$0xff] }
 0x1f4   : > { %v4242_v31 = vpop.eup %4241  ;;  %3132 = vst [vmem:[%s4667_s16 + $0xd08] sm:$0xff] %v2620_v22  ;;  %v2622_v32 = vadd.f32 0.5, %v2110_v23  ;;  %v2112_v33 = vmul.f32 0.5, %v4240_v26  ;;  %4267 = vtanh.f32 %v1102_v14  ;;  %v1117_v25 = vmul.f32 0.5, %v605_v11  ;;  %v608_v26 = vld [vmem:[%s4634_s3 + $0xe28] sm:$0xff] }
 0x1f5   : > { %v4244_v36 = vpop.eup %4243  ;;  %3133 = vst [vmem:[%s4667_s16 + $0xd10] sm:$0xff] %v2621_v27  ;;  %v2623_v37 = vadd.f32 0.5, %v2111_v28  ;;  %v2113_v38 = vmul.f32 0.5, %v4242_v31  ;;  %4269 = vtanh.f32 %v1103_v19  ;;  %v1118_v30 = vmul.f32 0.5, %v606_v16  ;;  %v609_v31 = vld [vmem:[%s4634_s3 + $0xe30] sm:$0xff] }
 0x1f6   : > { %v4246_v41 = vpop.eup %4245  ;;  %3134 = vst [vmem:[%s4667_s16 + $0xd18] sm:$0xff] %v2622_v32  ;;  %v2624_v42 = vadd.f32 0.5, %v2112_v33  ;;  %v2114_v43 = vmul.f32 0.5, %v4244_v36  ;;  %4271 = vtanh.f32 %v1104_v24  ;;  %v1119_v35 = vmul.f32 0.5, %v607_v21  ;;  %v610_v36 = vld [vmem:[%s4634_s3 + $0xe38] sm:$0xff] }
 0x1f7   : > { %v4248_v46 = vpop.eup %4247  ;;  %3135 = vst [vmem:[%s4667_s16 + $0xd20] sm:$0xff] %v2623_v37  ;;  %v2625_v47 = vadd.f32 0.5, %v2113_v38  ;;  %v2115_v48 = vmul.f32 0.5, %v4246_v41  ;;  %4273 = vtanh.f32 %v1105_v29  ;;  %v1120_v40 = vmul.f32 0.5, %v608_v26  ;;  %v611_v41 = vld [vmem:[%s4634_s3 + $0xe40] sm:$0xff] }
 0x1f8   : > { %v4250_v51 = vpop.eup %4249  ;;  %3136 = vst [vmem:[%s4667_s16 + $0xd28] sm:$0xff] %v2624_v42  ;;  %v2626_v52 = vadd.f32 0.5, %v2114_v43  ;;  %v2116_v53 = vmul.f32 0.5, %v4248_v46  ;;  %4275 = vtanh.f32 %v1106_v34  ;;  %v1121_v45 = vmul.f32 0.5, %v609_v31  ;;  %v612_v46 = vld [vmem:[%s4634_s3 + $0xe48] sm:$0xff] }
 0x1f9   : > { %v4252_v56 = vpop.eup %4251  ;;  %3137 = vst [vmem:[%s4667_s16 + $0xd30] sm:$0xff] %v2625_v47  ;;  %v2627_v57 = vadd.f32 0.5, %v2115_v48  ;;  %v2117_v58 = vmul.f32 0.5, %v4250_v51  ;;  %4277 = vtanh.f32 %v1107_v39  ;;  %v1122_v50 = vmul.f32 0.5, %v610_v36  ;;  %v613_v51 = vld [vmem:[%s4634_s3 + $0xe50] sm:$0xff] }
 0x1fa   : > { %v4254_v61 = vpop.eup %4253  ;;  %3138 = vst [vmem:[%s4667_s16 + $0xd38] sm:$0xff] %v2626_v52  ;;  %v2628_v62 = vadd.f32 0.5, %v2116_v53  ;;  %v2118_v63 = vmul.f32 0.5, %v4252_v56  ;;  %4279 = vtanh.f32 %v1108_v44  ;;  %v1123_v55 = vmul.f32 0.5, %v611_v41  ;;  %v614_v56 = vld [vmem:[%s4634_s3 + $0xe58] sm:$0xff] }
 0x1fb   : > { %v4256_v2 = vpop.eup %4255  ;;  %3139 = vst [vmem:[%s4667_s16 + $0xd40] sm:$0xff] %v2627_v57  ;;  %v2629_v3 = vadd.f32 0.5, %v2117_v58  ;;  %v2119_v4 = vmul.f32 0.5, %v4254_v61  ;;  %4281 = vtanh.f32 %v1109_v49  ;;  %v1124_v60 = vmul.f32 0.5, %v612_v46  ;;  %v615_v61 = vld [vmem:[%s4634_s3 + $0xe60] sm:$0xff] }
 0x1fc   : > { %v4258_v7 = vpop.eup %4257  ;;  %3140 = vst [vmem:[%s4667_s16 + $0xd48] sm:$0xff] %v2628_v62  ;;  %v2630_v8 = vadd.f32 0.5, %v2118_v63  ;;  %v2120_v9 = vmul.f32 0.5, %v4256_v2  ;;  %4283 = vtanh.f32 %v1110_v54  ;;  %v1125_v1 = vmul.f32 0.5, %v613_v51  ;;  %v616_v2 = vld [vmem:[%s4634_s3 + $0xe68] sm:$0xff] }
 0x1fd   : > { %v4260_v12 = vpop.eup %4259  ;;  %3141 = vst [vmem:[%s4667_s16 + $0xd50] sm:$0xff] %v2629_v3  ;;  %v2631_v13 = vadd.f32 0.5, %v2119_v4  ;;  %v2121_v14 = vmul.f32 0.5, %v4258_v7  ;;  %4285 = vtanh.f32 %v1111_v59  ;;  %v1126_v6 = vmul.f32 0.5, %v614_v56  ;;  %v617_v7 = vld [vmem:[%s4634_s3 + $0xe70] sm:$0xff] }
 0x1fe   : > { %v4262_v17 = vpop.eup %4261  ;;  %3142 = vst [vmem:[%s4667_s16 + $0xd58] sm:$0xff] %v2630_v8  ;;  %v2632_v18 = vadd.f32 0.5, %v2120_v9  ;;  %v2122_v19 = vmul.f32 0.5, %v4260_v12  ;;  %4287 = vtanh.f32 %v1112_v0  ;;  %v1127_v11 = vmul.f32 0.5, %v615_v61  ;;  %v618_v12 = vld [vmem:[%s4634_s3 + $0xe78] sm:$0xff] }
 0x1ff   : > { %v4264_v22 = vpop.eup %4263  ;;  %3143 = vst [vmem:[%s4667_s16 + $0xd60] sm:$0xff] %v2631_v13  ;;  %v2633_v23 = vadd.f32 0.5, %v2121_v14  ;;  %v2123_v24 = vmul.f32 0.5, %v4262_v17  ;;  %4289 = vtanh.f32 %v1113_v5  ;;  %v1128_v16 = vmul.f32 0.5, %v616_v2  ;;  %v619_v17 = vld [vmem:[%s4634_s3 + $0xe80] sm:$0xff] }
 0x200   : > { %v4266_v27 = vpop.eup %4265  ;;  %3144 = vst [vmem:[%s4667_s16 + $0xd68] sm:$0xff] %v2632_v18  ;;  %v2634_v28 = vadd.f32 0.5, %v2122_v19  ;;  %v2124_v29 = vmul.f32 0.5, %v4264_v22  ;;  %4291 = vtanh.f32 %v1114_v10  ;;  %v1129_v21 = vmul.f32 0.5, %v617_v7  ;;  %v620_v22 = vld [vmem:[%s4634_s3 + $0xe88] sm:$0xff] }
 0x201   : > { %v4268_v32 = vpop.eup %4267  ;;  %3145 = vst [vmem:[%s4667_s16 + $0xd70] sm:$0xff] %v2633_v23  ;;  %v2635_v33 = vadd.f32 0.5, %v2123_v24  ;;  %v2125_v34 = vmul.f32 0.5, %v4266_v27  ;;  %4293 = vtanh.f32 %v1115_v15  ;;  %v1130_v26 = vmul.f32 0.5, %v618_v12  ;;  %v621_v27 = vld [vmem:[%s4634_s3 + $0xe90] sm:$0xff] }
 0x202   : > { %v4270_v37 = vpop.eup %4269  ;;  %3146 = vst [vmem:[%s4667_s16 + $0xd78] sm:$0xff] %v2634_v28  ;;  %v2636_v38 = vadd.f32 0.5, %v2124_v29  ;;  %v2126_v39 = vmul.f32 0.5, %v4268_v32  ;;  %4295 = vtanh.f32 %v1116_v20  ;;  %v1131_v31 = vmul.f32 0.5, %v619_v17  ;;  %v622_v32 = vld [vmem:[%s4634_s3 + $0xe98] sm:$0xff] }
 0x203   : > { %v4272_v42 = vpop.eup %4271  ;;  %3147 = vst [vmem:[%s4667_s16 + $0xd80] sm:$0xff] %v2635_v33  ;;  %v2637_v43 = vadd.f32 0.5, %v2125_v34  ;;  %v2127_v44 = vmul.f32 0.5, %v4270_v37  ;;  %4297 = vtanh.f32 %v1117_v25  ;;  %v1132_v36 = vmul.f32 0.5, %v620_v22  ;;  %v623_v37 = vld [vmem:[%s4634_s3 + $0xea0] sm:$0xff] }
 0x204   : > { %v4274_v47 = vpop.eup %4273  ;;  %3148 = vst [vmem:[%s4667_s16 + $0xd88] sm:$0xff] %v2636_v38  ;;  %v2638_v48 = vadd.f32 0.5, %v2126_v39  ;;  %v2128_v49 = vmul.f32 0.5, %v4272_v42  ;;  %4299 = vtanh.f32 %v1118_v30  ;;  %v1133_v41 = vmul.f32 0.5, %v621_v27  ;;  %v624_v42 = vld [vmem:[%s4634_s3 + $0xea8] sm:$0xff] }
 0x205   : > { %v4276_v52 = vpop.eup %4275  ;;  %3149 = vst [vmem:[%s4667_s16 + $0xd90] sm:$0xff] %v2637_v43  ;;  %v2639_v53 = vadd.f32 0.5, %v2127_v44  ;;  %v2129_v54 = vmul.f32 0.5, %v4274_v47  ;;  %4301 = vtanh.f32 %v1119_v35  ;;  %v1134_v46 = vmul.f32 0.5, %v622_v32  ;;  %v625_v47 = vld [vmem:[%s4634_s3 + $0xeb0] sm:$0xff] }
 0x206   : > { %v4278_v57 = vpop.eup %4277  ;;  %3150 = vst [vmem:[%s4667_s16 + $0xd98] sm:$0xff] %v2638_v48  ;;  %v2640_v58 = vadd.f32 0.5, %v2128_v49  ;;  %v2130_v59 = vmul.f32 0.5, %v4276_v52  ;;  %4303 = vtanh.f32 %v1120_v40  ;;  %v1135_v51 = vmul.f32 0.5, %v623_v37  ;;  %v626_v52 = vld [vmem:[%s4634_s3 + $0xeb8] sm:$0xff] }
 0x207   : > { %v4280_v62 = vpop.eup %4279  ;;  %3151 = vst [vmem:[%s4667_s16 + $0xda0] sm:$0xff] %v2639_v53  ;;  %v2641_v63 = vadd.f32 0.5, %v2129_v54  ;;  %v2131_v0 = vmul.f32 0.5, %v4278_v57  ;;  %4305 = vtanh.f32 %v1121_v45  ;;  %v1136_v56 = vmul.f32 0.5, %v624_v42  ;;  %v627_v57 = vld [vmem:[%s4634_s3 + $0xec0] sm:$0xff] }
 0x208   : > { %v4282_v3 = vpop.eup %4281  ;;  %3152 = vst [vmem:[%s4667_s16 + $0xda8] sm:$0xff] %v2640_v58  ;;  %v2642_v4 = vadd.f32 0.5, %v2130_v59  ;;  %v2132_v5 = vmul.f32 0.5, %v4280_v62  ;;  %4307 = vtanh.f32 %v1122_v50  ;;  %v1137_v61 = vmul.f32 0.5, %v625_v47  ;;  %v628_v62 = vld [vmem:[%s4634_s3 + $0xec8] sm:$0xff] }
 0x209   : > { %v4284_v8 = vpop.eup %4283  ;;  %3153 = vst [vmem:[%s4667_s16 + $0xdb0] sm:$0xff] %v2641_v63  ;;  %v2643_v9 = vadd.f32 0.5, %v2131_v0  ;;  %v2133_v10 = vmul.f32 0.5, %v4282_v3  ;;  %4309 = vtanh.f32 %v1123_v55  ;;  %v1138_v2 = vmul.f32 0.5, %v626_v52  ;;  %v629_v3 = vld [vmem:[%s4634_s3 + $0xed0] sm:$0xff] }
 0x20a   : > { %v4286_v13 = vpop.eup %4285  ;;  %3154 = vst [vmem:[%s4667_s16 + $0xdb8] sm:$0xff] %v2642_v4  ;;  %v2644_v14 = vadd.f32 0.5, %v2132_v5  ;;  %v2134_v15 = vmul.f32 0.5, %v4284_v8  ;;  %4311 = vtanh.f32 %v1124_v60  ;;  %v1139_v7 = vmul.f32 0.5, %v627_v57  ;;  %v630_v8 = vld [vmem:[%s4634_s3 + $0xed8] sm:$0xff] }
 0x20b   : > { %v4288_v18 = vpop.eup %4287  ;;  %3155 = vst [vmem:[%s4667_s16 + $0xdc0] sm:$0xff] %v2643_v9  ;;  %v2645_v19 = vadd.f32 0.5, %v2133_v10  ;;  %v2135_v20 = vmul.f32 0.5, %v4286_v13  ;;  %4313 = vtanh.f32 %v1125_v1  ;;  %v1140_v12 = vmul.f32 0.5, %v628_v62  ;;  %v631_v13 = vld [vmem:[%s4634_s3 + $0xee0] sm:$0xff] }
 0x20c   : > { %v4290_v23 = vpop.eup %4289  ;;  %3156 = vst [vmem:[%s4667_s16 + $0xdc8] sm:$0xff] %v2644_v14  ;;  %v2646_v24 = vadd.f32 0.5, %v2134_v15  ;;  %v2136_v25 = vmul.f32 0.5, %v4288_v18  ;;  %4315 = vtanh.f32 %v1126_v6  ;;  %v1141_v17 = vmul.f32 0.5, %v629_v3  ;;  %v632_v18 = vld [vmem:[%s4634_s3 + $0xee8] sm:$0xff] }
 0x20d   : > { %v4292_v28 = vpop.eup %4291  ;;  %3157 = vst [vmem:[%s4667_s16 + $0xdd0] sm:$0xff] %v2645_v19  ;;  %v2647_v29 = vadd.f32 0.5, %v2135_v20  ;;  %v2137_v30 = vmul.f32 0.5, %v4290_v23  ;;  %4317 = vtanh.f32 %v1127_v11  ;;  %v1142_v22 = vmul.f32 0.5, %v630_v8  ;;  %v633_v23 = vld [vmem:[%s4634_s3 + $0xef0] sm:$0xff] }
 0x20e   : > { %v4294_v33 = vpop.eup %4293  ;;  %3158 = vst [vmem:[%s4667_s16 + $0xdd8] sm:$0xff] %v2646_v24  ;;  %v2648_v34 = vadd.f32 0.5, %v2136_v25  ;;  %v2138_v35 = vmul.f32 0.5, %v4292_v28  ;;  %4319 = vtanh.f32 %v1128_v16  ;;  %v1143_v27 = vmul.f32 0.5, %v631_v13  ;;  %v634_v28 = vld [vmem:[%s4634_s3 + $0xef8] sm:$0xff] }
 0x20f   : > { %v4296_v38 = vpop.eup %4295  ;;  %3159 = vst [vmem:[%s4667_s16 + $0xde0] sm:$0xff] %v2647_v29  ;;  %v2649_v39 = vadd.f32 0.5, %v2137_v30  ;;  %v2139_v40 = vmul.f32 0.5, %v4294_v33  ;;  %4321 = vtanh.f32 %v1129_v21  ;;  %v1144_v32 = vmul.f32 0.5, %v632_v18  ;;  %v635_v33 = vld [vmem:[%s4634_s3 + $0xf00] sm:$0xff] }
 0x210   : > { %v4298_v43 = vpop.eup %4297  ;;  %3160 = vst [vmem:[%s4667_s16 + $0xde8] sm:$0xff] %v2648_v34  ;;  %v2650_v44 = vadd.f32 0.5, %v2138_v35  ;;  %v2140_v45 = vmul.f32 0.5, %v4296_v38  ;;  %4323 = vtanh.f32 %v1130_v26  ;;  %v1145_v37 = vmul.f32 0.5, %v633_v23  ;;  %v636_v38 = vld [vmem:[%s4634_s3 + $0xf08] sm:$0xff] }
 0x211   : > { %v4300_v48 = vpop.eup %4299  ;;  %3161 = vst [vmem:[%s4667_s16 + $0xdf0] sm:$0xff] %v2649_v39  ;;  %v2651_v49 = vadd.f32 0.5, %v2139_v40  ;;  %v2141_v50 = vmul.f32 0.5, %v4298_v43  ;;  %4325 = vtanh.f32 %v1131_v31  ;;  %v1146_v42 = vmul.f32 0.5, %v634_v28  ;;  %v637_v43 = vld [vmem:[%s4634_s3 + $0xf10] sm:$0xff] }
 0x212   : > { %v4302_v53 = vpop.eup %4301  ;;  %3162 = vst [vmem:[%s4667_s16 + $0xdf8] sm:$0xff] %v2650_v44  ;;  %v2652_v54 = vadd.f32 0.5, %v2140_v45  ;;  %v2142_v55 = vmul.f32 0.5, %v4300_v48  ;;  %4327 = vtanh.f32 %v1132_v36  ;;  %v1147_v47 = vmul.f32 0.5, %v635_v33  ;;  %v638_v48 = vld [vmem:[%s4634_s3 + $0xf18] sm:$0xff] }
 0x213   : > { %v4304_v58 = vpop.eup %4303  ;;  %3163 = vst [vmem:[%s4667_s16 + $0xe00] sm:$0xff] %v2651_v49  ;;  %v2653_v59 = vadd.f32 0.5, %v2141_v50  ;;  %v2143_v60 = vmul.f32 0.5, %v4302_v53  ;;  %4329 = vtanh.f32 %v1133_v41  ;;  %v1148_v52 = vmul.f32 0.5, %v636_v38  ;;  %v639_v53 = vld [vmem:[%s4634_s3 + $0xf20] sm:$0xff] }
 0x214   : > { %v4306_v63 = vpop.eup %4305  ;;  %3164 = vst [vmem:[%s4667_s16 + $0xe08] sm:$0xff] %v2652_v54  ;;  %v2654_v0 = vadd.f32 0.5, %v2142_v55  ;;  %v2144_v1 = vmul.f32 0.5, %v4304_v58  ;;  %4331 = vtanh.f32 %v1134_v46  ;;  %v1149_v57 = vmul.f32 0.5, %v637_v43  ;;  %v640_v58 = vld [vmem:[%s4634_s3 + $0xf28] sm:$0xff] }
 0x215   : > { %v4308_v4 = vpop.eup %4307  ;;  %3165 = vst [vmem:[%s4667_s16 + $0xe10] sm:$0xff] %v2653_v59  ;;  %v2655_v5 = vadd.f32 0.5, %v2143_v60  ;;  %v2145_v6 = vmul.f32 0.5, %v4306_v63  ;;  %4333 = vtanh.f32 %v1135_v51  ;;  %v1150_v62 = vmul.f32 0.5, %v638_v48  ;;  %v641_v63 = vld [vmem:[%s4634_s3 + $0xf30] sm:$0xff] }
 0x216   : > { %v4310_v9 = vpop.eup %4309  ;;  %3166 = vst [vmem:[%s4667_s16 + $0xe18] sm:$0xff] %v2654_v0  ;;  %v2656_v10 = vadd.f32 0.5, %v2144_v1  ;;  %v2146_v11 = vmul.f32 0.5, %v4308_v4  ;;  %4335 = vtanh.f32 %v1136_v56  ;;  %v1151_v3 = vmul.f32 0.5, %v639_v53  ;;  %v642_v4 = vld [vmem:[%s4634_s3 + $0xf38] sm:$0xff] }
 0x217   : > { %v4312_v14 = vpop.eup %4311  ;;  %3167 = vst [vmem:[%s4667_s16 + $0xe20] sm:$0xff] %v2655_v5  ;;  %v2657_v15 = vadd.f32 0.5, %v2145_v6  ;;  %v2147_v16 = vmul.f32 0.5, %v4310_v9  ;;  %4337 = vtanh.f32 %v1137_v61  ;;  %v1152_v8 = vmul.f32 0.5, %v640_v58  ;;  %v643_v9 = vld [vmem:[%s4634_s3 + $0xf40] sm:$0xff] }
 0x218   : > { %v4314_v19 = vpop.eup %4313  ;;  %3168 = vst [vmem:[%s4667_s16 + $0xe28] sm:$0xff] %v2656_v10  ;;  %v2658_v20 = vadd.f32 0.5, %v2146_v11  ;;  %v2148_v21 = vmul.f32 0.5, %v4312_v14  ;;  %4339 = vtanh.f32 %v1138_v2  ;;  %v1153_v13 = vmul.f32 0.5, %v641_v63  ;;  %v644_v14 = vld [vmem:[%s4634_s3 + $0xf48] sm:$0xff] }
 0x219   : > { %v4316_v24 = vpop.eup %4315  ;;  %3169 = vst [vmem:[%s4667_s16 + $0xe30] sm:$0xff] %v2657_v15  ;;  %v2659_v25 = vadd.f32 0.5, %v2147_v16  ;;  %v2149_v26 = vmul.f32 0.5, %v4314_v19  ;;  %4341 = vtanh.f32 %v1139_v7  ;;  %v1154_v18 = vmul.f32 0.5, %v642_v4  ;;  %v645_v19 = vld [vmem:[%s4634_s3 + $0xf50] sm:$0xff] }
 0x21a   : > { %v4318_v29 = vpop.eup %4317  ;;  %3170 = vst [vmem:[%s4667_s16 + $0xe38] sm:$0xff] %v2658_v20  ;;  %v2660_v30 = vadd.f32 0.5, %v2148_v21  ;;  %v2150_v31 = vmul.f32 0.5, %v4316_v24  ;;  %4343 = vtanh.f32 %v1140_v12  ;;  %v1155_v23 = vmul.f32 0.5, %v643_v9  ;;  %v646_v24 = vld [vmem:[%s4634_s3 + $0xf58] sm:$0xff] }
 0x21b   : > { %v4320_v34 = vpop.eup %4319  ;;  %3171 = vst [vmem:[%s4667_s16 + $0xe40] sm:$0xff] %v2659_v25  ;;  %v2661_v35 = vadd.f32 0.5, %v2149_v26  ;;  %v2151_v36 = vmul.f32 0.5, %v4318_v29  ;;  %4345 = vtanh.f32 %v1141_v17  ;;  %v1156_v28 = vmul.f32 0.5, %v644_v14  ;;  %v647_v29 = vld [vmem:[%s4634_s3 + $0xf60] sm:$0xff] }
 0x21c   : > { %v4322_v39 = vpop.eup %4321  ;;  %3172 = vst [vmem:[%s4667_s16 + $0xe48] sm:$0xff] %v2660_v30  ;;  %v2662_v40 = vadd.f32 0.5, %v2150_v31  ;;  %v2152_v41 = vmul.f32 0.5, %v4320_v34  ;;  %4347 = vtanh.f32 %v1142_v22  ;;  %v1157_v33 = vmul.f32 0.5, %v645_v19  ;;  %v648_v34 = vld [vmem:[%s4634_s3 + $0xf68] sm:$0xff] }
 0x21d   : > { %v4324_v44 = vpop.eup %4323  ;;  %3173 = vst [vmem:[%s4667_s16 + $0xe50] sm:$0xff] %v2661_v35  ;;  %v2663_v45 = vadd.f32 0.5, %v2151_v36  ;;  %v2153_v46 = vmul.f32 0.5, %v4322_v39  ;;  %4349 = vtanh.f32 %v1143_v27  ;;  %v1158_v38 = vmul.f32 0.5, %v646_v24  ;;  %v649_v39 = vld [vmem:[%s4634_s3 + $0xf70] sm:$0xff] }
 0x21e   : > { %v4326_v49 = vpop.eup %4325  ;;  %3174 = vst [vmem:[%s4667_s16 + $0xe58] sm:$0xff] %v2662_v40  ;;  %v2664_v50 = vadd.f32 0.5, %v2152_v41  ;;  %v2154_v51 = vmul.f32 0.5, %v4324_v44  ;;  %4351 = vtanh.f32 %v1144_v32  ;;  %v1159_v43 = vmul.f32 0.5, %v647_v29  ;;  %v650_v44 = vld [vmem:[%s4634_s3 + $0xf78] sm:$0xff] }
 0x21f   : > { %v4328_v54 = vpop.eup %4327  ;;  %3175 = vst [vmem:[%s4667_s16 + $0xe60] sm:$0xff] %v2663_v45  ;;  %v2665_v55 = vadd.f32 0.5, %v2153_v46  ;;  %v2155_v56 = vmul.f32 0.5, %v4326_v49  ;;  %4353 = vtanh.f32 %v1145_v37  ;;  %v1160_v48 = vmul.f32 0.5, %v648_v34  ;;  %v651_v49 = vld [vmem:[%s4634_s3 + $0xf80] sm:$0xff] }
 0x220   : > { %v4330_v59 = vpop.eup %4329  ;;  %3176 = vst [vmem:[%s4667_s16 + $0xe68] sm:$0xff] %v2664_v50  ;;  %v2666_v60 = vadd.f32 0.5, %v2154_v51  ;;  %v2156_v61 = vmul.f32 0.5, %v4328_v54  ;;  %4355 = vtanh.f32 %v1146_v42  ;;  %v1161_v53 = vmul.f32 0.5, %v649_v39  ;;  %v652_v54 = vld [vmem:[%s4634_s3 + $0xf88] sm:$0xff] }
 0x221   : > { %v4332_v0 = vpop.eup %4331  ;;  %3177 = vst [vmem:[%s4667_s16 + $0xe70] sm:$0xff] %v2665_v55  ;;  %v2667_v1 = vadd.f32 0.5, %v2155_v56  ;;  %v2157_v2 = vmul.f32 0.5, %v4330_v59  ;;  %4357 = vtanh.f32 %v1147_v47  ;;  %v1162_v58 = vmul.f32 0.5, %v650_v44  ;;  %v653_v59 = vld [vmem:[%s4634_s3 + $0xf90] sm:$0xff] }
 0x222   : > { %v4334_v5 = vpop.eup %4333  ;;  %3178 = vst [vmem:[%s4667_s16 + $0xe78] sm:$0xff] %v2666_v60  ;;  %v2668_v6 = vadd.f32 0.5, %v2156_v61  ;;  %v2158_v7 = vmul.f32 0.5, %v4332_v0  ;;  %4359 = vtanh.f32 %v1148_v52  ;;  %v1163_v63 = vmul.f32 0.5, %v651_v49  ;;  %v654_v0 = vld [vmem:[%s4634_s3 + $0xf98] sm:$0xff] }
 0x223   : > { %v4336_v10 = vpop.eup %4335  ;;  %3179 = vst [vmem:[%s4667_s16 + $0xe80] sm:$0xff] %v2667_v1  ;;  %v2669_v11 = vadd.f32 0.5, %v2157_v2  ;;  %v2159_v12 = vmul.f32 0.5, %v4334_v5  ;;  %4361 = vtanh.f32 %v1149_v57  ;;  %v1164_v4 = vmul.f32 0.5, %v652_v54  ;;  %v655_v5 = vld [vmem:[%s4634_s3 + $0xfa0] sm:$0xff] }
 0x224   : > { %v4338_v15 = vpop.eup %4337  ;;  %3180 = vst [vmem:[%s4667_s16 + $0xe88] sm:$0xff] %v2668_v6  ;;  %v2670_v16 = vadd.f32 0.5, %v2158_v7  ;;  %v2160_v17 = vmul.f32 0.5, %v4336_v10  ;;  %4363 = vtanh.f32 %v1150_v62  ;;  %v1165_v9 = vmul.f32 0.5, %v653_v59  ;;  %v656_v10 = vld [vmem:[%s4634_s3 + $0xfa8] sm:$0xff] }
 0x225   : > { %v4340_v20 = vpop.eup %4339  ;;  %3181 = vst [vmem:[%s4667_s16 + $0xe90] sm:$0xff] %v2669_v11  ;;  %v2671_v21 = vadd.f32 0.5, %v2159_v12  ;;  %v2161_v22 = vmul.f32 0.5, %v4338_v15  ;;  %4365 = vtanh.f32 %v1151_v3  ;;  %v1166_v14 = vmul.f32 0.5, %v654_v0  ;;  %v657_v15 = vld [vmem:[%s4634_s3 + $0xfb0] sm:$0xff] }
 0x226   : > { %v4342_v25 = vpop.eup %4341  ;;  %3182 = vst [vmem:[%s4667_s16 + $0xe98] sm:$0xff] %v2670_v16  ;;  %v2672_v26 = vadd.f32 0.5, %v2160_v17  ;;  %v2162_v27 = vmul.f32 0.5, %v4340_v20  ;;  %4367 = vtanh.f32 %v1152_v8  ;;  %v1167_v19 = vmul.f32 0.5, %v655_v5  ;;  %v658_v20 = vld [vmem:[%s4634_s3 + $0xfb8] sm:$0xff] }
 0x227   : > { %v4344_v30 = vpop.eup %4343  ;;  %3183 = vst [vmem:[%s4667_s16 + $0xea0] sm:$0xff] %v2671_v21  ;;  %v2673_v31 = vadd.f32 0.5, %v2161_v22  ;;  %v2163_v32 = vmul.f32 0.5, %v4342_v25  ;;  %4369 = vtanh.f32 %v1153_v13  ;;  %v1168_v24 = vmul.f32 0.5, %v656_v10  ;;  %v659_v25 = vld [vmem:[%s4634_s3 + $0xfc0] sm:$0xff] }
 0x228   : > { %v4346_v35 = vpop.eup %4345  ;;  %3184 = vst [vmem:[%s4667_s16 + $0xea8] sm:$0xff] %v2672_v26  ;;  %v2674_v36 = vadd.f32 0.5, %v2162_v27  ;;  %v2164_v37 = vmul.f32 0.5, %v4344_v30  ;;  %4371 = vtanh.f32 %v1154_v18  ;;  %v1169_v29 = vmul.f32 0.5, %v657_v15  ;;  %v660_v30 = vld [vmem:[%s4634_s3 + $0xfc8] sm:$0xff] }
 0x229   : > { %v4348_v40 = vpop.eup %4347  ;;  %3185 = vst [vmem:[%s4667_s16 + $0xeb0] sm:$0xff] %v2673_v31  ;;  %v2675_v41 = vadd.f32 0.5, %v2163_v32  ;;  %v2165_v42 = vmul.f32 0.5, %v4346_v35  ;;  %4373 = vtanh.f32 %v1155_v23  ;;  %v1170_v34 = vmul.f32 0.5, %v658_v20  ;;  %v661_v35 = vld [vmem:[%s4634_s3 + $0xfd0] sm:$0xff] }
 0x22a   : > { %v4350_v45 = vpop.eup %4349  ;;  %3186 = vst [vmem:[%s4667_s16 + $0xeb8] sm:$0xff] %v2674_v36  ;;  %v2676_v46 = vadd.f32 0.5, %v2164_v37  ;;  %v2166_v47 = vmul.f32 0.5, %v4348_v40  ;;  %4375 = vtanh.f32 %v1156_v28  ;;  %v1171_v39 = vmul.f32 0.5, %v659_v25  ;;  %v662_v40 = vld [vmem:[%s4634_s3 + $0xfd8] sm:$0xff] }
 0x22b   : > { %v4352_v50 = vpop.eup %4351  ;;  %3187 = vst [vmem:[%s4667_s16 + $0xec0] sm:$0xff] %v2675_v41  ;;  %v2677_v51 = vadd.f32 0.5, %v2165_v42  ;;  %v2167_v52 = vmul.f32 0.5, %v4350_v45  ;;  %4377 = vtanh.f32 %v1157_v33  ;;  %v1172_v44 = vmul.f32 0.5, %v660_v30  ;;  %v663_v45 = vld [vmem:[%s4634_s3 + $0xfe0] sm:$0xff] }
 0x22c   : > { %v4354_v55 = vpop.eup %4353  ;;  %3188 = vst [vmem:[%s4667_s16 + $0xec8] sm:$0xff] %v2676_v46  ;;  %v2678_v56 = vadd.f32 0.5, %v2166_v47  ;;  %v2168_v57 = vmul.f32 0.5, %v4352_v50  ;;  %4379 = vtanh.f32 %v1158_v38  ;;  %v1173_v49 = vmul.f32 0.5, %v661_v35  ;;  %v664_v50 = vld [vmem:[%s4634_s3 + $0xfe8] sm:$0xff] }
 0x22d   : > { %v4356_v60 = vpop.eup %4355  ;;  %3189 = vst [vmem:[%s4667_s16 + $0xed0] sm:$0xff] %v2677_v51  ;;  %v2679_v61 = vadd.f32 0.5, %v2167_v52  ;;  %v2169_v62 = vmul.f32 0.5, %v4354_v55  ;;  %4381 = vtanh.f32 %v1159_v43  ;;  %v1174_v54 = vmul.f32 0.5, %v662_v40  ;;  %v665_v55 = vld [vmem:[%s4634_s3 + $0xff0] sm:$0xff] }
 0x22e   : > { %v4358_v1 = vpop.eup %4357  ;;  %3190 = vst [vmem:[%s4667_s16 + $0xed8] sm:$0xff] %v2678_v56  ;;  %v2680_v2 = vadd.f32 0.5, %v2168_v57  ;;  %v2170_v3 = vmul.f32 0.5, %v4356_v60  ;;  %4383 = vtanh.f32 %v1160_v48  ;;  %v1175_v59 = vmul.f32 0.5, %v663_v45  ;;  %v666_v60 = vld [vmem:[%s4634_s3 + $0xff8] sm:$0xff] }
 0x22f   : > { %v4360_v6 = vpop.eup %4359  ;;  %3191 = vst [vmem:[%s4667_s16 + $0xee0] sm:$0xff] %v2679_v61  ;;  %v2681_v7 = vadd.f32 0.5, %v2169_v62  ;;  %v2171_v8 = vmul.f32 0.5, %v4358_v1  ;;  %4385 = vtanh.f32 %v1161_v53  ;;  %v1176_v0 = vmul.f32 0.5, %v664_v50 }
 0x230   : > { %v4362_v11 = vpop.eup %4361  ;;  %3192 = vst [vmem:[%s4667_s16 + $0xee8] sm:$0xff] %v2680_v2  ;;  %v2682_v12 = vadd.f32 0.5, %v2170_v3  ;;  %v2172_v13 = vmul.f32 0.5, %v4360_v6  ;;  %4387 = vtanh.f32 %v1162_v58 }
 0x231   : > { %v4364_v16 = vpop.eup %4363  ;;  %3193 = vst [vmem:[%s4667_s16 + $0xef0] sm:$0xff] %v2681_v7  ;;  %v2683_v17 = vadd.f32 0.5, %v2171_v8  ;;  %v2173_v18 = vmul.f32 0.5, %v4362_v11  ;;  %4389 = vtanh.f32 %v1163_v63  ;;  %v1178_v8 = vmul.f32 0.5, %v666_v60 }
 0x232   : > { %v4366_v21 = vpop.eup %4365  ;;  %3194 = vst [vmem:[%s4667_s16 + $0xef8] sm:$0xff] %v2682_v12  ;;  %v2684_v22 = vadd.f32 0.5, %v2172_v13  ;;  %v2174_v23 = vmul.f32 0.5, %v4364_v16  ;;  %4391 = vtanh.f32 %v1164_v4  ;;  %v1177_v4 = vmul.f32 0.5, %v665_v55 }
 0x233   : > { %v4368_v26 = vpop.eup %4367  ;;  %3195 = vst [vmem:[%s4667_s16 + $0xf00] sm:$0xff] %v2683_v17  ;;  %v2685_v27 = vadd.f32 0.5, %v2173_v18  ;;  %v2175_v28 = vmul.f32 0.5, %v4366_v21  ;;  %4393 = vtanh.f32 %v1165_v9 }
 0x234   : > { %v4370_v31 = vpop.eup %4369  ;;  %3196 = vst [vmem:[%s4667_s16 + $0xf08] sm:$0xff] %v2684_v22  ;;  %v2686_v32 = vadd.f32 0.5, %v2174_v23  ;;  %v2176_v33 = vmul.f32 0.5, %v4368_v26  ;;  %4395 = vtanh.f32 %v1166_v14 }
 0x235   : > { %v4372_v36 = vpop.eup %4371  ;;  %3197 = vst [vmem:[%s4667_s16 + $0xf10] sm:$0xff] %v2685_v27  ;;  %v2687_v37 = vadd.f32 0.5, %v2175_v28  ;;  %v2177_v38 = vmul.f32 0.5, %v4370_v31  ;;  %4397 = vtanh.f32 %v1167_v19 }
 0x236   : > { %v4374_v41 = vpop.eup %4373  ;;  %3198 = vst [vmem:[%s4667_s16 + $0xf18] sm:$0xff] %v2686_v32  ;;  %v2688_v42 = vadd.f32 0.5, %v2176_v33  ;;  %v2178_v43 = vmul.f32 0.5, %v4372_v36  ;;  %4399 = vtanh.f32 %v1168_v24 }
 0x237   : > { %v4376_v46 = vpop.eup %4375  ;;  %3199 = vst [vmem:[%s4667_s16 + $0xf20] sm:$0xff] %v2687_v37  ;;  %v2689_v47 = vadd.f32 0.5, %v2177_v38  ;;  %v2179_v48 = vmul.f32 0.5, %v4374_v41  ;;  %4401 = vtanh.f32 %v1169_v29 }
 0x238   : > { %v4378_v51 = vpop.eup %4377  ;;  %3200 = vst [vmem:[%s4667_s16 + $0xf28] sm:$0xff] %v2688_v42  ;;  %v2690_v52 = vadd.f32 0.5, %v2178_v43  ;;  %v2180_v53 = vmul.f32 0.5, %v4376_v46  ;;  %4403 = vtanh.f32 %v1170_v34 }
 0x239   : > { %v4380_v56 = vpop.eup %4379  ;;  %3201 = vst [vmem:[%s4667_s16 + $0xf30] sm:$0xff] %v2689_v47  ;;  %v2691_v57 = vadd.f32 0.5, %v2179_v48  ;;  %v2181_v58 = vmul.f32 0.5, %v4378_v51  ;;  %4405 = vtanh.f32 %v1171_v39 }
 0x23a   : > { %v4382_v61 = vpop.eup %4381  ;;  %3202 = vst [vmem:[%s4667_s16 + $0xf38] sm:$0xff] %v2690_v52  ;;  %v2692_v62 = vadd.f32 0.5, %v2180_v53  ;;  %v2182_v63 = vmul.f32 0.5, %v4380_v56  ;;  %4407 = vtanh.f32 %v1172_v44 }
 0x23b   : > { %v4384_v1 = vpop.eup %4383  ;;  %3203 = vst [vmem:[%s4667_s16 + $0xf40] sm:$0xff] %v2691_v57  ;;  %v2693_v2 = vadd.f32 0.5, %v2181_v58  ;;  %v2183_v3 = vmul.f32 0.5, %v4382_v61  ;;  %4409 = vtanh.f32 %v1173_v49 }
 0x23c   : > { %v4386_v5 = vpop.eup %4385  ;;  %3204 = vst [vmem:[%s4667_s16 + $0xf48] sm:$0xff] %v2692_v62  ;;  %v2694_v6 = vadd.f32 0.5, %v2182_v63  ;;  %v2184_v7 = vmul.f32 0.5, %v4384_v1  ;;  %4411 = vtanh.f32 %v1174_v54 }
 0x23d   : > { %v4388_v9 = vpop.eup %4387  ;;  %3205 = vst [vmem:[%s4667_s16 + $0xf50] sm:$0xff] %v2693_v2  ;;  %v2695_v10 = vadd.f32 0.5, %v2183_v3  ;;  %v2185_v11 = vmul.f32 0.5, %v4386_v5  ;;  %4413 = vtanh.f32 %v1175_v59 }
 0x23e   : > { %v4390_v12 = vpop.eup %4389  ;;  %3206 = vst [vmem:[%s4667_s16 + $0xf58] sm:$0xff] %v2694_v6  ;;  %v2696_v13 = vadd.f32 0.5, %v2184_v7  ;;  %v2186_v14 = vmul.f32 0.5, %v4388_v9  ;;  %4415 = vtanh.f32 %v1176_v0 }
 0x23f   : > { %v4392_v15 = vpop.eup %4391  ;;  %3207 = vst [vmem:[%s4667_s16 + $0xf60] sm:$0xff] %v2695_v10  ;;  %v2697_v16 = vadd.f32 0.5, %v2185_v11  ;;  %v2187_v17 = vmul.f32 0.5, %v4390_v12  ;;  %4417 = vtanh.f32 %v1177_v4 }
 0x240   : > { %v4394_v18 = vpop.eup %4393  ;;  %3208 = vst [vmem:[%s4667_s16 + $0xf68] sm:$0xff] %v2696_v13  ;;  %v2698_v19 = vadd.f32 0.5, %v2186_v14  ;;  %v2188_v20 = vmul.f32 0.5, %v4392_v15  ;;  %4419 = vtanh.f32 %v1178_v8 }
 0x241   : > { %v4396_v21 = vpop.eup %4395  ;;  %3209 = vst [vmem:[%s4667_s16 + $0xf70] sm:$0xff] %v2697_v16  ;;  %v2699_v22 = vadd.f32 0.5, %v2187_v17  ;;  %v2189_v23 = vmul.f32 0.5, %v4394_v18 }
 0x242   : > { %v4398_v24 = vpop.eup %4397  ;;  %3210 = vst [vmem:[%s4667_s16 + $0xf78] sm:$0xff] %v2698_v19  ;;  %v2700_v25 = vadd.f32 0.5, %v2188_v20  ;;  %v2190_v26 = vmul.f32 0.5, %v4396_v21 }
 0x243   : > { %v4400_v27 = vpop.eup %4399  ;;  %3211 = vst [vmem:[%s4667_s16 + $0xf80] sm:$0xff] %v2699_v22  ;;  %v2701_v28 = vadd.f32 0.5, %v2189_v23  ;;  %v2191_v29 = vmul.f32 0.5, %v4398_v24 }
 0x244   : > { %v4402_v30 = vpop.eup %4401  ;;  %3212 = vst [vmem:[%s4667_s16 + $0xf88] sm:$0xff] %v2700_v25  ;;  %v2702_v31 = vadd.f32 0.5, %v2190_v26  ;;  %v2192_v32 = vmul.f32 0.5, %v4400_v27 }
 0x245   : > { %v4404_v33 = vpop.eup %4403  ;;  %3213 = vst [vmem:[%s4667_s16 + $0xf90] sm:$0xff] %v2701_v28  ;;  %v2703_v34 = vadd.f32 0.5, %v2191_v29  ;;  %v2193_v35 = vmul.f32 0.5, %v4402_v30 }
 0x246   : > { %v4406_v36 = vpop.eup %4405  ;;  %3214 = vst [vmem:[%s4667_s16 + $0xf98] sm:$0xff] %v2702_v31  ;;  %v2704_v37 = vadd.f32 0.5, %v2192_v32  ;;  %v2194_v38 = vmul.f32 0.5, %v4404_v33 }
 0x247   : > { %v4408_v39 = vpop.eup %4407  ;;  %3215 = vst [vmem:[%s4667_s16 + $0xfa0] sm:$0xff] %v2703_v34  ;;  %v2705_v40 = vadd.f32 0.5, %v2193_v35  ;;  %v2195_v41 = vmul.f32 0.5, %v4406_v36 }
 0x248   : > { %v4410_v42 = vpop.eup %4409  ;;  %3216 = vst [vmem:[%s4667_s16 + $0xfa8] sm:$0xff] %v2704_v37  ;;  %v2706_v43 = vadd.f32 0.5, %v2194_v38  ;;  %v2196_v44 = vmul.f32 0.5, %v4408_v39 }
 0x249   : > { %v4412_v45 = vpop.eup %4411  ;;  %3217 = vst [vmem:[%s4667_s16 + $0xfb0] sm:$0xff] %v2705_v40  ;;  %v2707_v46 = vadd.f32 0.5, %v2195_v41  ;;  %v2197_v47 = vmul.f32 0.5, %v4410_v42 }
 0x24a   : > { %v4414_v48 = vpop.eup %4413  ;;  %3218 = vst [vmem:[%s4667_s16 + $0xfb8] sm:$0xff] %v2706_v43  ;;  %v2708_v49 = vadd.f32 0.5, %v2196_v44  ;;  %v2198_v50 = vmul.f32 0.5, %v4412_v45 }
 0x24b   : > { %v4416_v51 = vpop.eup %4415  ;;  %3219 = vst [vmem:[%s4667_s16 + $0xfc0] sm:$0xff] %v2707_v46  ;;  %v2709_v52 = vadd.f32 0.5, %v2197_v47  ;;  %v2199_v53 = vmul.f32 0.5, %v4414_v48 }
 0x24c   : > { %v4418_v54 = vpop.eup %4417  ;;  %3220 = vst [vmem:[%s4667_s16 + $0xfc8] sm:$0xff] %v2708_v49  ;;  %v2710_v55 = vadd.f32 0.5, %v2198_v50  ;;  %v2200_v56 = vmul.f32 0.5, %v4416_v51 }
 0x24d   : > { %v4420_v57 = vpop.eup %4419  ;;  %3221 = vst [vmem:[%s4667_s16 + $0xfd0] sm:$0xff] %v2709_v52  ;;  %v2711_v58 = vadd.f32 0.5, %v2199_v53  ;;  %v2201_v59 = vmul.f32 0.5, %v4418_v54 }
 0x24e   : > { %3222 = vst [vmem:[%s4667_s16 + $0xfd8] sm:$0xff] %v2710_v55  ;;  %v2712_v60 = vadd.f32 0.5, %v2200_v56  ;;  %v2202_v61 = vmul.f32 0.5, %v4420_v57  ;;  %3234 = sbr.rel (!%p4573_p9) target bundleno = 622 (0x26e), region = 32 }
 0x24f   : > { %3223 = vst [vmem:[%s4667_s16 + $0xfe0] sm:$0xff] %v2711_v58  ;;  %v2713_v62 = vadd.f32 0.5, %v2201_v59 }
 0x250   : > { %3224 = vst [vmem:[%s4667_s16 + $0xfe8] sm:$0xff] %v2712_v60  ;;  %v2714_v63 = vadd.f32 0.5, %v2202_v61 }
 0x251   : > { %3225 = vst [vmem:[%s4667_s16 + $0xff0] sm:$0xff] %v2713_v62 }
 0x252   : > { %3226 = vst [vmem:[%s4667_s16 + $0xff8] sm:$0xff] %v2714_v63 }
 0x253   : > { %s5745_s30 = smov (!%p3237_p6, %s3236_s30), 32 }
 0x254   : > { %s5672_s2 = sshll.u32 %s5745_s30, 11 }
 0x255   : > { %s3242_s4 = ssub.s32 65536, %s5672_s2 }
 0x256   : > { %3243 = vsyncadd %s3228_s23, %s3242_s4  ;;  %p3341_p10 = scmp.ne.s32.totalorder %s5672_s2, 0  ;;  %s3353_s17 = sshll.u32 %s4550_s10, 16 }
 0x257   : > { %s5682_s13 = scalar_lea.hbm %s5731_s1, %s3353_s17  ;;  %s3249_s14 = sshll.u32 %s4667_s16, 4  ;;  %s5685_s14 = int_to_ptr.vmem [resolvable:$true] %s3249_s14 }
 0x258   : > { %s4447_s19 = scalar_lea.vmem %s5685_s14, %s5672_s2  ;;  %s4516_s20 = smov [#allocation5]  }
 0x259   : > { %p4448_p9 = scmp.ne.s32.totalorder %s5685_s14, %s4447_s19  ;;  %s4451_s21 = sshll.u32 %s4516_s20, 4  ;;  %s4452_s21 = int_to_ptr.vmem [resolvable:$false] %s4451_s21 }
 0x25a   : > { %s4453_s10 = scalar_lea.vmem %s4452_s21, 131072  ;;  %p4454_p7 = scmp.lt.s32.totalorder %s5685_s14, %s4452_s21 }
 0x25b   : > { %p4449_p11 = pnand %p4448_p9, %p3341_p10  ;;  %p4455_p8 = scmp.lt.s32.totalorder %s4453_s10, %s4447_s19 }
 0x25d   : > { %p4450_p13 = pneg %p4449_p11  ;;  %p4456_p12 = por %p4455_p8, %p4454_p7 }
 0x25f   : > { %p4457_p0 = pnand %p4456_p12, %p4450_p13 }
 0x261   : > { %4460 = shalt.err (!%p4457_p0)
}
 0x262   : > { %s4461_s22 = scalar_lea.hbm %s5682_s13, %s5672_s2  ;;  %s4465_s28 = scalar_lea.hbm %s5731_s1, 67584 }
 0x263   : > { %p4462_p1 = scmp.ne.s32.totalorder %s5682_s13, %s4461_s22  ;;  %p4466_p4 = scmp.lt.s32.totalorder %s5682_s13, %s5731_s1 }
 0x264   : > { %p4467_p5 = scmp.lt.s32.totalorder %s4465_s28, %s4461_s22 }
 0x265   : > { %p4463_p3 = pnand %p4462_p1, %p3341_p10 }
 0x266   : > { %p4468_p6 = por %p4467_p5, %p4466_p4 }
 0x267   : > { %p4464_p2 = pneg %p4463_p3 }
 0x269   : > { %p4469_p9 = pnand %p4468_p6, %p4464_p2 }
 0x26b   : > { %4472 = shalt.err (!%p4469_p9)
}
 0x26c   : > { %s4517_s16 = smov 2048   ;;  %s4518_s25 = smov 128  }
 0x26d   : > { %3255 = dma.vmem_to_hbm [thread:$0]  (%p3341_p10), %s5685_s14, %s5672_s2, %s5682_s13, %s3228_s23, %s4517_s16, %s4517_s16, %s4518_s25  }
 0x26e PF: > { %s3264_s30 = sand.u32 1, %s4499_s6   ;;  %p5736_p11 = scmp.ne.s32.totalorder %s5735_s18, 0 }
 0x26f   : > { %p5737_p13 = scmp.ge.s32.totalorder %s4511_s9, 2  ;;  %s3265_s4 = scalar_lea.sflag [#allocation4], %s3264_s30 }
 0x271   : > { %p3357_p7 = pnand %p5737_p13, %p5736_p11 }
 0x273   : > { %p3358_p8 = pneg %p3357_p7 }
 0x275   : > { %4494 = dma.done.wait (%p3358_p8), %s3265_s4, 65536  }
 0x276   : > { %4496 = vsyncadd (%p3358_p8), %s3265_s4, 4294901760  ;;  %p14_p12 = scmp.ge.s32.totalorder %s4554_s12, 4   ;;  %s5738_s6 = smov %s4503_s7 }
 0x277   : > { %s5739_s7 = smov %s4507_s8  ;;  %s5740_s8 = smov %s4566_s15 }
 0x278   : > { %s5741_s9 = smov %s4554_s12  ;;  %16 = sbr.rel (!%p14_p12) target bundleno = 5 (0x5), region = 69 }
 0x27d   :  { %3270 = vsyncpa [#allocation3], 1 }
 0x27e   :  { %3272 = vsyncpa [#allocation3 + $0x1], 1 }
 0x27f   :  { %3273 = vsyncpa [#allocation4], 1 }
 0x280   :  { %3275 = vsyncpa [#allocation4 + $0x1], 1 }

</bundles_post_ra>
